<compile_context>
chip_gen: v5e
topology: v5e:2x2
jax: 0.10.0
libtpu: 0.0.40
codegen_flags: <defaults>
</compile_context>

<pallas_src>
import jax
import jax.numpy as jnp
from jax import lax
from jax.experimental import pallas as pl
from jax.experimental.pallas import tpu as pltpu


def _round_up(x, m):
    return (x + m - 1) // m * m


def _vmem_capacity_bytes():
    cap = 64 * 2**20                       # conservative (v7x-sized) fallback
    try:
        info = pltpu.get_tpu_info()
        c = getattr(info, "vmem_capacity_bytes", None)
        if c:
            cap = int(c)
    except Exception:
        pass
    return max(32 * 2**20, min(cap, 128 * 2**20))


def _choose_row_tile(N, H, W, Cin, Cout, budget_bytes):
    """Largest divisor TH2 of H whose per-step VMEM working set fits the budget."""
    sub, lane = 8, 128
    cin_l = _round_up(Cin, lane)
    cout_l = _round_up(Cout, lane)
    c2_l = _round_up(2 * Cout, lane)
    # Whole padded image resident (double-buffered) + packed weights + bias.
    resident = 2 * (H + 2) * _round_up(W + 2, sub) * cin_l * 2
    wbytes = 2 * 16 * _round_up(Cin, sub) * cout_l * 2 + 2 * sub * cout_l * 4

    def fits(th2):
        views = 9 * th2 * _round_up(W, sub) * cin_l * 2      # 9 shifted bf16 views
        accs = 4 * th2 * _round_up(W, sub) * cout_l * 4      # f32 partial sums in flight
        outb = 2 * th2 * 2 * _round_up(W, sub) * c2_l * 4    # double-buffered out block
        return resident + wbytes + views + accs + outb <= budget_bytes

    divisors = [d for d in range(1, H + 1) if H % d == 0]
    fitting = [d for d in divisors if fits(d)]
    th2 = max(fitting) if fitting else 1
    # v7x has 2 TensorCores per chip: keep at least 2 parallel grid steps if possible.
    if N * (H // th2) < 2:
        smaller = [d for d in fitting if d < th2]
        if smaller:
            th2 = max(smaller)
    return th2
    # TODO(synk): very large single images with few channels may not fit the
    # resident-input budget; those would need a manual-DMA row-halo pipeline (P4).


def _make_upconv_kernel(TH2, W, Cin, Cout):
    """One (n, row-tile) step: 4 parity outputs, each = 4 chained (M,Cin)@(Cin,Cout) dots."""

    def kernel(x_ref, w_ref, b_ref, o_ref):
        # x_ref: (H+2, W+2, Cin) bf16  -- whole zero-padded image, resident across tiles
        # w_ref: (16, Cin, Cout) bf16  -- packed 2x2 effective weights [dy, dx, a, b]
        # b_ref: (1, Cout) f32
        # o_ref: (TH2, 2, W, 2*Cout) f32  -- (row, dy, col, dx*Cout + c)
        row0 = pl.program_id(1) * TH2

        # The 9 shifted original-resolution views (1-pixel halo), loaded once, reused.
        views = {}
        for r in range(3):
            for c in range(3):
                v = x_ref[pl.ds(row0 + r, TH2), pl.ds(c, W), :]
                views[(r, c)] = v.reshape(TH2 * W, Cin)

        bias = b_ref[...]                                     # (1, Cout) f32
        for dy in range(2):
            for dx in range(2):
                acc = None
                for a in range(2):
                    for b in range(2):
                        wi = ((dy * 2 + dx) * 2 + a) * 2 + b
                        d = jnp.dot(views[(dy + a, dx + b)], w_ref[wi],
                                    preferred_element_type=jnp.float32)
                        acc = d if acc is None else acc + d   # register accumulation
                y = jnp.maximum(acc + bias, 0.0)              # fused bias + ReLU (f32)
                y = y.reshape(TH2, 1, W, Cout)
                o_ref[:, dy:dy + 1, :, dx * Cout:(dx + 1) * Cout] = y

    return kernel


# Tap-combination matrices: for each output parity, the 3 upsampled taps collapse onto
# 2 original-resolution taps (nearest-neighbour duplication folds neighbouring taps).
_TAP_COMBINE = jnp.array(
    [[[1.0, 0.0, 0.0], [0.0, 1.0, 1.0]],    # parity 0: tap0 <- k0 ; tap1 <- k1 + k2
     [[1.0, 1.0, 0.0], [0.0, 0.0, 1.0]]],   # parity 1: tap0 <- k0 + k1 ; tap1 <- k2
    dtype=jnp.float32)


@jax.jit
def up_conv_forward(x_nchw, w_oihw, bias):
    """Upsample(2x nearest) -> Conv2d(3x3, s=1, p=1, bias) -> ReLU.  NCHW in/out."""
    N, Cin, H, W = x_nchw.shape
    Cout = w_oihw.shape[0]

    # Activations: NHWC bf16, spatial zero-pad(1); channels stay at their true count.
    x = jnp.transpose(x_nchw, (0, 2, 3, 1)).astype(jnp.bfloat16)
    xp = jnp.pad(x, ((0, 0), (1, 1), (1, 1), (0, 0)))         # (N, H+2, W+2, Cin)

    # Weights: fold the nearest-2x upsample into 4 parity-dependent 2x2 kernels.
    w = jnp.transpose(w_oihw, (2, 3, 1, 0)).astype(jnp.float32)       # (3, 3, Cin, Cout)
    wg = jnp.einsum('yak,xbl,klio->yxabio', _TAP_COMBINE, _TAP_COMBINE, w)
    wg = wg.reshape(16, Cin, Cout).astype(jnp.bfloat16)               # [dy,dx,a,b] packed
    b2 = bias.reshape(1, Cout).astype(jnp.float32)

    cap = _vmem_capacity_bytes()
    TH2 = _choose_row_tile(N, H, W, Cin, Cout, budget_bytes=int(cap * 0.45))
    nt = H // TH2

    flops = 2 * N * H * W * 16 * Cin * Cout                    # 4 parities x 4 taps
    bytes_accessed = (xp.size * 2 + wg.size * 2 + b2.size * 4
                      + N * H * 2 * W * 2 * Cout * 4)

    out5 = pl.pallas_call(
        _make_upconv_kernel(TH2, W, Cin, Cout),
        out_shape=jax.ShapeDtypeStruct((N, H, 2, W, 2 * Cout), jnp.float32),
        grid=(N, nt),
        in_specs=[
            # Whole padded image per n; index ignores t -> stays resident across tiles.
            pl.BlockSpec((None, H + 2, W + 2, Cin), lambda n, t: (n, 0, 0, 0)),
            pl.BlockSpec((16, Cin, Cout), lambda n, t: (0, 0, 0)),
            pl.BlockSpec((1, Cout), lambda n, t: (0, 0)),
        ],
        out_specs=pl.BlockSpec((None, TH2, 2, W, 2 * Cout),
                               lambda n, t: (n, t, 0, 0, 0)),
        compiler_params=pltpu.CompilerParams(
            dimension_semantics=("parallel", "parallel"),
            vmem_limit_bytes=max(32 * 2**20,
                                 min(int(cap * 0.85), cap - (8 << 20)))),
        cost_estimate=pl.CostEstimate(flops=flops, transcendentals=0,
                                      bytes_accessed=bytes_accessed),
    )(xp, wg, b2)

    # (N, H, 2, W, 2*Cout) is bit-identical to NHWC (N, 2H, 2W, Cout): reshape is free.
    out = out5.reshape(N, 2 * H, 2 * W, Cout)
    return jnp.transpose(out, (0, 3, 1, 2))                    # back to NCHW (module API)


# ----------------------------- pure-JAX reference ---------------------------

def ref_forward(x_nchw, w_oihw, bias):
    # Straightforward upsample + conv + ReLU (inputs rounded to bf16 to match the
    # kernel's activation/weight dtype; math in f32).
    x = x_nchw.astype(jnp.bfloat16).astype(jnp.float32)
    w = w_oihw.astype(jnp.bfloat16).astype(jnp.float32)
    xu = jnp.repeat(jnp.repeat(x, 2, axis=2), 2, axis=3)       # nearest 2x
    y = lax.conv_general_dilated(
        xu, w, (1, 1), [(1, 1), (1, 1)],
        dimension_numbers=("NCHW", "OIHW", "NCHW"),
        precision=lax.Precision.HIGHEST)
    return jnp.maximum(y + bias[None, :, None, None], 0.0)


# --------------------------------- main -------------------------------------

if __name__ == "__main__":
    key = jax.random.PRNGKey(0)
    kx, kw, kb = jax.random.split(key, 3)

    N, in_ch, out_ch, H, W = 2, 4, 8, 16, 16
    x = jax.random.normal(kx, (N, in_ch, H, W), jnp.float32)
    w = jax.random.normal(kw, (out_ch, in_ch, 3, 3), jnp.float32) / jnp.sqrt(in_ch * 9.0)
    b = 0.01 * jax.random.normal(kb, (out_ch,), jnp.float32)

    out = jax.block_until_ready(up_conv_forward(x, w, b))
    ref = jax.block_until_ready(ref_forward(x, w, b))

    assert out.shape == (N, out_ch, 2 * H, 2 * W), out.shape
    max_err = float(jnp.max(jnp.abs(out - ref)))
    # bf16 activations/weights (and bf16-rounded combined taps) vs f32-math reference.
    assert jnp.allclose(out, ref, atol=3e-2, rtol=3e-2), max_err

    print("KERNEL_OK")
</pallas_src>

<mosaic_0001>
module attributes {stable_mosaic.version = 11 : i64} {
  func.func @kernel(%arg0: i32, %arg1: i32, %arg2: memref<1x18x18x4xbf16, #tpu.memory_space<vmem>>, %arg3: memref<16x4x8xbf16, #tpu.memory_space<vmem>>, %arg4: memref<1x8xf32, #tpu.memory_space<vmem>>, %arg5: memref<1x16x2x16x16xf32, #tpu.memory_space<vmem>>) attributes {dimension_semantics = [#tpu.dimension_semantics<parallel>, #tpu.dimension_semantics<parallel>], iteration_bounds = array<i64: 2, 1>, scalar_prefetch = 0 : i64, scratch_operands = 0 : i64, tpu.core_type = #tpu.core_type<tc>, window_params = [{transform_indices = @transform_0, window_bounds = array<i64: 1, 18, 18, 4>}, {pipeline_mode = #tpu.pipeline_mode<synchronous>, transform_indices = @transform_1, window_bounds = array<i64: 16, 4, 8>}, {pipeline_mode = #tpu.pipeline_mode<synchronous>, transform_indices = @transform_2, window_bounds = array<i64: 1, 8>}, {transform_indices = @transform_3, window_bounds = array<i64: 1, 16, 2, 16, 16>}]} {
    %c16_i32 = arith.constant 16 : i32
    %0 = arith.muli %arg1, %c16_i32 : i32
    %c0_i32 = arith.constant 0 : i32
    %1 = arith.addi %0, %c0_i32 : i32
    %c0 = arith.constant 0 : index
    %2 = arith.index_cast %1 : i32 to index
    %c0_0 = arith.constant 0 : index
    %c0_1 = arith.constant 0 : index
    %3 = vector.load %arg2[%c0, %2, %c0_0, %c0_1] : memref<1x18x18x4xbf16, #tpu.memory_space<vmem>>, vector<1x16x16x4xbf16>
    %4 = vector.shape_cast %3 : vector<1x16x16x4xbf16> to vector<16x16x4xbf16>
    %5 = vector.shape_cast %4 : vector<16x16x4xbf16> to vector<256x4xbf16>
    %c0_i32_2 = arith.constant 0 : i32
    %6 = arith.addi %0, %c0_i32_2 : i32
    %c0_3 = arith.constant 0 : index
    %7 = arith.index_cast %6 : i32 to index
    %c1 = arith.constant 1 : index
    %c0_4 = arith.constant 0 : index
    %8 = vector.load %arg2[%c0_3, %7, %c1, %c0_4] : memref<1x18x18x4xbf16, #tpu.memory_space<vmem>>, vector<1x16x16x4xbf16>
    %9 = vector.shape_cast %8 : vector<1x16x16x4xbf16> to vector<16x16x4xbf16>
    %10 = vector.shape_cast %9 : vector<16x16x4xbf16> to vector<256x4xbf16>
    %c0_i32_5 = arith.constant 0 : i32
    %11 = arith.addi %0, %c0_i32_5 : i32
    %c0_6 = arith.constant 0 : index
    %12 = arith.index_cast %11 : i32 to index
    %c2 = arith.constant 2 : index
    %c0_7 = arith.constant 0 : index
    %13 = vector.load %arg2[%c0_6, %12, %c2, %c0_7] : memref<1x18x18x4xbf16, #tpu.memory_space<vmem>>, vector<1x16x16x4xbf16>
    %14 = vector.shape_cast %13 : vector<1x16x16x4xbf16> to vector<16x16x4xbf16>
    %15 = vector.shape_cast %14 : vector<16x16x4xbf16> to vector<256x4xbf16>
    %c1_i32 = arith.constant 1 : i32
    %16 = arith.addi %0, %c1_i32 : i32
    %c0_8 = arith.constant 0 : index
    %17 = arith.index_cast %16 : i32 to index
    %c0_9 = arith.constant 0 : index
    %c0_10 = arith.constant 0 : index
    %18 = vector.load %arg2[%c0_8, %17, %c0_9, %c0_10] : memref<1x18x18x4xbf16, #tpu.memory_space<vmem>>, vector<1x16x16x4xbf16>
    %19 = vector.shape_cast %18 : vector<1x16x16x4xbf16> to vector<16x16x4xbf16>
    %20 = vector.shape_cast %19 : vector<16x16x4xbf16> to vector<256x4xbf16>
    %c1_i32_11 = arith.constant 1 : i32
    %21 = arith.addi %0, %c1_i32_11 : i32
    %c0_12 = arith.constant 0 : index
    %22 = arith.index_cast %21 : i32 to index
    %c1_13 = arith.constant 1 : index
    %c0_14 = arith.constant 0 : index
    %23 = vector.load %arg2[%c0_12, %22, %c1_13, %c0_14] : memref<1x18x18x4xbf16, #tpu.memory_space<vmem>>, vector<1x16x16x4xbf16>
    %24 = vector.shape_cast %23 : vector<1x16x16x4xbf16> to vector<16x16x4xbf16>
    %25 = vector.shape_cast %24 : vector<16x16x4xbf16> to vector<256x4xbf16>
    %c1_i32_15 = arith.constant 1 : i32
    %26 = arith.addi %0, %c1_i32_15 : i32
    %c0_16 = arith.constant 0 : index
    %27 = arith.index_cast %26 : i32 to index
    %c2_17 = arith.constant 2 : index
    %c0_18 = arith.constant 0 : index
    %28 = vector.load %arg2[%c0_16, %27, %c2_17, %c0_18] : memref<1x18x18x4xbf16, #tpu.memory_space<vmem>>, vector<1x16x16x4xbf16>
    %29 = vector.shape_cast %28 : vector<1x16x16x4xbf16> to vector<16x16x4xbf16>
    %30 = vector.shape_cast %29 : vector<16x16x4xbf16> to vector<256x4xbf16>
    %c2_i32 = arith.constant 2 : i32
    %31 = arith.addi %0, %c2_i32 : i32
    %c0_19 = arith.constant 0 : index
    %32 = arith.index_cast %31 : i32 to index
    %c0_20 = arith.constant 0 : index
    %c0_21 = arith.constant 0 : index
    %33 = vector.load %arg2[%c0_19, %32, %c0_20, %c0_21] : memref<1x18x18x4xbf16, #tpu.memory_space<vmem>>, vector<1x16x16x4xbf16>
    %34 = vector.shape_cast %33 : vector<1x16x16x4xbf16> to vector<16x16x4xbf16>
    %35 = vector.shape_cast %34 : vector<16x16x4xbf16> to vector<256x4xbf16>
    %c2_i32_22 = arith.constant 2 : i32
    %36 = arith.addi %0, %c2_i32_22 : i32
    %c0_23 = arith.constant 0 : index
    %37 = arith.index_cast %36 : i32 to index
    %c1_24 = arith.constant 1 : index
    %c0_25 = arith.constant 0 : index
    %38 = vector.load %arg2[%c0_23, %37, %c1_24, %c0_25] : memref<1x18x18x4xbf16, #tpu.memory_space<vmem>>, vector<1x16x16x4xbf16>
    %39 = vector.shape_cast %38 : vector<1x16x16x4xbf16> to vector<16x16x4xbf16>
    %40 = vector.shape_cast %39 : vector<16x16x4xbf16> to vector<256x4xbf16>
    %c2_i32_26 = arith.constant 2 : i32
    %41 = arith.addi %0, %c2_i32_26 : i32
    %c0_27 = arith.constant 0 : index
    %42 = arith.index_cast %41 : i32 to index
    %c2_28 = arith.constant 2 : index
    %c0_29 = arith.constant 0 : index
    %43 = vector.load %arg2[%c0_27, %42, %c2_28, %c0_29] : memref<1x18x18x4xbf16, #tpu.memory_space<vmem>>, vector<1x16x16x4xbf16>
    %44 = vector.shape_cast %43 : vector<1x16x16x4xbf16> to vector<16x16x4xbf16>
    %45 = vector.shape_cast %44 : vector<16x16x4xbf16> to vector<256x4xbf16>
    %c0_30 = arith.constant 0 : index
    %c0_31 = arith.constant 0 : index
    %46 = vector.load %arg4[%c0_30, %c0_31] : memref<1x8xf32, #tpu.memory_space<vmem>>, vector<1x8xf32>
    %c0_32 = arith.constant 0 : index
    %c0_33 = arith.constant 0 : index
    %c0_34 = arith.constant 0 : index
    %47 = vector.load %arg3[%c0_32, %c0_33, %c0_34] : memref<16x4x8xbf16, #tpu.memory_space<vmem>>, vector<1x4x8xbf16>
    %48 = vector.shape_cast %47 : vector<1x4x8xbf16> to vector<4x8xbf16>
    %cst = arith.constant dense<0.000000e+00> : vector<256x8xf32>
    %49 = tpu.matmul %5, %48, %cst {dimension_numbers = #tpu.dot_dimension_numbers<[1], [0], [0], [1], [0, 0, 1, 1], [], []>} : vector<256x4xbf16>, vector<4x8xbf16>, vector<256x8xf32> -> vector<256x8xf32>
    %c1_35 = arith.constant 1 : index
    %c0_36 = arith.constant 0 : index
    %c0_37 = arith.constant 0 : index
    %50 = vector.load %arg3[%c1_35, %c0_36, %c0_37] : memref<16x4x8xbf16, #tpu.memory_space<vmem>>, vector<1x4x8xbf16>
    %51 = vector.shape_cast %50 : vector<1x4x8xbf16> to vector<4x8xbf16>
    %cst_38 = arith.constant dense<0.000000e+00> : vector<256x8xf32>
    %52 = tpu.matmul %10, %51, %cst_38 {dimension_numbers = #tpu.dot_dimension_numbers<[1], [0], [0], [1], [0, 0, 1, 1], [], []>} : vector<256x4xbf16>, vector<4x8xbf16>, vector<256x8xf32> -> vector<256x8xf32>
    %53 = arith.addf %49, %52 : vector<256x8xf32>
    %c2_39 = arith.constant 2 : index
    %c0_40 = arith.constant 0 : index
    %c0_41 = arith.constant 0 : index
    %54 = vector.load %arg3[%c2_39, %c0_40, %c0_41] : memref<16x4x8xbf16, #tpu.memory_space<vmem>>, vector<1x4x8xbf16>
    %55 = vector.shape_cast %54 : vector<1x4x8xbf16> to vector<4x8xbf16>
    %cst_42 = arith.constant dense<0.000000e+00> : vector<256x8xf32>
    %56 = tpu.matmul %20, %55, %cst_42 {dimension_numbers = #tpu.dot_dimension_numbers<[1], [0], [0], [1], [0, 0, 1, 1], [], []>} : vector<256x4xbf16>, vector<4x8xbf16>, vector<256x8xf32> -> vector<256x8xf32>
    %57 = arith.addf %53, %56 : vector<256x8xf32>
    %c3 = arith.constant 3 : index
    %c0_43 = arith.constant 0 : index
    %c0_44 = arith.constant 0 : index
    %58 = vector.load %arg3[%c3, %c0_43, %c0_44] : memref<16x4x8xbf16, #tpu.memory_space<vmem>>, vector<1x4x8xbf16>
    %59 = vector.shape_cast %58 : vector<1x4x8xbf16> to vector<4x8xbf16>
    %cst_45 = arith.constant dense<0.000000e+00> : vector<256x8xf32>
    %60 = tpu.matmul %25, %59, %cst_45 {dimension_numbers = #tpu.dot_dimension_numbers<[1], [0], [0], [1], [0, 0, 1, 1], [], []>} : vector<256x4xbf16>, vector<4x8xbf16>, vector<256x8xf32> -> vector<256x8xf32>
    %61 = arith.addf %57, %60 : vector<256x8xf32>
    %62 = vector.broadcast %46 : vector<1x8xf32> to vector<256x8xf32>
    %63 = arith.addf %61, %62 : vector<256x8xf32>
    %cst_46 = arith.constant 0.000000e+00 : f32
    %64 = vector.broadcast %cst_46 : f32 to vector<256x8xf32>
    %65 = arith.maximumf %63, %64 : vector<256x8xf32>
    %66 = vector.shape_cast %65 : vector<256x8xf32> to vector<16x1x16x8xf32>
    %c0_47 = arith.constant 0 : index
    %c0_48 = arith.constant 0 : index
    %c0_49 = arith.constant 0 : index
    %c0_50 = arith.constant 0 : index
    %c0_51 = arith.constant 0 : index
    %67 = vector.load %arg5[%c0_47, %c0_48, %c0_49, %c0_50, %c0_51] : memref<1x16x2x16x16xf32, #tpu.memory_space<vmem>>, vector<1x16x1x16x8xf32>
    %68 = vector.shape_cast %67 : vector<1x16x1x16x8xf32> to vector<16x1x16x8xf32>
    %69 = vector.shape_cast %66 : vector<16x1x16x8xf32> to vector<1x16x1x16x8xf32>
    tpu.vector_store %arg5[%c0_47, %c0_48, %c0_49, %c0_50, %c0_51], %69 {strides = array<i32>} : memref<1x16x2x16x16xf32, #tpu.memory_space<vmem>>, vector<1x16x1x16x8xf32>,
    %c4 = arith.constant 4 : index
    %c0_52 = arith.constant 0 : index
    %c0_53 = arith.constant 0 : index
    %70 = vector.load %arg3[%c4, %c0_52, %c0_53] : memref<16x4x8xbf16, #tpu.memory_space<vmem>>, vector<1x4x8xbf16>
    %71 = vector.shape_cast %70 : vector<1x4x8xbf16> to vector<4x8xbf16>
    %cst_54 = arith.constant dense<0.000000e+00> : vector<256x8xf32>
    %72 = tpu.matmul %10, %71, %cst_54 {dimension_numbers = #tpu.dot_dimension_numbers<[1], [0], [0], [1], [0, 0, 1, 1], [], []>} : vector<256x4xbf16>, vector<4x8xbf16>, vector<256x8xf32> -> vector<256x8xf32>
    %c5 = arith.constant 5 : index
    %c0_55 = arith.constant 0 : index
    %c0_56 = arith.constant 0 : index
    %73 = vector.load %arg3[%c5, %c0_55, %c0_56] : memref<16x4x8xbf16, #tpu.memory_space<vmem>>, vector<1x4x8xbf16>
    %74 = vector.shape_cast %73 : vector<1x4x8xbf16> to vector<4x8xbf16>
    %cst_57 = arith.constant dense<0.000000e+00> : vector<256x8xf32>
    %75 = tpu.matmul %15, %74, %cst_57 {dimension_numbers = #tpu.dot_dimension_numbers<[1], [0], [0], [1], [0, 0, 1, 1], [], []>} : vector<256x4xbf16>, vector<4x8xbf16>, vector<256x8xf32> -> vector<256x8xf32>
    %76 = arith.addf %72, %75 : vector<256x8xf32>
    %c6 = arith.constant 6 : index
    %c0_58 = arith.constant 0 : index
    %c0_59 = arith.constant 0 : index
    %77 = vector.load %arg3[%c6, %c0_58, %c0_59] : memref<16x4x8xbf16, #tpu.memory_space<vmem>>, vector<1x4x8xbf16>
    %78 = vector.shape_cast %77 : vector<1x4x8xbf16> to vector<4x8xbf16>
    %cst_60 = arith.constant dense<0.000000e+00> : vector<256x8xf32>
    %79 = tpu.matmul %25, %78, %cst_60 {dimension_numbers = #tpu.dot_dimension_numbers<[1], [0], [0], [1], [0, 0, 1, 1], [], []>} : vector<256x4xbf16>, vector<4x8xbf16>, vector<256x8xf32> -> vector<256x8xf32>
    %80 = arith.addf %76, %79 : vector<256x8xf32>
    %c7 = arith.constant 7 : index
    %c0_61 = arith.constant 0 : index
    %c0_62 = arith.constant 0 : index
    %81 = vector.load %arg3[%c7, %c0_61, %c0_62] : memref<16x4x8xbf16, #tpu.memory_space<vmem>>, vector<1x4x8xbf16>
    %82 = vector.shape_cast %81 : vector<1x4x8xbf16> to vector<4x8xbf16>
    %cst_63 = arith.constant dense<0.000000e+00> : vector<256x8xf32>
    %83 = tpu.matmul %30, %82, %cst_63 {dimension_numbers = #tpu.dot_dimension_numbers<[1], [0], [0], [1], [0, 0, 1, 1], [], []>} : vector<256x4xbf16>, vector<4x8xbf16>, vector<256x8xf32> -> vector<256x8xf32>
    %84 = arith.addf %80, %83 : vector<256x8xf32>
    %85 = vector.broadcast %46 : vector<1x8xf32> to vector<256x8xf32>
    %86 = arith.addf %84, %85 : vector<256x8xf32>
    %cst_64 = arith.constant 0.000000e+00 : f32
    %87 = vector.broadcast %cst_64 : f32 to vector<256x8xf32>
    %88 = arith.maximumf %86, %87 : vector<256x8xf32>
    %89 = vector.shape_cast %88 : vector<256x8xf32> to vector<16x1x16x8xf32>
    %c0_65 = arith.constant 0 : index
    %c0_66 = arith.constant 0 : index
    %c0_67 = arith.constant 0 : index
    %c0_68 = arith.constant 0 : index
    %c8 = arith.constant 8 : index
    %90 = vector.load %arg5[%c0_65, %c0_66, %c0_67, %c0_68, %c8] : memref<1x16x2x16x16xf32, #tpu.memory_space<vmem>>, vector<1x16x1x16x8xf32>
    %91 = vector.shape_cast %90 : vector<1x16x1x16x8xf32> to vector<16x1x16x8xf32>
    %92 = vector.shape_cast %89 : vector<16x1x16x8xf32> to vector<1x16x1x16x8xf32>
    tpu.vector_store %arg5[%c0_65, %c0_66, %c0_67, %c0_68, %c8], %92 {strides = array<i32>} : memref<1x16x2x16x16xf32, #tpu.memory_space<vmem>>, vector<1x16x1x16x8xf32>,
    %c8_69 = arith.constant 8 : index
    %c0_70 = arith.constant 0 : index
    %c0_71 = arith.constant 0 : index
    %93 = vector.load %arg3[%c8_69, %c0_70, %c0_71] : memref<16x4x8xbf16, #tpu.memory_space<vmem>>, vector<1x4x8xbf16>
    %94 = vector.shape_cast %93 : vector<1x4x8xbf16> to vector<4x8xbf16>
    %cst_72 = arith.constant dense<0.000000e+00> : vector<256x8xf32>
    %95 = tpu.matmul %20, %94, %cst_72 {dimension_numbers = #tpu.dot_dimension_numbers<[1], [0], [0], [1], [0, 0, 1, 1], [], []>} : vector<256x4xbf16>, vector<4x8xbf16>, vector<256x8xf32> -> vector<256x8xf32>
    %c9 = arith.constant 9 : index
    %c0_73 = arith.constant 0 : index
    %c0_74 = arith.constant 0 : index
    %96 = vector.load %arg3[%c9, %c0_73, %c0_74] : memref<16x4x8xbf16, #tpu.memory_space<vmem>>, vector<1x4x8xbf16>
    %97 = vector.shape_cast %96 : vector<1x4x8xbf16> to vector<4x8xbf16>
    %cst_75 = arith.constant dense<0.000000e+00> : vector<256x8xf32>
    %98 = tpu.matmul %25, %97, %cst_75 {dimension_numbers = #tpu.dot_dimension_numbers<[1], [0], [0], [1], [0, 0, 1, 1], [], []>} : vector<256x4xbf16>, vector<4x8xbf16>, vector<256x8xf32> -> vector<256x8xf32>
    %99 = arith.addf %95, %98 : vector<256x8xf32>
    %c10 = arith.constant 10 : index
    %c0_76 = arith.constant 0 : index
    %c0_77 = arith.constant 0 : index
    %100 = vector.load %arg3[%c10, %c0_76, %c0_77] : memref<16x4x8xbf16, #tpu.memory_space<vmem>>, vector<1x4x8xbf16>
    %101 = vector.shape_cast %100 : vector<1x4x8xbf16> to vector<4x8xbf16>
    %cst_78 = arith.constant dense<0.000000e+00> : vector<256x8xf32>
    %102 = tpu.matmul %35, %101, %cst_78 {dimension_numbers = #tpu.dot_dimension_numbers<[1], [0], [0], [1], [0, 0, 1, 1], [], []>} : vector<256x4xbf16>, vector<4x8xbf16>, vector<256x8xf32> -> vector<256x8xf32>
    %103 = arith.addf %99, %102 : vector<256x8xf32>
    %c11 = arith.constant 11 : index
    %c0_79 = arith.constant 0 : index
    %c0_80 = arith.constant 0 : index
    %104 = vector.load %arg3[%c11, %c0_79, %c0_80] : memref<16x4x8xbf16, #tpu.memory_space<vmem>>, vector<1x4x8xbf16>
    %105 = vector.shape_cast %104 : vector<1x4x8xbf16> to vector<4x8xbf16>
    %cst_81 = arith.constant dense<0.000000e+00> : vector<256x8xf32>
    %106 = tpu.matmul %40, %105, %cst_81 {dimension_numbers = #tpu.dot_dimension_numbers<[1], [0], [0], [1], [0, 0, 1, 1], [], []>} : vector<256x4xbf16>, vector<4x8xbf16>, vector<256x8xf32> -> vector<256x8xf32>
    %107 = arith.addf %103, %106 : vector<256x8xf32>
    %108 = vector.broadcast %46 : vector<1x8xf32> to vector<256x8xf32>
    %109 = arith.addf %107, %108 : vector<256x8xf32>
    %cst_82 = arith.constant 0.000000e+00 : f32
    %110 = vector.broadcast %cst_82 : f32 to vector<256x8xf32>
    %111 = arith.maximumf %109, %110 : vector<256x8xf32>
    %112 = vector.shape_cast %111 : vector<256x8xf32> to vector<16x1x16x8xf32>
    %c0_83 = arith.constant 0 : index
    %c0_84 = arith.constant 0 : index
    %c1_85 = arith.constant 1 : index
    %c0_86 = arith.constant 0 : index
    %c0_87 = arith.constant 0 : index
    %113 = vector.load %arg5[%c0_83, %c0_84, %c1_85, %c0_86, %c0_87] : memref<1x16x2x16x16xf32, #tpu.memory_space<vmem>>, vector<1x16x1x16x8xf32>
    %114 = vector.shape_cast %113 : vector<1x16x1x16x8xf32> to vector<16x1x16x8xf32>
    %115 = vector.shape_cast %112 : vector<16x1x16x8xf32> to vector<1x16x1x16x8xf32>
    tpu.vector_store %arg5[%c0_83, %c0_84, %c1_85, %c0_86, %c0_87], %115 {strides = array<i32>} : memref<1x16x2x16x16xf32, #tpu.memory_space<vmem>>, vector<1x16x1x16x8xf32>,
    %c12 = arith.constant 12 : index
    %c0_88 = arith.constant 0 : index
    %c0_89 = arith.constant 0 : index
    %116 = vector.load %arg3[%c12, %c0_88, %c0_89] : memref<16x4x8xbf16, #tpu.memory_space<vmem>>, vector<1x4x8xbf16>
    %117 = vector.shape_cast %116 : vector<1x4x8xbf16> to vector<4x8xbf16>
    %cst_90 = arith.constant dense<0.000000e+00> : vector<256x8xf32>
    %118 = tpu.matmul %25, %117, %cst_90 {dimension_numbers = #tpu.dot_dimension_numbers<[1], [0], [0], [1], [0, 0, 1, 1], [], []>} : vector<256x4xbf16>, vector<4x8xbf16>, vector<256x8xf32> -> vector<256x8xf32>
    %c13 = arith.constant 13 : index
    %c0_91 = arith.constant 0 : index
    %c0_92 = arith.constant 0 : index
    %119 = vector.load %arg3[%c13, %c0_91, %c0_92] : memref<16x4x8xbf16, #tpu.memory_space<vmem>>, vector<1x4x8xbf16>
    %120 = vector.shape_cast %119 : vector<1x4x8xbf16> to vector<4x8xbf16>
    %cst_93 = arith.constant dense<0.000000e+00> : vector<256x8xf32>
    %121 = tpu.matmul %30, %120, %cst_93 {dimension_numbers = #tpu.dot_dimension_numbers<[1], [0], [0], [1], [0, 0, 1, 1], [], []>} : vector<256x4xbf16>, vector<4x8xbf16>, vector<256x8xf32> -> vector<256x8xf32>
    %122 = arith.addf %118, %121 : vector<256x8xf32>
    %c14 = arith.constant 14 : index
    %c0_94 = arith.constant 0 : index
    %c0_95 = arith.constant 0 : index
    %123 = vector.load %arg3[%c14, %c0_94, %c0_95] : memref<16x4x8xbf16, #tpu.memory_space<vmem>>, vector<1x4x8xbf16>
    %124 = vector.shape_cast %123 : vector<1x4x8xbf16> to vector<4x8xbf16>
    %cst_96 = arith.constant dense<0.000000e+00> : vector<256x8xf32>
    %125 = tpu.matmul %40, %124, %cst_96 {dimension_numbers = #tpu.dot_dimension_numbers<[1], [0], [0], [1], [0, 0, 1, 1], [], []>} : vector<256x4xbf16>, vector<4x8xbf16>, vector<256x8xf32> -> vector<256x8xf32>
    %126 = arith.addf %122, %125 : vector<256x8xf32>
    %c15 = arith.constant 15 : index
    %c0_97 = arith.constant 0 : index
    %c0_98 = arith.constant 0 : index
    %127 = vector.load %arg3[%c15, %c0_97, %c0_98] : memref<16x4x8xbf16, #tpu.memory_space<vmem>>, vector<1x4x8xbf16>
    %128 = vector.shape_cast %127 : vector<1x4x8xbf16> to vector<4x8xbf16>
    %cst_99 = arith.constant dense<0.000000e+00> : vector<256x8xf32>
    %129 = tpu.matmul %45, %128, %cst_99 {dimension_numbers = #tpu.dot_dimension_numbers<[1], [0], [0], [1], [0, 0, 1, 1], [], []>} : vector<256x4xbf16>, vector<4x8xbf16>, vector<256x8xf32> -> vector<256x8xf32>
    %130 = arith.addf %126, %129 : vector<256x8xf32>
    %131 = vector.broadcast %46 : vector<1x8xf32> to vector<256x8xf32>
    %132 = arith.addf %130, %131 : vector<256x8xf32>
    %cst_100 = arith.constant 0.000000e+00 : f32
    %133 = vector.broadcast %cst_100 : f32 to vector<256x8xf32>
    %134 = arith.maximumf %132, %133 : vector<256x8xf32>
    %135 = vector.shape_cast %134 : vector<256x8xf32> to vector<16x1x16x8xf32>
    %c0_101 = arith.constant 0 : index
    %c0_102 = arith.constant 0 : index
    %c1_103 = arith.constant 1 : index
    %c0_104 = arith.constant 0 : index
    %c8_105 = arith.constant 8 : index
    %136 = vector.load %arg5[%c0_101, %c0_102, %c1_103, %c0_104, %c8_105] : memref<1x16x2x16x16xf32, #tpu.memory_space<vmem>>, vector<1x16x1x16x8xf32>
    %137 = vector.shape_cast %136 : vector<1x16x1x16x8xf32> to vector<16x1x16x8xf32>
    %138 = vector.shape_cast %135 : vector<16x1x16x8xf32> to vector<1x16x1x16x8xf32>
    tpu.vector_store %arg5[%c0_101, %c0_102, %c1_103, %c0_104, %c8_105], %138 {strides = array<i32>} : memref<1x16x2x16x16xf32, #tpu.memory_space<vmem>>, vector<1x16x1x16x8xf32>,
    return
  }
  func.func @transform_0(%arg0: i32, %arg1: i32) -> (i32, i32, i32, i32) {
    %c0_i32 = arith.constant 0 : i32
    %c0_i32_0 = arith.constant 0 : i32
    %c0_i32_1 = arith.constant 0 : i32
    %c0_i32_2 = arith.constant 0 : i32
    return %arg0, %c0_i32, %c0_i32_0, %c0_i32_1 : i32, i32, i32, i32
  }
  func.func @transform_1(%arg0: i32, %arg1: i32) -> (i32, i32, i32) {
    %c0_i32 = arith.constant 0 : i32
    %c0_i32_0 = arith.constant 0 : i32
    %c0_i32_1 = arith.constant 0 : i32
    %c0_i32_2 = arith.constant 0 : i32
    return %c0_i32, %c0_i32_0, %c0_i32_1 : i32, i32, i32
  }
  func.func @transform_2(%arg0: i32, %arg1: i32) -> (i32, i32) {
    %c0_i32 = arith.constant 0 : i32
    %c0_i32_0 = arith.constant 0 : i32
    %c0_i32_1 = arith.constant 0 : i32
    return %c0_i32, %c0_i32_0 : i32, i32
  }
  func.func @transform_3(%arg0: i32, %arg1: i32) -> (i32, i32, i32, i32, i32) {
    %c0_i32 = arith.constant 0 : i32
    %c0_i32_0 = arith.constant 0 : i32
    %c0_i32_1 = arith.constant 0 : i32
    %c0_i32_2 = arith.constant 0 : i32
    return %arg0, %arg1, %c0_i32, %c0_i32_0, %c0_i32_1 : i32, i32, i32, i32, i32
  }
}

</mosaic_0001>

<bundles_post_ra>
// kernel: up_conv_forward.1
= control target key start
LH: loop header
LB: loop body
LE: loop exit
PB: predicated region body
PF: predicated region fallthrough
CT: control target
= control target key end

     0   :  { %s6407_s12 = smov 0   ;;  %s6409_s13 = smov 0   ;;  %s8409_s0 = inlined_call_operand.vmem [shape: bf16[2,18,18,4], index: 0, kind: input, shape index: {}]   ;;  %s8410_s1 = inlined_call_operand.vmem [shape: bf16[16,4,8], index: 1, kind: input, shape index: {}]   ;;  %s8411_s2 = inlined_call_operand.vmem [shape: f32[1,8], index: 2, kind: input, shape index: {}]   ;;  %s8412_s3 = inlined_call_operand.vmem [shape: f32[2,16,2,16,16], index: 3, kind: output, shape index: {}]  }
   0x1   :  { %s6411_s14 = smov 0  }
   0x2 LB: > { %s25_s15 = sadd.s32 1, %s6380_s13  ;;  %p5460_p0 = scmp.ge.s32.totalorder %s6384_s14, 1  ;;  %s6384_s14 = sphi %s6411_s14, %s13_s14   ;;  %s6380_s13 = sphi %s6409_s13, %s8466_s13   ;;  %s6376_s12 = sphi %s6407_s12, %s8465_s12  }
   0x3   : > { %p27_p1 = scmp.ge.s32.totalorder %s25_s15, 2  ;;  %p151_p2 = scmp.lt.s32.totalorder %s6384_s14, 3 }
   0x5   : > { %s8468_s15 = smov (%p27_p1, %s25_s15), 0  ;;  %p152_p3 = pnand %p5460_p0, %p151_p2 }
   0x7   : > { %155 = sbr.rel (%p152_p3) target bundleno = 1307 (0x51b), region = 32 }
   0xc   : > { %vm2140_vm0 = vcmask 1041408   ;;  %v5737_v0 = vld [vmem:[%s8410_s1 + $0x4] sm:$0x3]  ;;  %p180_p4 = scmp.lt.s32.totalorder %s6376_s12, 1  ;;  %v2040_v2 = vld [vmem:[%s8410_s1] sm:$0x3] }
   0xd   : > { %v2552_v1 = vsel %vm2140_vm0, %v5737_v0, 0  ;;  %v5640_v3 = vld [vmem:[%s8410_s1 + $0x2] sm:$0x3]  ;;  %v2346_v4 = vsel %vm2140_vm0, %v2040_v2, 0  ;;  %v5818_v6 = vld [vmem:[%s8410_s1 + $0x6] sm:$0x3] }
   0xe   : > { %2561 = vmatpush.bf16.msra.mxu2 %v2552_v1  ;;  %s8470_s12 = smov (!%p180_p4, %s6376_s12), 1  ;;  %v2142_v5 = vsel %vm2140_vm0, %v5640_v3, 0  ;;  %2355 = vmatpush.bf16.msra.mxu1 %v2346_v4  ;;  %v2774_v7 = vsel %vm2140_vm0, %v5818_v6, 0  ;;  %v5869_v8 = vld [vmem:[%s8410_s1 + $0xc] sm:$0x3]  ;;  %vm2091_vm1 = vcmask 31744  }
   0xf   : > { %2151 = vmatpush.bf16.msra.mxu0 %v2142_v5  ;;  %s6218_s26 = smul.u32 216, %s8470_s12  ;;  %2783 = vmatpush.bf16.msra.mxu3 %v2774_v7  ;;  %v3284_v9 = vsel %vm2140_vm0, %v5869_v8, 0  ;;  %v5886_v10 = vld [vmem:[%s8410_s1 + $0xe] sm:$0x3]  ;;  %v5836_v12 = vld [vmem:[%s8410_s1 + $0xa] sm:$0x3] }
  0x10   : > { %v3506_v11 = vsel %vm2140_vm0, %v5886_v10, 0  ;;  %v5835_v13 = vld [vmem:[%s8410_s1 + $0x8] sm:$0x3]  ;;  %vm249_vm2 = vsmask.f32 3328  ;;  %v3098_v14 = vsel %vm2140_vm0, %v5836_v12, 0 }
  0x11   : > { %s6461_s8 = scalar_lea.vmem %s8409_s0, %s6218_s26  ;;  %v3190_v15 = vsel %vm2140_vm0, %v5835_v13, 0  ;;  %vm250_vm3 = vsmask.f32 7440  ;;  %s6169_s11 = sshll.u32 %s8470_s12, 9  ;;  %vm2964_vm5 = vcmask 64512   ;;  %vm700_vm6 = vcmask 1042432  }
  0x12   : > { %3293 = vmatpush.bf16.msrb.mxu2 %v3284_v9  ;;  %v6186_v16 = vld [vmem:[%s6461_s8 + $0xc] sm:$0xff]  ;;  %v6170_v17 = vld [vmem:[%s6461_s8] sm:$0xff]  ;;  %3199 = vmatpush.bf16.msrb.mxu1 %v3190_v15  ;;  %v233_v20 = vld [vmem:[%s6461_s8 + $0x8] sm:$0x1]  ;;  %s6753_s18 = scalar_lea.vmem %s8412_s3, %s6169_s11  ;;  %vm701_vm7 = vcmask 1046532   ;;  %s6386_s28 = smov 8  }
  0x13   : > { %3515 = vmatpush.bf16.msrb.mxu3 %v3506_v11  ;;  %v201_v18 = vld [vmem:[%s6461_s8] sm:$0xf]  ;;  %3107 = vmatpush.bf16.msrb.mxu0 %v3098_v14  ;;  %v202_v19 = vld [vmem:[%s6461_s8 + $0x4] sm:$0xf]  ;;  %v272_v25 = vshll.u32 %v233_v20, 16  ;;  %vm6477_vm4 = vmor %vm249_vm2, %vm250_vm3  ;;  %vm3821_vm9 = vcmask 130112  }
  0x14   : > { %v253_v21 = vshrl.u32 %v201_v18, 16  ;;  %v256_v22 = vshll.u32 %v201_v18, 16  ;;  %5802 = vmatmul.msk.bf16.vlgmr.msra.gmra.mxu2 %vm2091_vm1, %v6186_v16  ;;  %5721 = vmatmul.msk.bf16.vlgmr.msra.gmra.mxu1 %vm2091_vm1, %v6170_v17  ;;  %v262_v23 = vshll.u32 %v202_v19, 16  ;;  %v266_v24 = vshrl.u32 %v202_v19, 16  ;;  %v5480_v26 = vld [vmem:[%s6461_s8 + $0xc] sm:$0xf]  ;;  %vm7019_vm8 = vmor %vm700_vm6, %vm701_vm7 }
  0x15   : > { %v5481_v29 = vld [vmem:[%s6461_s8 + $0x10] sm:$0xf]  ;;  %v868_v30 = vshrl.u32 %v5480_v26, 16  ;;  %v5512_v33 = vld [vmem:[%s6461_s8 + $0x14] sm:$0x1]  ;;  %v871_v36 = vshll.u32 %v5480_v26, 16 }
  0x16   : > { %v255_v27 = vrot.slane %v253_v21, 4  ;;  %v258_v28 = vrot.slane %v256_v22, 5  ;;  %v264_v31 = vrot.slane %v262_v23, 5  ;;  %v268_v32 = vrot.slane %v266_v24, 4  ;;  %v203_v43 = vld [vmem:[%s6461_s8 + $0xc] sm:$0xf] }
  0x17   : > { %v870_v35 = vrot.slane %v868_v30, 4  ;;  %v877_v37 = vshll.u32 %v5481_v29, 16  ;;  %v274_v40 = vrot.slane %v272_v25, 5  ;;  %v881_v41 = vshrl.u32 %v5481_v29, 16  ;;  %v204_v47 = vld [vmem:[%s6461_s8 + $0x10] sm:$0xf] }
  0x18   : > { %v259_v34 = vor.u32 %v258_v28, %v255_v27  ;;  %v269_v39 = vor.u32 %v268_v32, %v264_v31  ;;  %v887_v42 = vshll.u32 %v5512_v33, 16  ;;  %v873_v45 = vrot.slane %v871_v36, 5  ;;  %v234_v55 = vld [vmem:[%s6461_s8 + $0x14] sm:$0x1]  ;;  %v5482_v62 = vld [vmem:[%s6461_s8 + $0x18] sm:$0xf] }
  0x19   : > { %v879_v46 = vrot.slane %v877_v37, 5  ;;  %v277_v48 = vshrl.u32 %v203_v43, 16  ;;  %v883_v50 = vrot.slane %v881_v41, 4  ;;  %v280_v52 = vshll.u32 %v203_v43, 16  ;;  %v5483_v9 = vld [vmem:[%s6461_s8 + $0x1c] sm:$0xf] }
  0x1a   : > { %v260_v44 = vrot.slane %v259_v34, 4  ;;  %v270_v49 = vrot.slane %v269_v39, 4  ;;  %v889_v51 = vrot.slane %v887_v42, 5  ;;  %v874_v54 = vor.u32 %v873_v45, %v870_v35  ;;  %v5513_v10 = vld [vmem:[%s6461_s8 + $0x20] sm:$0x1]  ;;  %v6187_v14 = vld [vmem:[%s6461_s8 + $0x18] sm:$0xff] }
  0x1b   : > { %v279_v56 = vrot.slane %v277_v48, 4  ;;  %v286_v57 = vshll.u32 %v204_v47, 16  ;;  %v884_v60 = vor.u32 %v883_v50, %v879_v46  ;;  %v282_v61 = vrot.slane %v280_v52, 5  ;;  %v6171_v15 = vld [vmem:[%s6461_s8 + $0xc] sm:$0xff]  ;;  %v205_v22 = vld [vmem:[%s6461_s8 + $0x18] sm:$0xf] }
  0x1c   : > { %v265_v53 = vsel %vm6477_vm4, %v260_v44, %v264_v31  ;;  %v275_v58 = vsel %vm6477_vm4, %v270_v49, %v274_v40  ;;  %v875_v0 = vrot.slane %v874_v54, 4  ;;  %v290_v2 = vshrl.u32 %v204_v47, 16  ;;  %v206_v26 = vld [vmem:[%s6461_s8 + $0x1c] sm:$0xf]  ;;  %v5484_v42 = vld [vmem:[%s6461_s8 + $0x24] sm:$0xf] }
  0x1d   : > { %v2043_v59 = vunpack.c.l.b16 %v265_v53  ;;  %v2044_v63 = vunpack.c.l.b16 %v275_v58  ;;  %v288_v1 = vrot.slane %v286_v57, 5  ;;  %v885_v3 = vrot.slane %v884_v60, 4  ;;  %v235_v45 = vld [vmem:[%s6461_s8 + $0x20] sm:$0x1]  ;;  %v5485_v50 = vld [vmem:[%s6461_s8 + $0x28] sm:$0xf] }
  0x1e   : > { %v283_v4 = vor.u32 %v282_v61, %v279_v56  ;;  %v296_v5 = vshll.u32 %v234_v55, 16  ;;  %v880_v7 = vsel %vm6477_vm4, %v875_v0, %v879_v46  ;;  %v292_v8 = vrot.slane %v290_v2, 4 }
  0x1f   : > { %v6489_v6 = vpack.c.b16 %v2044_v63, %v2043_v59  ;;  %v892_v11 = vshrl.u32 %v5482_v62, 16  ;;  %v890_v12 = vsel %vm6477_vm4, %v885_v3, %v889_v51  ;;  %v2677_v13 = vunpack.c.l.b16 %v880_v7  ;;  %v6188_v7 = vld [vmem:[%s6461_s8 + $0x24] sm:$0xff] }
  0x20   : > { %v284_v16 = vrot.slane %v283_v4, 4  ;;  %v298_v17 = vrot.slane %v296_v5, 5  ;;  %v2678_v18 = vunpack.c.l.b16 %v890_v12  ;;  %v293_v19 = vor.u32 %v292_v8, %v288_v1  ;;  %v5514_v5 = vld [vmem:[%s6461_s8 + $0x2c] sm:$0x1]  ;;  %v6172_v8 = vld [vmem:[%s6461_s8 + $0x18] sm:$0xff] }
  0x21   : > { %5641 = vmatmul.msk.bf16.vlgmr.msra.gmra.mxu0 %vm2091_vm1, %v6489_v6  ;;  %v894_v20 = vrot.slane %v892_v11, 4  ;;  %v895_v21 = vshll.u32 %v5482_v62, 16  ;;  %v901_v23 = vshll.u32 %v5483_v9, 16  ;;  %v905_v24 = vshrl.u32 %v5483_v9, 16 }
  0x22   : > { %v911_v25 = vshll.u32 %v5513_v10, 16  ;;  %v6503_v27 = vpack.c.b16 %v2678_v18, %v2677_v13  ;;  %v294_v28 = vrot.slane %v293_v19, 4  ;;  %v289_v30 = vsel %vm6477_vm4, %v284_v16, %v288_v1 }
  0x23   : > { %v897_v29 = vrot.slane %v895_v21, 5  ;;  %v903_v31 = vrot.slane %v901_v23, 5  ;;  %v907_v32 = vrot.slane %v905_v24, 4  ;;  %v301_v33 = vshrl.u32 %v205_v22, 16 }
  0x24   : > { %5803 = vmatmul.msk.bf16.gmra.mxu2 %vm2091_vm1, %v6187_v14  ;;  %5722 = vmatmul.msk.bf16.gmra.mxu1 %vm2091_vm1, %v6171_v15  ;;  %v299_v34 = vsel %vm6477_vm4, %v294_v28, %v298_v17  ;;  %v304_v36 = vshll.u32 %v205_v22, 16  ;;  %v310_v37 = vshll.u32 %v206_v26, 16  ;;  %v913_v40 = vrot.slane %v911_v25, 5  ;;  %v207_v14 = vld [vmem:[%s6461_s8 + $0x24] sm:$0xf] }
  0x25   : > { %5819 = vmatmul.msk.bf16.vlgmr.msra.gmra.mxu3 %vm2091_vm1, %v6503_v27  ;;  %v898_v35 = vor.u32 %v897_v29, %v894_v20  ;;  %v908_v39 = vor.u32 %v907_v32, %v903_v31  ;;  %v314_v41 = vshrl.u32 %v206_v26, 16  ;;  %v2045_v43 = vunpack.c.l.b16 %v289_v30  ;;  %v208_v17 = vld [vmem:[%s6461_s8 + $0x28] sm:$0xf]  ;;  %v5486_v28 = vld [vmem:[%s6461_s8 + $0x30] sm:$0xf] }
  0x26   : > { %v2046_v46 = vunpack.c.l.b16 %v299_v34  ;;  %v303_v48 = vrot.slane %v301_v33, 4  ;;  %v306_v49 = vrot.slane %v304_v36, 5  ;;  %v312_v52 = vrot.slane %v310_v37, 5  ;;  %v5487_v29 = vld [vmem:[%s6461_s8 + $0x34] sm:$0xf] }
  0x27   : > { %v899_v44 = vrot.slane %v898_v35, 4  ;;  %v909_v47 = vrot.slane %v908_v39, 4  ;;  %v316_v53 = vrot.slane %v314_v41, 4  ;;  %v916_v54 = vshrl.u32 %v5484_v42, 16  ;;  %v236_v35 = vld [vmem:[%s6461_s8 + $0x2c] sm:$0x1] }
  0x28   : > { %v919_v56 = vshll.u32 %v5484_v42, 16  ;;  %v320_v57 = vshll.u32 %v235_v45, 16  ;;  %v925_v58 = vshll.u32 %v5485_v50, 16  ;;  %v6520_v59 = vpack.c.b16 %v2046_v46, %v2045_v43 }
  0x29   : > { %v904_v51 = vsel %vm6477_vm4, %v899_v44, %v903_v31  ;;  %v914_v55 = vsel %vm6477_vm4, %v909_v47, %v913_v40  ;;  %v307_v61 = vor.u32 %v306_v49, %v303_v48  ;;  %v929_v62 = vshrl.u32 %v5485_v50, 16 }
  0x2a   : > { %v2679_v60 = vunpack.c.l.b16 %v904_v51  ;;  %v2680_v63 = vunpack.c.l.b16 %v914_v55  ;;  %v317_v0 = vor.u32 %v316_v53, %v312_v52  ;;  %v918_v1 = vrot.slane %v916_v54, 4  ;;  %v6189_v54 = vld [vmem:[%s6461_s8 + $0x30] sm:$0xff]  ;;  %v5515_v55 = vld [vmem:[%s6461_s8 + $0x38] sm:$0x1] }
  0x2b   : > { %v921_v2 = vrot.slane %v919_v56, 5  ;;  %v927_v3 = vrot.slane %v925_v58, 5  ;;  %v931_v4 = vrot.slane %v929_v62, 4  ;;  %v308_v9 = vrot.slane %v307_v61, 4  ;;  %v6173_v56 = vld [vmem:[%s6461_s8 + $0x24] sm:$0xff] }
  0x2c   : > { %v6527_v10 = vpack.c.b16 %v2680_v63, %v2679_v60  ;;  %v318_v11 = vrot.slane %v317_v0, 4  ;;  %v322_v12 = vrot.slane %v320_v57, 5  ;;  %v935_v16 = vshll.u32 %v5514_v5, 16  ;;  %v209_v57 = vld [vmem:[%s6461_s8 + $0x30] sm:$0xf] }
  0x2d   : > { %v922_v13 = vor.u32 %v921_v2, %v918_v1  ;;  %v932_v15 = vor.u32 %v931_v4, %v927_v3  ;;  %v313_v18 = vsel %vm6477_vm4, %v308_v9, %v312_v52  ;;  %v325_v19 = vshrl.u32 %v207_v14, 16  ;;  %v210_v58 = vld [vmem:[%s6461_s8 + $0x34] sm:$0xf]  ;;  %v5488_v9 = vld [vmem:[%s6461_s8 + $0x3c] sm:$0xf] }
  0x2e   : > { %v328_v20 = vshll.u32 %v207_v14, 16  ;;  %v323_v21 = vsel %vm6477_vm4, %v318_v11, %v322_v12  ;;  %v334_v23 = vshll.u32 %v208_v17, 16  ;;  %v338_v24 = vshrl.u32 %v208_v17, 16  ;;  %v5489_v11 = vld [vmem:[%s6461_s8 + $0x40] sm:$0xf] }
  0x2f   : > { %v923_v22 = vrot.slane %v922_v13, 4  ;;  %v933_v25 = vrot.slane %v932_v15, 4  ;;  %v937_v26 = vrot.slane %v935_v16, 5  ;;  %v2047_v30 = vunpack.c.l.b16 %v313_v18 }
  0x30   : > { %v2048_v31 = vunpack.c.l.b16 %v323_v21  ;;  %v327_v32 = vrot.slane %v325_v19, 4  ;;  %v330_v33 = vrot.slane %v328_v20, 5  ;;  %v336_v36 = vrot.slane %v334_v23, 5  ;;  %v237_v20 = vld [vmem:[%s6461_s8 + $0x38] sm:$0x1] }
  0x31   : > { %5642 = vmatmul.msk.bf16.gmra.mxu0 %vm2091_vm1, %v6520_v59  ;;  %v928_v34 = vsel %vm6477_vm4, %v923_v22, %v927_v3  ;;  %v340_v37 = vrot.slane %v338_v24, 4  ;;  %v940_v39 = vshrl.u32 %v5486_v28, 16  ;;  %v938_v40 = vsel %vm6477_vm4, %v933_v25, %v937_v26 }
  0x32   : > { %v943_v41 = vshll.u32 %v5486_v28, 16  ;;  %v949_v42 = vshll.u32 %v5487_v29, 16  ;;  %v953_v43 = vshrl.u32 %v5487_v29, 16  ;;  %v6546_v44 = vpack.c.b16 %v2048_v31, %v2047_v30 }
  0x33   : > { %v344_v45 = vshll.u32 %v236_v35, 16  ;;  %v2681_v46 = vunpack.c.l.b16 %v928_v34  ;;  %v2682_v47 = vunpack.c.l.b16 %v938_v40  ;;  %v331_v48 = vor.u32 %v330_v33, %v327_v32 }
  0x34   : > { %5804 = vmatmul.msk.bf16.gmra.mxu2 %vm2091_vm1, %v6188_v7  ;;  %5723 = vmatmul.msk.bf16.gmra.mxu1 %vm2091_vm1, %v6172_v8  ;;  %v341_v49 = vor.u32 %v340_v37, %v336_v36  ;;  %v942_v50 = vrot.slane %v940_v39, 4  ;;  %v945_v51 = vrot.slane %v943_v41, 5  ;;  %v951_v52 = vrot.slane %v949_v42, 5  ;;  %v5516_v41 = vld [vmem:[%s6461_s8 + $0x44] sm:$0x1] }
  0x35   : > { %5820 = vmatmul.msk.bf16.gmra.mxu3 %vm2091_vm1, %v6527_v10  ;;  %v955_v53 = vrot.slane %v953_v43, 4  ;;  %v6555_v60 = vpack.c.b16 %v2682_v47, %v2681_v46  ;;  %v332_v61 = vrot.slane %v331_v48, 4  ;;  %v346_v62 = vrot.slane %v344_v45, 5  ;;  %v6190_v45 = vld [vmem:[%s6461_s8 + $0x3c] sm:$0xff]  ;;  %v6174_v46 = vld [vmem:[%s6461_s8 + $0x30] sm:$0xff] }
  0x36   : > { %v342_v63 = vrot.slane %v341_v49, 4  ;;  %v946_v0 = vor.u32 %v945_v51, %v942_v50  ;;  %v959_v2 = vshll.u32 %v5515_v55, 16  ;;  %v349_v3 = vshrl.u32 %v209_v57, 16 }
  0x37   : > { %v956_v1 = vor.u32 %v955_v53, %v951_v52  ;;  %v352_v4 = vshll.u32 %v209_v57, 16  ;;  %v358_v5 = vshll.u32 %v210_v58, 16  ;;  %v362_v7 = vshrl.u32 %v210_v58, 16  ;;  %v212_v53 = vld [vmem:[%s6461_s8 + $0x40] sm:$0xf] }
  0x38   : > { %v337_v8 = vsel %vm6477_vm4, %v332_v61, %v336_v36  ;;  %v347_v12 = vsel %vm6477_vm4, %v342_v63, %v346_v62  ;;  %v947_v13 = vrot.slane %v946_v0, 4  ;;  %v961_v15 = vrot.slane %v959_v2, 5  ;;  %v5491_v2 = vld [vmem:[%s6461_s8 + $0x4c] sm:$0xf] }
  0x39   : > { %v957_v14 = vrot.slane %v956_v1, 4  ;;  %v351_v16 = vrot.slane %v349_v3, 4  ;;  %v354_v17 = vrot.slane %v352_v4, 5  ;;  %v360_v18 = vrot.slane %v358_v5, 5  ;;  %v5490_v1 = vld [vmem:[%s6461_s8 + $0x48] sm:$0xf] }
  0x3a   : > { %v364_v19 = vrot.slane %v362_v7, 4  ;;  %v964_v21 = vshrl.u32 %v5488_v9, 16  ;;  %v967_v22 = vshll.u32 %v5488_v9, 16  ;;  %v973_v23 = vshll.u32 %v5489_v11, 16 }
  0x3b   : > { %v977_v24 = vshrl.u32 %v5489_v11, 16  ;;  %v2049_v25 = vunpack.c.l.b16 %v337_v8  ;;  %v2050_v26 = vunpack.c.l.b16 %v347_v12  ;;  %v952_v28 = vsel %vm6477_vm4, %v947_v13, %v951_v52  ;;  %v211_v52 = vld [vmem:[%s6461_s8 + $0x3c] sm:$0xf]  ;;  %v238_v13 = vld [vmem:[%s6461_s8 + $0x44] sm:$0x1] }
  0x3c   : > { %v962_v29 = vsel %vm6477_vm4, %v957_v14, %v961_v15  ;;  %v355_v30 = vor.u32 %v354_v17, %v351_v16  ;;  %v365_v31 = vor.u32 %v364_v19, %v360_v18  ;;  %v368_v32 = vshll.u32 %v237_v20, 16 }
  0x3d   : > { %v966_v33 = vrot.slane %v964_v21, 4  ;;  %v969_v34 = vrot.slane %v967_v22, 5  ;;  %v975_v35 = vrot.slane %v973_v23, 5  ;;  %v979_v36 = vrot.slane %v977_v24, 4 }
  0x3e   : > { %v6572_v37 = vpack.c.b16 %v2050_v26, %v2049_v25  ;;  %v2683_v39 = vunpack.c.l.b16 %v952_v28  ;;  %v2684_v40 = vunpack.c.l.b16 %v962_v29  ;;  %v356_v42 = vrot.slane %v355_v30, 4  ;;  %v5517_v29 = vld [vmem:[%s6461_s8 + $0x50] sm:$0x1]  ;;  %v6191_v30 = vld [vmem:[%s6461_s8 + $0x48] sm:$0xff] }
  0x3f   : > { %v370_v43 = vrot.slane %v368_v32, 5  ;;  %v366_v47 = vrot.slane %v365_v31, 4  ;;  %v970_v48 = vor.u32 %v969_v34, %v966_v33  ;;  %v980_v49 = vor.u32 %v979_v36, %v975_v35  ;;  %v6175_v31 = vld [vmem:[%s6461_s8 + $0x3c] sm:$0xff]  ;;  %v213_v32 = vld [vmem:[%s6461_s8 + $0x48] sm:$0xf] }
  0x40   : > { %v983_v50 = vshll.u32 %v5516_v41, 16  ;;  %v6579_v51 = vpack.c.b16 %v2684_v40, %v2683_v39  ;;  %v373_v61 = vshrl.u32 %v211_v52, 16  ;;  %v376_v62 = vshll.u32 %v211_v52, 16  ;;  %v214_v36 = vld [vmem:[%s6461_s8 + $0x4c] sm:$0xf] }
  0x41   : > { %5643 = vmatmul.msk.bf16.gmra.mxu0 %vm2091_vm1, %v6546_v44  ;;  %v371_v55 = vsel %vm6477_vm4, %v366_v47, %v370_v43  ;;  %v981_v57 = vrot.slane %v980_v49, 4  ;;  %v382_v63 = vshll.u32 %v212_v53, 16  ;;  %v386_v0 = vshrl.u32 %v212_v53, 16  ;;  %v5493_v49 = vld [vmem:[%s6461_s8 + $0x58] sm:$0xf] }
  0x42   : > { %v985_v58 = vrot.slane %v983_v50, 5  ;;  %v2052_v4 = vunpack.c.l.b16 %v371_v55  ;;  %v375_v8 = vrot.slane %v373_v61, 4  ;;  %v378_v9 = vrot.slane %v376_v62, 5 }
  0x43   : > { %v384_v11 = vrot.slane %v382_v63, 5  ;;  %v388_v12 = vrot.slane %v386_v0, 4  ;;  %v988_v14 = vshrl.u32 %v5490_v1, 16  ;;  %v991_v15 = vshll.u32 %v5490_v1, 16 }
  0x44   : > { %5805 = vmatmul.msk.bf16.gmra.mxu2 %vm2091_vm1, %v6189_v54  ;;  %5724 = vmatmul.msk.bf16.gmra.mxu1 %vm2091_vm1, %v6173_v56  ;;  %v361_v54 = vsel %vm6477_vm4, %v356_v42, %v360_v18  ;;  %v971_v56 = vrot.slane %v970_v48, 4  ;;  %v986_v7 = vsel %vm6477_vm4, %v981_v57, %v985_v58  ;;  %v997_v16 = vshll.u32 %v5491_v2, 16  ;;  %v5492_v48 = vld [vmem:[%s6461_s8 + $0x54] sm:$0xf] }
  0x45   : > { %5821 = vmatmul.msk.bf16.gmra.mxu3 %vm2091_vm1, %v6555_v60  ;;  %v2051_v3 = vunpack.c.l.b16 %v361_v54  ;;  %v1001_v17 = vshrl.u32 %v5491_v2, 16  ;;  %v2686_v20 = vunpack.c.l.b16 %v986_v7  ;;  %v379_v21 = vor.u32 %v378_v9, %v375_v8 }
  0x46   : > { %v976_v5 = vsel %vm6477_vm4, %v971_v56, %v975_v35  ;;  %v389_v22 = vor.u32 %v388_v12, %v384_v11  ;;  %v392_v23 = vshll.u32 %v238_v13, 16  ;;  %v990_v24 = vrot.slane %v988_v14, 4 }
  0x47   : > { %v6598_v18 = vpack.c.b16 %v2052_v4, %v2051_v3  ;;  %v2685_v19 = vunpack.c.l.b16 %v976_v5  ;;  %v993_v25 = vrot.slane %v991_v15, 5  ;;  %v999_v26 = vrot.slane %v997_v16, 5  ;;  %v239_v4 = vld [vmem:[%s6461_s8 + $0x50] sm:$0x1]  ;;  %v5518_v16 = vld [vmem:[%s6461_s8 + $0x5c] sm:$0x1] }
  0x48   : > { %v1003_v28 = vrot.slane %v1001_v17, 4  ;;  %v380_v34 = vrot.slane %v379_v21, 4  ;;  %v394_v35 = vrot.slane %v392_v23, 5  ;;  %v390_v39 = vrot.slane %v389_v22, 4 }
  0x49   : > { %v6606_v33 = vpack.c.b16 %v2686_v20, %v2685_v19  ;;  %v994_v40 = vor.u32 %v993_v25, %v990_v24  ;;  %v1007_v42 = vshll.u32 %v5517_v29, 16  ;;  %v397_v43 = vshrl.u32 %v213_v32, 16  ;;  %v6192_v24 = vld [vmem:[%s6461_s8 + $0x54] sm:$0xff]  ;;  %v6176_v25 = vld [vmem:[%s6461_s8 + $0x48] sm:$0xff] }
  0x4a   : > { %v1004_v41 = vor.u32 %v1003_v28, %v999_v26  ;;  %v410_v47 = vshrl.u32 %v214_v36, 16  ;;  %v385_v50 = vsel %vm6477_vm4, %v380_v34, %v384_v11  ;;  %v395_v52 = vsel %vm6477_vm4, %v390_v39, %v394_v35 }
  0x4b   : > { %v995_v53 = vrot.slane %v994_v40, 4  ;;  %v1009_v55 = vrot.slane %v1007_v42, 5  ;;  %v1012_v56 = vshrl.u32 %v5492_v48, 16  ;;  %v1015_v57 = vshll.u32 %v5492_v48, 16 }
  0x4c   : > { %v1005_v54 = vrot.slane %v1004_v41, 4  ;;  %v1021_v58 = vshll.u32 %v5493_v49, 16  ;;  %v1025_v61 = vshrl.u32 %v5493_v49, 16  ;;  %v399_v62 = vrot.slane %v397_v43, 4 }
  0x4d   : > { %v412_v1 = vrot.slane %v410_v47, 4  ;;  %v2053_v2 = vunpack.c.l.b16 %v385_v50  ;;  %v2054_v3 = vunpack.c.l.b16 %v395_v52  ;;  %v1000_v5 = vsel %vm6477_vm4, %v995_v53, %v999_v26  ;;  %v5495_v47 = vld [vmem:[%s6461_s8 + $0x64] sm:$0xf] }
  0x4e   : > { %v1010_v7 = vsel %vm6477_vm4, %v1005_v54, %v1009_v55  ;;  %v1014_v8 = vrot.slane %v1012_v56, 4  ;;  %v1017_v9 = vrot.slane %v1015_v57, 5  ;;  %v1023_v11 = vrot.slane %v1021_v58, 5 }
  0x4f   : > { %v1027_v12 = vrot.slane %v1025_v61, 4  ;;  %v416_v15 = vshll.u32 %v239_v4, 16  ;;  %v6625_v17 = vpack.c.b16 %v2054_v3, %v2053_v2  ;;  %v2687_v19 = vunpack.c.l.b16 %v1000_v5 }
  0x50   : > { %v2688_v20 = vunpack.c.l.b16 %v1010_v7  ;;  %v1018_v21 = vor.u32 %v1017_v9, %v1014_v8  ;;  %v1031_v23 = vshll.u32 %v5518_v16, 16  ;;  %v1045_v61 = vshll.u32 %v5495_v47, 16  ;;  %v5519_v9 = vld [vmem:[%s6461_s8 + $0x68] sm:$0x1] }
  0x51   : > { %5644 = vmatmul.msk.bf16.gmra.mxu0 %vm2091_vm1, %v6572_v37  ;;  %v1028_v22 = vor.u32 %v1027_v12, %v1023_v11  ;;  %v418_v29 = vrot.slane %v416_v15, 5 }
  0x52   : > { %v1019_v34 = vrot.slane %v1018_v21, 4 }
  0x53   : > { %v1029_v35 = vrot.slane %v1028_v22, 4 }
  0x54   : > { %5806 = vmatmul.msk.bf16.gmra.mxu2 %vm2091_vm1, %v6190_v45  ;;  %5725 = vmatmul.msk.bf16.gmra.mxu1 %vm2091_vm1, %v6174_v46  ;;  %v400_v45 = vshll.u32 %v213_v32, 16  ;;  %v406_v46 = vshll.u32 %v214_v36, 16  ;;  %v216_v32 = vld [vmem:[%s6461_s8 + $0x58] sm:$0xf]  ;;  %v1033_v36 = vrot.slane %v1031_v23, 5  ;;  %v1024_v50 = vsel %vm6477_vm4, %v1019_v34, %v1023_v11 }
  0x55   : > { %5822 = vmatmul.msk.bf16.gmra.mxu3 %vm2091_vm1, %v6579_v51  ;;  %v430_v43 = vshll.u32 %v216_v32, 16  ;;  %v1047_v11 = vrot.slane %v1045_v61, 5 }
  0x56   : > { %v402_v63 = vrot.slane %v400_v45, 5  ;;  %v408_v0 = vrot.slane %v406_v46, 5  ;;  %v434_v45 = vshrl.u32 %v216_v32, 16  ;;  %v5494_v46 = vld [vmem:[%s6461_s8 + $0x60] sm:$0xf]  ;;  %v1034_v52 = vsel %vm6477_vm4, %v1029_v35, %v1033_v36 }
  0x57   : > { %v1036_v55 = vshrl.u32 %v5494_v46, 16  ;;  %v1039_v56 = vshll.u32 %v5494_v46, 16  ;;  %v432_v57 = vrot.slane %v430_v43, 5  ;;  %v2690_v2 = vunpack.c.l.b16 %v1034_v52 }
  0x58   : > { %v403_v13 = vor.u32 %v402_v63, %v399_v62  ;;  %v413_v14 = vor.u32 %v412_v1, %v408_v0  ;;  %v436_v58 = vrot.slane %v434_v45, 4  ;;  %v1049_v62 = vshrl.u32 %v5495_v47, 16  ;;  %v240_v63 = vld [vmem:[%s6461_s8 + $0x5c] sm:$0x1] }
  0x59   : > { %v2689_v1 = vunpack.c.l.b16 %v1024_v50  ;;  %v1038_v4 = vrot.slane %v1036_v55, 4  ;;  %v1041_v5 = vrot.slane %v1039_v56, 5  ;;  %v440_v8 = vshll.u32 %v240_v63, 16  ;;  %v241_v56 = vld [vmem:[%s6461_s8 + $0x68] sm:$0x1] }
  0x5a   : > { %v404_v26 = vrot.slane %v403_v13, 4  ;;  %v414_v28 = vrot.slane %v413_v14, 4  ;;  %v437_v7 = vor.u32 %v436_v58, %v432_v57  ;;  %v1051_v12 = vrot.slane %v1049_v62, 4  ;;  %v6193_v13 = vld [vmem:[%s6461_s8 + $0x60] sm:$0xff]  ;;  %v6177_v14 = vld [vmem:[%s6461_s8 + $0x54] sm:$0xff] }
  0x5b   : > { %v1042_v16 = vor.u32 %v1041_v5, %v1038_v4  ;;  %v442_v22 = vrot.slane %v440_v8, 5  ;;  %v5520_v4 = vld [vmem:[%s6461_s8 + $0x74] sm:$0x1] }
  0x5c   : > { %v409_v39 = vsel %vm6477_vm4, %v404_v26, %v408_v0  ;;  %v419_v40 = vsel %vm6477_vm4, %v414_v28, %v418_v29  ;;  %v438_v21 = vrot.slane %v437_v7, 4  ;;  %v1052_v23 = vor.u32 %v1051_v12, %v1047_v11 }
  0x5d   : > { %v2055_v48 = vunpack.c.l.b16 %v409_v39  ;;  %v2056_v49 = vunpack.c.l.b16 %v419_v40  ;;  %v1043_v28 = vrot.slane %v1042_v16, 4 }
  0x5e   : > { %v443_v32 = vsel %vm6477_vm4, %v438_v21, %v442_v22  ;;  %v1053_v34 = vrot.slane %v1052_v23, 4  ;;  %v220_v23 = vld [vmem:[%s6461_s8 + $0x70] sm:$0xf] }
  0x5f   : > { %v6650_v0 = vpack.c.b16 %v2056_v49, %v2055_v48  ;;  %v2058_v46 = vunpack.c.l.b16 %v443_v32  ;;  %v1048_v47 = vsel %vm6477_vm4, %v1043_v28, %v1047_v11  ;;  %v6178_v11 = vld [vmem:[%s6461_s8 + $0x60] sm:$0xff]  ;;  %v5498_v28 = vld [vmem:[%s6461_s8 + $0x78] sm:$0xf]  ;;  %v5499_v32 = vld [vmem:[%s6461_s8 + $0x7c] sm:$0xf] }
  0x60   : > { %v2691_v62 = vunpack.c.l.b16 %v1048_v47  ;;  %v1093_v47 = vshll.u32 %v5499_v32, 16 }
  0x61   : > { %5645 = vmatmul.msk.bf16.gmra.mxu0 %vm2091_vm1, %v6598_v18 }
  0x64   : > { %5807 = vmatmul.msk.bf16.gmra.mxu2 %vm2091_vm1, %v6191_v30  ;;  %5726 = vmatmul.msk.bf16.gmra.mxu1 %vm2091_vm1, %v6175_v31  ;;  %v6631_v30 = vpack.c.b16 %v2688_v20, %v2687_v19  ;;  %v215_v31 = vld [vmem:[%s6461_s8 + $0x54] sm:$0xf]  ;;  %v1055_v19 = vshll.u32 %v5519_v9, 16  ;;  %v6657_v20 = vpack.c.b16 %v2690_v2, %v2689_v1  ;;  %v6194_v9 = vld [vmem:[%s6461_s8 + $0x6c] sm:$0xff] }
  0x65   : > { %5823 = vmatmul.msk.bf16.gmra.mxu3 %vm2091_vm1, %v6606_v33  ;;  %v421_v41 = vshrl.u32 %v215_v31, 16  ;;  %v424_v42 = vshll.u32 %v215_v31, 16  ;;  %v5496_v31 = vld [vmem:[%s6461_s8 + $0x6c] sm:$0xf] }
  0x66   : > { %v1057_v29 = vrot.slane %v1055_v19, 5  ;;  %v1063_v43 = vshll.u32 %v5496_v31, 16 }
  0x67   : > { %v423_v53 = vrot.slane %v421_v41, 4  ;;  %v426_v54 = vrot.slane %v424_v42, 5  ;;  %v5497_v41 = vld [vmem:[%s6461_s8 + $0x70] sm:$0xf]  ;;  %v1060_v42 = vshrl.u32 %v5496_v31, 16  ;;  %v482_v31 = vshrl.u32 %v220_v23, 16 }
  0x68   : > { %v1058_v48 = vsel %vm6477_vm4, %v1053_v34, %v1057_v29  ;;  %v1073_v55 = vshrl.u32 %v5497_v41, 16  ;;  %v1065_v58 = vrot.slane %v1063_v43, 5  ;;  %v478_v29 = vshll.u32 %v220_v23, 16 }
  0x69   : > { %v427_v3 = vor.u32 %v426_v54, %v423_v53  ;;  %v1069_v54 = vshll.u32 %v5497_v41, 16  ;;  %v2692_v63 = vunpack.c.l.b16 %v1058_v48  ;;  %v1087_v43 = vshll.u32 %v5498_v28, 16 }
  0x6a   : > { %v1075_v7 = vrot.slane %v1073_v55, 4  ;;  %v1097_v48 = vshrl.u32 %v5499_v32, 16 }
  0x6b   : > { %v428_v15 = vrot.slane %v427_v3, 4  ;;  %v464_v3 = vshll.u32 %v241_v56, 16  ;;  %v1071_v5 = vrot.slane %v1069_v54, 5  ;;  %v6683_v12 = vpack.c.b16 %v2692_v63, %v2691_v62  ;;  %v242_v56 = vld [vmem:[%s6461_s8 + $0x74] sm:$0x1] }
  0x6c   : > { %v484_v54 = vrot.slane %v482_v31, 4  ;;  %v1089_v63 = vrot.slane %v1087_v43, 5  ;;  %v222_v31 = vld [vmem:[%s6461_s8 + $0x7c] sm:$0xf]  ;;  %v5500_v43 = vld [vmem:[%s6461_s8 + $0x84] sm:$0xf] }
  0x6d   : > { %v433_v26 = vsel %vm6477_vm4, %v428_v15, %v432_v57  ;;  %v1062_v57 = vrot.slane %v1060_v42, 4  ;;  %v219_v15 = vld [vmem:[%s6461_s8 + $0x6c] sm:$0xf]  ;;  %v466_v21 = vrot.slane %v464_v3, 5  ;;  %v1076_v22 = vor.u32 %v1075_v7, %v1071_v5 }
  0x6e   : > { %v2057_v45 = vunpack.c.l.b16 %v433_v26  ;;  %v472_v26 = vshll.u32 %v219_v15, 16  ;;  %v1084_v42 = vshrl.u32 %v5498_v28, 16  ;;  %v488_v7 = vshll.u32 %v242_v56, 16 }
  0x6f   : > { %v1066_v8 = vor.u32 %v1065_v58, %v1062_v57 }
  0x70   : > { %v6676_v61 = vpack.c.b16 %v2058_v46, %v2057_v45  ;;  %v474_v46 = vrot.slane %v472_v26, 5  ;;  %v1086_v58 = vrot.slane %v1084_v42, 4  ;;  %v490_v28 = vrot.slane %v488_v7, 5 }
  0x71   : > { %5646 = vmatmul.msk.bf16.gmra.mxu0 %vm2091_vm1, %v6625_v17 }
  0x74   : > { %5808 = vmatmul.msk.bf16.gmra.mxu2 %vm2091_vm1, %v6192_v24  ;;  %5727 = vmatmul.msk.bf16.gmra.mxu1 %vm2091_vm1, %v6176_v25  ;;  %v217_v24 = vld [vmem:[%s6461_s8 + $0x60] sm:$0xf]  ;;  %v218_v25 = vld [vmem:[%s6461_s8 + $0x64] sm:$0xf] }
  0x75   : > { %5824 = vmatmul.msk.bf16.gmra.mxu3 %vm2091_vm1, %v6631_v30  ;;  %v445_v35 = vshrl.u32 %v217_v24, 16  ;;  %v448_v36 = vshll.u32 %v217_v24, 16  ;;  %v454_v39 = vshll.u32 %v218_v25, 16  ;;  %v458_v40 = vshrl.u32 %v218_v25, 16 }
  0x76   : > { %v1067_v24 = vrot.slane %v1066_v8, 4  ;;  %v469_v25 = vshrl.u32 %v219_v15, 16  ;;  %v5521_v8 = vld [vmem:[%s6461_s8 + $0x80] sm:$0x1]  ;;  %v6179_v15 = vld [vmem:[%s6461_s8 + $0x6c] sm:$0xff] }
  0x77   : > { %v447_v49 = vrot.slane %v445_v35, 4  ;;  %v450_v50 = vrot.slane %v448_v36, 5  ;;  %v456_v52 = vrot.slane %v454_v39, 5  ;;  %v460_v53 = vrot.slane %v458_v40, 4 }
  0x78   : > { %v1077_v36 = vrot.slane %v1076_v22, 4  ;;  %v1072_v41 = vsel %vm6477_vm4, %v1067_v24, %v1071_v5  ;;  %v471_v45 = vrot.slane %v469_v25, 4  ;;  %v1103_v22 = vshll.u32 %v5521_v8, 16 }
  0x79   : > { %v451_v1 = vor.u32 %v450_v50, %v447_v49  ;;  %v461_v2 = vor.u32 %v460_v53, %v456_v52  ;;  %v480_v53 = vrot.slane %v478_v29, 5  ;;  %v2693_v57 = vunpack.c.l.b16 %v1072_v41  ;;  %v221_v29 = vld [vmem:[%s6461_s8 + $0x78] sm:$0xf] }
  0x7a   : > { %v475_v62 = vor.u32 %v474_v46, %v471_v45  ;;  %v493_v41 = vshrl.u32 %v221_v29, 16  ;;  %v496_v42 = vshll.u32 %v221_v29, 16  ;;  %v502_v46 = vshll.u32 %v222_v31, 16 }
  0x7b   : > { %v452_v16 = vrot.slane %v451_v1, 4  ;;  %v462_v19 = vrot.slane %v461_v2, 4  ;;  %v1095_v1 = vrot.slane %v1093_v47, 5  ;;  %v1099_v2 = vrot.slane %v1097_v48, 4  ;;  %v6731_v48 = vld [vmem:[%s8411_s2] ss:$0 sm:$0xff] }
  0x7c   : > { %v485_v5 = vor.u32 %v484_v54, %v480_v53  ;;  %v506_v47 = vshrl.u32 %v222_v31, 16  ;;  %v6744_v7 = vrot.slane %v502_v46, 5  ;;  %v5522_v31 = vld [vmem:[%s6461_s8 + $0x8c] sm:$0x1] }
  0x7d   : > { %v457_v34 = vsel %vm6477_vm4, %v452_v16, %v456_v52  ;;  %v467_v35 = vsel %vm6477_vm4, %v462_v19, %v466_v21  ;;  %v476_v16 = vrot.slane %v475_v62, 4  ;;  %v1090_v19 = vor.u32 %v1089_v63, %v1086_v58 }
  0x7e   : > { %v2059_v50 = vunpack.c.l.b16 %v457_v34  ;;  %v2060_v52 = vunpack.c.l.b16 %v467_v35  ;;  %v1100_v21 = vor.u32 %v1099_v2, %v1095_v1  ;;  %v486_v26 = vrot.slane %v485_v5, 4  ;;  %v243_v5 = vld [vmem:[%s6461_s8 + $0x80] sm:$0x1] }
  0x7f   : > { %v481_v32 = vsel %vm6477_vm4, %v476_v16, %v480_v53  ;;  %v1105_v35 = vrot.slane %v1103_v22, 5  ;;  %v495_v63 = vrot.slane %v493_v41, 4  ;;  %v498_v2 = vrot.slane %v496_v42, 5  ;;  %v6196_v42 = vld [vmem:[%s6461_s8 + $0x84] sm:$0xff] }
  0x80   : > { %v6704_v3 = vpack.c.b16 %v2060_v52, %v2059_v50  ;;  %v1101_v34 = vrot.slane %v1100_v21, 4  ;;  %v2061_v52 = vunpack.c.l.b16 %v481_v32  ;;  %v508_v8 = vrot.slane %v506_v47, 4 }
  0x81   : > { %5647 = vmatmul.msk.bf16.gmra.mxu0 %vm2091_vm1, %v6650_v0 }
  0x82   : > { %v1106_v56 = vsel %vm6477_vm4, %v1101_v34, %v1105_v35 }
  0x83   : > { %v2696_v21 = vunpack.c.l.b16 %v1106_v56 }
  0x84   : > { %5809 = vmatmul.msk.bf16.gmra.mxu2 %vm2091_vm1, %v6193_v13  ;;  %5728 = vmatmul.msk.bf16.gmra.mxu1 %vm2091_vm1, %v6177_v14  ;;  %v1079_v14 = vshll.u32 %v5520_v4, 16 }
  0x85   : > { %5825 = vmatmul.msk.bf16.gmra.mxu3 %vm2091_vm1, %v6657_v20 }
  0x86   : > { %v1081_v39 = vrot.slane %v1079_v14, 5  ;;  %v6195_v14 = vld [vmem:[%s6461_s8 + $0x78] sm:$0xff] }
  0x88   : > { %v1082_v55 = vsel %vm6477_vm4, %v1077_v36, %v1081_v39  ;;  %v491_v39 = vsel %vm6477_vm4, %v486_v26, %v490_v28  ;;  %v512_v26 = vshll.u32 %v243_v5, 16 }
  0x89   : > { %v2694_v4 = vunpack.c.l.b16 %v1082_v55  ;;  %v2062_v54 = vunpack.c.l.b16 %v491_v39 }
  0x8b   : > { %v6713_v24 = vpack.c.b16 %v2694_v4, %v2693_v57  ;;  %v1108_v57 = vshrl.u32 %v5500_v43, 16  ;;  %v1111_v4 = vshll.u32 %v5500_v43, 16  ;;  %v6748_v16 = vpack.c.b16 %v2062_v54, %v2061_v52  ;;  %v6180_v43 = vld [vmem:[%s6461_s8 + $0x78] sm:$0xff] }
  0x8d   : > { %v1110_v28 = vrot.slane %v1108_v57, 4  ;;  %v1113_v32 = vrot.slane %v1111_v4, 5  ;;  %v5502_v4 = vld [vmem:[%s6461_s8 + $0x90] sm:$0xf] }
  0x8f   : > { %v1114_v56 = vor.u32 %v1113_v32, %v1110_v28 }
  0x91   : > { %5648 = vmatmul.msk.bf16.gmra.mxu0 %vm2091_vm1, %v6676_v61  ;;  %v2357_v13 = vpop.f32.mrf.mxu1 }
  0x94   : > { %5810 = vmatmul.msk.bf16.gmra.mxu2 %vm2091_vm1, %v6194_v9  ;;  %5729 = vmatmul.msk.bf16.gmra.mxu1 %vm2091_vm1, %v6178_v11 }
  0x95   : > { %5826 = vmatmul.msk.bf16.gmra.mxu3 %vm2091_vm1, %v6683_v12 }
  0x97   : > { %v2563_v40 = vpop.f32.mrf.mxu2 }
  0x99   : > { %v6699_v49 = vpop.f32.mrf.mxu1 }
  0x9e   : > { %v2153_v9 = vpop.f32.mrf.mxu0 }
  0x9f   : > { %v6707_v11 = vpop.f32.mrf.mxu2  ;;  %v2358_v23 = vadd.f32 %v2357_v13, %v2153_v9  ;;  %v1091_v13 = vrot.slane %v1090_v19, 4 }
  0xa1   : > { %5649 = vmatmul.msk.bf16.gmra.mxu0 %vm2091_vm1, %v6704_v3  ;;  %v6715_v25 = vpop.f32.mrf.mxu1  ;;  %v2643_v36 = vadd.f32 %v2563_v40, %v2358_v23  ;;  %v5501_v40 = vld [vmem:[%s6461_s8 + $0x88] sm:$0xf]  ;;  %v1096_v55 = vsel %vm6477_vm4, %v1091_v13, %v1095_v1  ;;  %v499_v23 = vor.u32 %v498_v2, %v495_v63 }
  0xa2   : > { %v1117_v9 = vshll.u32 %v5501_v40, 16  ;;  %v2695_v19 = vunpack.c.l.b16 %v1096_v55  ;;  %v514_v55 = vrot.slane %v512_v26, 5  ;;  %v1132_v26 = vshrl.u32 %v5502_v4, 16 }
  0xa4   : > { %5811 = vmatmul.msk.bf16.gmra.mxu2 %vm2091_vm1, %v6195_v14  ;;  %5730 = vmatmul.msk.bf16.gmra.mxu1 %vm2091_vm1, %v6179_v15  ;;  %v1121_v14 = vshrl.u32 %v5501_v40, 16  ;;  %v6757_v13 = vrot.slane %v1117_v9, 5  ;;  %v6764_v41 = vpack.c.b16 %v2696_v21, %v2695_v19  ;;  %v1127_v40 = vshll.u32 %v5522_v31, 16 }
  0xa5   : > { %5827 = vmatmul.msk.bf16.gmra.mxu3 %vm2091_vm1, %v6713_v24 }
  0xa6   : > { %v2155_v45 = vpop.f32.mrf.mxu0  ;;  %v1123_v34 = vrot.slane %v1121_v14, 4  ;;  %8432 = vst [vmem:[#allocation2_spill] sm:$0xff] %v6764_v41 }
  0xa7   : > { %v6733_v50 = vpop.f32.mrf.mxu2  ;;  %v2360_v15 = vadd.f32 %v6699_v49, %v2155_v45  ;;  %v509_v49 = vor.u32 %v508_v8, %v6744_v7  ;;  %v223_v45 = vld [vmem:[%s6461_s8 + $0x84] sm:$0xf] }
  0xa8   : > { %v2785_v53 = vpop.f32.mrf.mxu3  ;;  %v1124_v57 = vor.u32 %v1123_v34, %v6757_v13  ;;  %v517_v63 = vshrl.u32 %v223_v45, 16  ;;  %v520_v2 = vshll.u32 %v223_v45, 16 }
  0xa9   : > { %v2865_v58 = vadd.f32 %v2785_v53, %v2643_v36  ;;  %v6740_v62 = vpop.f32.mrf.mxu1  ;;  %v2644_v35 = vadd.f32 %v6707_v11, %v2360_v15  ;;  %v500_v11 = vrot.slane %v499_v23, 4  ;;  %v224_v53 = vld [vmem:[%s6461_s8 + $0x88] sm:$0xf]  ;;  %v510_v54 = vrot.slane %v509_v49, 4  ;;  %v5503_v15 = vld [vmem:[%s6461_s8 + $0x94] sm:$0xf] }
  0xaa   : > { %v530_v5 = vshrl.u32 %v224_v53, 16  ;;  %v1125_v23 = vrot.slane %v1124_v57, 4  ;;  %v522_v49 = vrot.slane %v520_v2, 5  ;;  %v1141_v34 = vshll.u32 %v5503_v15, 16 }
  0xab   : > { %v2900_v1 = vadd.f32 %v6731_v48, %v2865_v58  ;;  %v505_v14 = vsel %vm6477_vm4, %v500_v11, %v6744_v7  ;;  %v515_v21 = vsel %vm6477_vm4, %v510_v54, %v514_v55 }
  0xac   : > { %v532_v7 = vrot.slane %v530_v5, 4  ;;  %v2064_v45 = vunpack.c.l.b16 %v515_v21  ;;  %v6807_v2 = vrot.slane %v1141_v34, 5  ;;  %v226_v21 = vld [vmem:[%s6461_s8 + $0x94] sm:$0xf] }
  0xad   : > { %v2932_v22 = vmax.f32 %v2900_v1, 0.0  ;;  %v1129_v1 = vrot.slane %v1127_v40, 5  ;;  %v1134_v40 = vrot.slane %v1132_v26, 4  ;;  %v6181_v26 = vld [vmem:[%s6461_s8 + $0x84] sm:$0xff] }
  0xae   : > { %v2158_v29 = vpop.f32.mrf.mxu0 }
  0xaf   : > { %v6760_v36 = vpop.f32.mrf.mxu2  ;;  %2965 = vst.msk [vmem:[%s6753_s18] sm:$0xff] %vm2964_vm5, %v2932_v22  ;;  %v2363_v47 = vadd.f32 %v6715_v25, %v2158_v29  ;;  %v526_v25 = vshll.u32 %v224_v53, 16  ;;  %v1115_v22 = vrot.slane %v1114_v56, 4  ;;  %v519_v29 = vrot.slane %v517_v63, 4  ;;  %v5523_v63 = vld [vmem:[%s6461_s8 + $0x98] sm:$0x1] }
  0xb0   : > { %v2787_v39 = vpop.f32.mrf.mxu3  ;;  %v1130_v11 = vsel %vm6477_vm4, %v1125_v23, %v1129_v1  ;;  %v6197_v23 = vld [vmem:[%s6461_s8 + $0x90] sm:$0xff] }
  0xb1   : > { %v2866_v46 = vadd.f32 %v2787_v39, %v2644_v35  ;;  %5650 = vmatmul.msk.bf16.gmra.mxu0 %vm2091_vm1, %v6748_v16  ;;  %v6772_v52 = vpop.f32.mrf.mxu1  ;;  %v2645_v9 = vadd.f32 %v6733_v50, %v2363_v47  ;;  %v1135_v50 = vshll.u32 %v5502_v4, 16  ;;  %v6791_v32 = vrot.slane %v526_v25, 5 }
  0xb2   : > { %v1145_v35 = vshrl.u32 %v5503_v15, 16  ;;  %v1120_v47 = vsel %vm6477_vm4, %v1115_v22, %v6757_v13  ;;  %v523_v55 = vor.u32 %v522_v49, %v519_v29 }
  0xb3   : > { %v2901_v58 = vadd.f32 %v6731_v48, %v2866_v46  ;;  %v244_v46 = vld [vmem:[%s6461_s8 + $0x8c] sm:$0x1]  ;;  %v1137_v56 = vrot.slane %v1135_v50, 5  ;;  %v533_v57 = vor.u32 %v532_v7, %v6791_v32  ;;  %v2697_v5 = vunpack.c.l.b16 %v1120_v47  ;;  %v5504_v47 = vld [vmem:[%s6461_s8 + $0x9c] sm:$0xf] }
  0xb4   : > { %5812 = vmatmul.msk.bf16.gmra.mxu2 %vm2091_vm1, %v6196_v42  ;;  %5731 = vmatmul.msk.bf16.gmra.mxu1 %vm2091_vm1, %v6180_v43  ;;  %v2063_v43 = vunpack.c.l.b16 %v505_v14  ;;  %v1147_v13 = vrot.slane %v1145_v35, 4  ;;  %v524_v29 = vrot.slane %v523_v55, 4 }
  0xb5   : > { %v2933_v8 = vmax.f32 %v2901_v58, 0.0  ;;  %5828 = vmatmul.msk.bf16.gmra.mxu3 %vm2091_vm1, %v6764_v41  ;;  %v536_v58 = vshll.u32 %v244_v46, 16  ;;  %v1138_v15 = vor.u32 %v1137_v56, %v1134_v40  ;;  %v534_v49 = vrot.slane %v533_v57, 4  ;;  %v5505_v56 = vld [vmem:[%s6461_s8 + $0xa0] sm:$0xf] }
  0xb6   : > { %v2160_v19 = vpop.f32.mrf.mxu0  ;;  %v6809_v25 = vpack.c.b16 %v2064_v45, %v2063_v43  ;;  %v550_v45 = vshll.u32 %v226_v21, 16  ;;  %v554_v46 = vshrl.u32 %v226_v21, 16 }
  0xb7   : > { %v6789_v28 = vpop.f32.mrf.mxu2  ;;  %2966 = vst.msk [vmem:[%s6753_s18 + $0x8] sm:$0xff] %vm2964_vm5, %v2933_v8  ;;  %v2365_v54 = vadd.f32 %v6740_v62, %v2160_v19  ;;  %v2698_v8 = vunpack.c.l.b16 %v1130_v11  ;;  %v225_v62 = vld [vmem:[%s6461_s8 + $0x90] sm:$0xf]  ;;  %v1151_v19 = vshll.u32 %v5523_v63, 16  ;;  %v538_v50 = vrot.slane %v536_v58, 5 }
  0xb8   : > { %v2790_v31 = vpop.f32.mrf.mxu3  ;;  %v544_v43 = vshll.u32 %v225_v62, 16  ;;  %v1139_v40 = vrot.slane %v1138_v15, 4  ;;  %v1165_v15 = vshll.u32 %v5505_v56, 16 }
  0xb9   : > { %v2867_v39 = vadd.f32 %v2790_v31, %v2645_v9  ;;  %v6793_v42 = vpop.f32.mrf.mxu1  ;;  %v2646_v14 = vadd.f32 %v6760_v36, %v2365_v54  ;;  %v1148_v31 = vor.u32 %v1147_v13, %v6807_v2  ;;  %v6824_v36 = vpack.c.b16 %v2698_v8, %v2697_v5 }
  0xba   : > { %v1153_v55 = vrot.slane %v1151_v19, 5  ;;  %v1156_v13 = vshrl.u32 %v5504_v47, 16  ;;  %v546_v5 = vrot.slane %v544_v43, 5  ;;  %v6841_v8 = vrot.slane %v550_v45, 5 }
  0xbb   : > { %v2902_v53 = vadd.f32 %v6731_v48, %v2867_v39  ;;  %8433 = vst [vmem:[#allocation3_spill] sm:$0xff] %v6824_v36  ;;  %v541_v39 = vshrl.u32 %v225_v62, 16  ;;  %v1149_v54 = vrot.slane %v1148_v31, 4  ;;  %v1169_v19 = vshrl.u32 %v5505_v56, 16 }
  0xbd   : > { %v2934_v4 = vmax.f32 %v2902_v53, 0.0  ;;  %v539_v53 = vsel %vm6477_vm4, %v534_v49, %v538_v50  ;;  %v543_v63 = vrot.slane %v541_v39, 4  ;;  %v1154_v49 = vsel %vm6477_vm4, %v1149_v54, %v1153_v55 }
  0xbe   : > { %v2163_v9 = vpop.f32.mrf.mxu0  ;;  %v1158_v50 = vrot.slane %v1156_v13, 4 }
  0xbf   : > { %v6813_v1 = vpop.f32.mrf.mxu2  ;;  %2967 = vst.msk [vmem:[%s6753_s18 + $0x20] sm:$0xff] %vm2964_vm5, %v2934_v4  ;;  %v2368_v34 = vadd.f32 %v6772_v52, %v2163_v9  ;;  %v529_v52 = vsel %vm6477_vm4, %v524_v29, %v6791_v32  ;;  %v556_v32 = vrot.slane %v554_v46, 4  ;;  %v1159_v9 = vshll.u32 %v5504_v47, 16  ;;  %v5524_v46 = vld [vmem:[%s6461_s8 + $0xa4] sm:$0x1] }
  0xc0   : > { %v2792_v22 = vpop.f32.mrf.mxu3  ;;  %v547_v31 = vor.u32 %v546_v5, %v543_v63  ;;  %v6857_v47 = vrot.slane %v1165_v15, 5 }
  0xc1   : > { %v2868_v7 = vadd.f32 %v2792_v22, %v2646_v14  ;;  %5651 = vmatmul.msk.bf16.gmra.mxu0 %vm2091_vm1, %v6809_v25  ;;  %v6826_v35 = vpop.f32.mrf.mxu1  ;;  %v2647_v58 = vadd.f32 %v6789_v28, %v2368_v34  ;;  %v245_v14 = vld [vmem:[%s6461_s8 + $0x98] sm:$0x1]  ;;  %v2065_v22 = vunpack.c.l.b16 %v529_v52  ;;  %v1144_v28 = vsel %vm6477_vm4, %v1139_v40, %v6807_v2 }
  0xc2   : > { %v560_v34 = vshll.u32 %v245_v14, 16  ;;  %v1161_v39 = vrot.slane %v1159_v9, 5  ;;  %v1171_v2 = vrot.slane %v1169_v19, 4  ;;  %v2699_v52 = vunpack.c.l.b16 %v1144_v28  ;;  %v6182_v9 = vld [vmem:[%s6461_s8 + $0x90] sm:$0xff] }
  0xc3   : > { %v2903_v11 = vadd.f32 %v6731_v48, %v2868_v7  ;;  %v557_v7 = vor.u32 %v556_v32, %v6841_v8  ;;  %v548_v55 = vrot.slane %v547_v31, 4  ;;  %v6198_v32 = vld [vmem:[%s6461_s8 + $0x9c] sm:$0xff] }
  0xc4   : > { %5813 = vmatmul.msk.bf16.gmra.mxu2 %vm2091_vm1, %v6197_v23  ;;  %5732 = vmatmul.msk.bf16.gmra.mxu1 %vm2091_vm1, %v6181_v26  ;;  %v2066_v23 = vunpack.c.l.b16 %v539_v53  ;;  %v2700_v53 = vunpack.c.l.b16 %v1154_v49  ;;  %v562_v63 = vrot.slane %v560_v34, 5  ;;  %v1162_v13 = vor.u32 %v1161_v39, %v1158_v50 }
  0xc5   : > { %v2935_v57 = vmax.f32 %v2903_v11, 0.0  ;;  %5829 = vmatmul.msk.bf16.gmra.mxu3 %vm2091_vm1, %v6824_v36  ;;  %v558_v56 = vrot.slane %v557_v7, 4 }
  0xc6   : > { %v2165_v4 = vpop.f32.mrf.mxu0  ;;  %v6859_v40 = vpack.c.b16 %v2066_v23, %v2065_v22  ;;  %v6872_v19 = vpack.c.b16 %v2700_v53, %v2699_v52  ;;  %v228_v22 = vld [vmem:[%s6461_s8 + $0xa0] sm:$0xf]  ;;  %v553_v23 = vsel %vm6477_vm4, %v548_v55, %v6841_v8  ;;  %v1163_v49 = vrot.slane %v1162_v13, 4  ;;  %v5507_v52 = vld [vmem:[%s6461_s8 + $0xac] sm:$0xf] }
  0xc7   : > { %v2578_v62 = vpop.f32.mrf.mxu2  ;;  %2968 = vst.msk [vmem:[%s6753_s18 + $0x28] sm:$0xff] %vm2964_vm5, %v2935_v57  ;;  %v2370_v45 = vadd.f32 %v6793_v42, %v2165_v4  ;;  %v1175_v57 = vshll.u32 %v5524_v46, 16  ;;  %v1172_v4 = vor.u32 %v1171_v2, %v6857_v47  ;;  %v574_v34 = vshll.u32 %v228_v22, 16 }
  0xc8   : > { %v2795_v21 = vpop.f32.mrf.mxu3  ;;  %8434 = vst [vmem:[#allocation4_spill] sm:$0xff] %v6872_v19  ;;  %v578_v39 = vshrl.u32 %v228_v22, 16  ;;  %v2067_v2 = vunpack.c.l.b16 %v553_v23 }
  0xc9   : > { %v2869_v26 = vadd.f32 %v2795_v21, %v2647_v58  ;;  %v6844_v29 = vpop.f32.mrf.mxu1  ;;  %v2648_v42 = vadd.f32 %v6813_v1, %v2370_v45  ;;  %v227_v21 = vld [vmem:[%s6461_s8 + $0x9c] sm:$0xf]  ;;  %v1173_v50 = vrot.slane %v1172_v4, 4 }
  0xca   : > { %v565_v31 = vshrl.u32 %v227_v21, 16  ;;  %v568_v7 = vshll.u32 %v227_v21, 16  ;;  %v580_v13 = vrot.slane %v578_v39, 4 }
  0xcb   : > { %v2904_v43 = vadd.f32 %v6731_v48, %v2869_v26  ;;  %v1177_v26 = vrot.slane %v1175_v57, 5 }
  0xcd   : > { %v2936_v11 = vmax.f32 %v2904_v43, 0.0  ;;  %v5506_v43 = vld [vmem:[%s6461_s8 + $0xa8] sm:$0xf]  ;;  %v1178_v55 = vsel %vm6477_vm4, %v1173_v50, %v1177_v26  ;;  %v5525_v50 = vld [vmem:[%s6461_s8 + $0xb0] sm:$0x1] }
  0xce   : > { %v2168_v54 = vpop.f32.mrf.mxu0  ;;  %v2702_v26 = vunpack.c.l.b16 %v1178_v55  ;;  %v6183_v55 = vld [vmem:[%s6461_s8 + $0x9c] sm:$0xff] }
  0xcf   : > { %v6862_v58 = vpop.f32.mrf.mxu2  ;;  %2969 = vst.msk [vmem:[%s6753_s18 + $0x40] sm:$0xff] %vm2964_vm5, %v2936_v11  ;;  %v2373_v15 = vadd.f32 %v6826_v35, %v2168_v54  ;;  %v563_v35 = vsel %vm6477_vm4, %v558_v56, %v562_v63  ;;  %v1168_v54 = vsel %vm6477_vm4, %v1163_v49, %v6857_v47  ;;  %v1180_v56 = vshrl.u32 %v5506_v43, 16 }
  0xd0   : > { %v2797_v5 = vpop.f32.mrf.mxu3  ;;  %v2068_v11 = vunpack.c.l.b16 %v563_v35  ;;  %v570_v63 = vrot.slane %v568_v7, 5  ;;  %v2701_v23 = vunpack.c.l.b16 %v1168_v54  ;;  %v6199_v54 = vld [vmem:[%s6461_s8 + $0xa8] sm:$0xff] }
  0xd1   : > { %v2870_v14 = vadd.f32 %v2797_v5, %v2648_v42  ;;  %5652 = vmatmul.msk.bf16.gmra.mxu0 %vm2091_vm1, %v6859_v40  ;;  %v6874_v1 = vpop.f32.mrf.mxu1  ;;  %v2649_v8 = vadd.f32 %v2578_v62, %v2373_v15  ;;  %v567_v42 = vrot.slane %v565_v31, 4  ;;  %v6897_v62 = vrot.slane %v574_v34, 5 }
  0xd2   : > { %v1193_v15 = vshrl.u32 %v5507_v52, 16  ;;  %v6904_v47 = vpack.c.b16 %v2068_v11, %v2067_v2  ;;  %v1182_v31 = vrot.slane %v1180_v56, 4  ;;  %v229_v2 = vld [vmem:[%s6461_s8 + $0xa8] sm:$0xf] }
  0xd3   : > { %v2905_v28 = vadd.f32 %v6731_v48, %v2870_v14  ;;  %v1189_v14 = vshll.u32 %v5507_v52, 16  ;;  %v581_v35 = vor.u32 %v580_v13, %v6897_v62  ;;  %v6918_v52 = vpack.c.b16 %v2702_v26, %v2701_v23  ;;  %v5508_v23 = vld [vmem:[%s6461_s8 + $0xb4] sm:$0xf] }
  0xd4   : > { %5814 = vmatmul.msk.bf16.gmra.mxu2 %vm2091_vm1, %v6198_v32  ;;  %5733 = vmatmul.msk.bf16.gmra.mxu1 %vm2091_vm1, %v6182_v9  ;;  %v246_v32 = vld [vmem:[%s6461_s8 + $0xa4] sm:$0x1]  ;;  %v1183_v9 = vshll.u32 %v5506_v43, 16  ;;  %v1195_v43 = vrot.slane %v1193_v15, 4  ;;  %v592_v15 = vshll.u32 %v229_v2, 16 }
  0xd5   : > { %v2937_v45 = vmax.f32 %v2905_v28, 0.0  ;;  %5830 = vmatmul.msk.bf16.gmra.mxu3 %vm2091_vm1, %v6872_v19  ;;  %v571_v28 = vor.u32 %v570_v63, %v567_v42  ;;  %v584_v49 = vshll.u32 %v246_v32, 16  ;;  %v6910_v39 = vrot.slane %v1189_v14, 5  ;;  %8435 = vst [vmem:[#allocation5_spill] sm:$0xff] %v6918_v52 }
  0xd6   : > { %v2170_v46 = vpop.f32.mrf.mxu0  ;;  %v1185_v34 = vrot.slane %v1183_v9, 5  ;;  %v230_v9 = vld [vmem:[%s6461_s8 + $0xac] sm:$0xf]  ;;  %v589_v14 = vshrl.u32 %v229_v2, 16 }
  0xd7   : > { %v6890_v53 = vpop.f32.mrf.mxu2  ;;  %2970 = vst.msk [vmem:[%s6753_s18 + $0x48] sm:$0xff] %vm2964_vm5, %v2937_v45  ;;  %v2375_v22 = vadd.f32 %v6844_v29, %v2170_v46  ;;  %v1199_v46 = vshll.u32 %v5525_v50, 16  ;;  %v572_v56 = vrot.slane %v571_v28, 4  ;;  %v586_v42 = vrot.slane %v584_v49, 5  ;;  %v5509_v49 = vld [vmem:[%s6461_s8 + $0xb8] sm:$0xf] }
  0xd8   : > { %v2800_v57 = vpop.f32.mrf.mxu3  ;;  %v1196_v32 = vor.u32 %v1195_v43, %v6910_v39  ;;  %v598_v28 = vshll.u32 %v230_v9, 16 }
  0xd9   : > { %v2871_v4 = vadd.f32 %v2800_v57, %v2649_v8  ;;  %v6899_v5 = vpop.f32.mrf.mxu1  ;;  %v2650_v29 = vadd.f32 %v6862_v58, %v2375_v22  ;;  %v582_v57 = vrot.slane %v581_v35, 4  ;;  %v1201_v22 = vrot.slane %v1199_v46, 5 }
  0xda   : > { %v602_v35 = vshrl.u32 %v230_v9, 16  ;;  %v1207_v46 = vshll.u32 %v5508_v23, 16 }
  0xdb   : > { %v2906_v21 = vadd.f32 %v6731_v48, %v2871_v4  ;;  %v1186_v4 = vor.u32 %v1185_v34, %v1182_v31  ;;  %v587_v26 = vsel %vm6477_vm4, %v582_v57, %v586_v42  ;;  %v1197_v34 = vrot.slane %v1196_v32, 4  ;;  %v247_v32 = vld [vmem:[%s6461_s8 + $0xb0] sm:$0x1] }
  0xdc   : > { %v604_v57 = vrot.slane %v602_v35, 4  ;;  %v5526_v35 = vld [vmem:[%s6461_s8 + $0xbc] sm:$0x1] }
  0xdd   : > { %v2938_v7 = vmax.f32 %v2906_v21, 0.0  ;;  %v1202_v9 = vsel %vm6477_vm4, %v1197_v34, %v1201_v22 }
  0xde   : > { %v2173_v45 = vpop.f32.mrf.mxu0 }
  0xdf   : > { %v6913_v8 = vpop.f32.mrf.mxu2  ;;  %2971 = vst.msk [vmem:[%s6753_s18 + $0x60] sm:$0xff] %vm2964_vm5, %v2938_v7  ;;  %v2378_v13 = vadd.f32 %v6874_v1, %v2173_v45  ;;  %v577_v1 = vsel %vm6477_vm4, %v572_v56, %v6897_v62  ;;  %v1187_v7 = vrot.slane %v1186_v4, 4  ;;  %v591_v45 = vrot.slane %v589_v14, 4 }
  0xe0   : > { %v2802_v11 = vpop.f32.mrf.mxu3  ;;  %v1204_v62 = vshrl.u32 %v5508_v23, 16  ;;  %v6942_v56 = vrot.slane %v598_v28, 5 }
  0xe1   : > { %v2872_v63 = vadd.f32 %v2802_v11, %v2650_v29  ;;  %5653 = vmatmul.msk.bf16.gmra.mxu0 %vm2091_vm1, %v6904_v47  ;;  %v6925_v58 = vpop.f32.mrf.mxu1  ;;  %v2651_v31 = vadd.f32 %v6890_v53, %v2378_v13  ;;  %v594_v29 = vrot.slane %v592_v15, 5  ;;  %v1213_v11 = vshll.u32 %v5509_v49, 16 }
  0xe2   : > { %v2069_v53 = vunpack.c.l.b16 %v577_v1  ;;  %v2070_v13 = vunpack.c.l.b16 %v587_v26  ;;  %v1192_v4 = vsel %vm6477_vm4, %v1187_v7, %v6910_v39  ;;  %v1206_v15 = vrot.slane %v1204_v62, 4 }
  0xe3   : > { %v2907_v21 = vadd.f32 %v6731_v48, %v2872_v63  ;;  %v595_v14 = vor.u32 %v594_v29, %v591_v45  ;;  %v6957_v1 = vrot.slane %v1213_v11, 5  ;;  %v605_v39 = vor.u32 %v604_v57, %v6942_v56 }
  0xe4   : > { %5815 = vmatmul.msk.bf16.gmra.mxu2 %vm2091_vm1, %v6199_v54  ;;  %5734 = vmatmul.msk.bf16.gmra.mxu1 %vm2091_vm1, %v6183_v55  ;;  %v1217_v54 = vshrl.u32 %v5509_v49, 16  ;;  %v608_v49 = vshll.u32 %v247_v32, 16  ;;  %v2703_v22 = vunpack.c.l.b16 %v1192_v4  ;;  %v2704_v7 = vunpack.c.l.b16 %v1202_v9  ;;  %v231_v32 = vld [vmem:[%s6461_s8 + $0xb4] sm:$0xf] }
  0xe5   : > { %v2939_v50 = vmax.f32 %v2907_v21, 0.0  ;;  %5831 = vmatmul.msk.bf16.gmra.mxu3 %vm2091_vm1, %v6918_v52  ;;  %v1209_v21 = vrot.slane %v1207_v46, 5  ;;  %v1223_v45 = vshll.u32 %v5526_v35, 16  ;;  %v606_v57 = vrot.slane %v605_v39, 4  ;;  %v5510_v39 = vld [vmem:[%s6461_s8 + $0xc0] sm:$0xf] }
  0xe6   : > { %v2175_v43 = vpop.f32.mrf.mxu0  ;;  %v1219_v26 = vrot.slane %v1217_v54, 4  ;;  %v6200_v54 = vld [vmem:[%s6461_s8 + $0xb4] sm:$0xff]  ;;  %v613_v35 = vshrl.u32 %v231_v32, 16 }
  0xe7   : > { %v2588_v2 = vpop.f32.mrf.mxu2  ;;  %2972 = vst.msk [vmem:[%s6753_s18 + $0x68] sm:$0xff] %vm2964_vm5, %v2939_v50  ;;  %v2380_v28 = vadd.f32 %v6899_v5, %v2175_v43  ;;  %v596_v43 = vrot.slane %v595_v14, 4  ;;  %v1210_v62 = vor.u32 %v1209_v21, %v1206_v15  ;;  %v1225_v9 = vrot.slane %v1223_v45, 5  ;;  %v232_v14 = vld [vmem:[%s6461_s8 + $0xb8] sm:$0xf] }
  0xe8   : > { %v2805_v55 = vpop.f32.mrf.mxu3  ;;  %v1220_v46 = vor.u32 %v1219_v26, %v6957_v1  ;;  %v616_v26 = vshll.u32 %v231_v32, 16 }
  0xe9   : > { %v2873_v42 = vadd.f32 %v2805_v55, %v2651_v31  ;;  %v6944_v63 = vpop.f32.mrf.mxu1  ;;  %v6960_v31 = vpack.c.b16 %v2070_v13, %v2069_v53  ;;  %v2652_v29 = vadd.f32 %v6913_v8, %v2380_v28  ;;  %v6184_v55 = vld [vmem:[%s6461_s8 + $0xa8] sm:$0xff]  ;;  %v6973_v8 = vpack.c.b16 %v2704_v7, %v2703_v22  ;;  %v5511_v7 = vld [vmem:[%s6461_s8 + $0xc4] sm:$0xf] }
  0xea   : > { %v601_v21 = vsel %vm6477_vm4, %v596_v43, %v6942_v56  ;;  %v622_v22 = vshll.u32 %v232_v14, 16  ;;  %v626_v56 = vshrl.u32 %v232_v14, 16 }
  0xeb   : > { %v2908_v23 = vadd.f32 %v6731_v48, %v2873_v42  ;;  %8436 = vst [vmem:[#allocation6_spill] sm:$0xff] %v6960_v31  ;;  %v610_v42 = vrot.slane %v608_v49, 5  ;;  %v2071_v43 = vunpack.c.l.b16 %v601_v21 }
  0xec   : > { %8437 = vst [vmem:[#allocation7_spill] sm:$0xff] %v6973_v8  ;;  %v7003_v21 = vrot.slane %v622_v22, 5 }
  0xed   : > { %v2940_v50 = vmax.f32 %v2908_v23, 0.0  ;;  %v1221_v23 = vrot.slane %v1220_v46, 4  ;;  %v611_v28 = vsel %vm6477_vm4, %v606_v57, %v610_v42  ;;  %v615_v57 = vrot.slane %v613_v35, 4 }
  0xee   : > { %v2178_v34 = vpop.f32.mrf.mxu0  ;;  %v2072_v46 = vunpack.c.l.b16 %v611_v28  ;;  %v1231_v42 = vshll.u32 %v5510_v39, 16  ;;  %v6246_v28 = vld [vmem:[%s6461_s8 + $0x8] sm:$0x1] }
  0xef   : > { %v6963_v5 = vpop.f32.mrf.mxu2  ;;  %2973 = vst.msk [vmem:[%s6753_s18 + $0x80] sm:$0xff] %vm2964_vm5, %v2940_v50  ;;  %v2383_v13 = vadd.f32 %v6925_v58, %v2178_v34  ;;  %v1211_v58 = vrot.slane %v1210_v62, 4  ;;  %v6245_v34 = vld [vmem:[%s6461_s8 + $0x4] sm:$0xf] }
  0xf0   : > { %v2807_v11 = vpop.f32.mrf.mxu3  ;;  %v705_v45 = vrot.slane %v6245_v34, 5  ;;  %v248_v34 = vld [vmem:[%s6461_s8 + $0xbc] sm:$0x1] }
  0xf1   : > { %v2874_v53 = vadd.f32 %v2807_v11, %v2652_v29  ;;  %5654 = vmatmul.msk.bf16.gmra.mxu0 %vm2091_vm1, %v6960_v31  ;;  %v6975_v4 = vpop.f32.mrf.mxu1  ;;  %v2653_v50 = vadd.f32 %v2588_v2, %v2383_v13  ;;  %v1216_v11 = vsel %vm6477_vm4, %v1211_v58, %v6957_v1  ;;  %v1241_v13 = vshrl.u32 %v5511_v7, 16  ;;  %v5527_v31 = vld [vmem:[%s6461_s8 + $0xc8] sm:$0x1] }
  0xf2   : > { %v628_v1 = vrot.slane %v626_v56, 4  ;;  %v707_v58 = vrot.slane %v705_v45, 4  ;;  %v7012_v56 = vpack.c.b16 %v2072_v46, %v2071_v43 }
  0xf3   : > { %v2909_v15 = vadd.f32 %v6731_v48, %v2874_v53  ;;  %v1237_v53 = vshll.u32 %v5511_v7, 16 }
  0xf4   : > { %5816 = vmatmul.msk.bf16.gmra.mxu2 %vm2091_vm1, %v6200_v54  ;;  %5735 = vmatmul.msk.bf16.gmra.mxu1 %vm2091_vm1, %v6184_v55  ;;  %v1226_v54 = vsel %vm6477_vm4, %v1221_v23, %v1225_v9  ;;  %v1228_v55 = vshrl.u32 %v5510_v39, 16  ;;  %v708_v9 = vrot.slane %v6246_v28, 5  ;;  %v636_v28 = vld [vmem:[%s6461_s8] sm:$0xe] }
  0xf5   : > { %v2941_v49 = vmax.f32 %v2909_v15, 0.0  ;;  %5832 = vmatmul.msk.bf16.gmra.mxu3 %vm2091_vm1, %v6973_v8  ;;  %v618_v15 = vrot.slane %v616_v26, 5  ;;  %v2706_v39 = vunpack.c.l.b16 %v1226_v54  ;;  %v1243_v26 = vrot.slane %v1241_v13, 4  ;;  %v6185_v13 = vld [vmem:[%s6461_s8 + $0xb4] sm:$0xff] }
  0xf6   : > { %v2180_v29 = vpop.f32.mrf.mxu0  ;;  %v1230_v7 = vrot.slane %v1228_v55, 4 }
  0xf7   : > { %v6992_v62 = vpop.f32.mrf.mxu2  ;;  %2974 = vst.msk [vmem:[%s6753_s18 + $0x88] sm:$0xff] %vm2964_vm5, %v2941_v49  ;;  %v2385_v35 = vadd.f32 %v6944_v63, %v2180_v29  ;;  %v2705_v49 = vunpack.c.l.b16 %v1216_v11  ;;  %v619_v8 = vor.u32 %v618_v15, %v615_v57  ;;  %v632_v29 = vshll.u32 %v248_v34, 16  ;;  %v6201_v57 = vld [vmem:[%s6461_s8 + $0xc0] sm:$0xff] }
  0xf8   : > { %v2810_v2 = vpop.f32.mrf.mxu3  ;;  %v5464_v11 = vrot.slane %v636_v28, 9 }
  0xf9   : > { %v2875_v32 = vadd.f32 %v2810_v2, %v2653_v50  ;;  %v7001_v14 = vpop.f32.mrf.mxu1  ;;  %v1233_v50 = vrot.slane %v1231_v42, 5  ;;  %v7010_v2 = vrot.slane %v1237_v53, 5  ;;  %v2654_v54 = vadd.f32 %v6963_v5, %v2385_v35 }
  0xfa   : > { %v7017_v55 = vpack.c.b16 %v2706_v39, %v2705_v49  ;;  %v1247_v53 = vshll.u32 %v5527_v31, 16  ;;  %v709_v5 = vsel %vm7019_vm8, %v707_v58, %v708_v9 }
  0xfb   : > { %v2910_v23 = vadd.f32 %v6731_v48, %v2875_v32  ;;  %v629_v32 = vor.u32 %v628_v1, %v7003_v21  ;;  %v1234_v15 = vor.u32 %v1233_v50, %v1230_v7  ;;  %v1244_v1 = vor.u32 %v1243_v26, %v7010_v2 }
  0xfc   : > { %v3002_v34 = vunpack.c.l.b16 %v709_v5  ;;  %v634_v7 = vrot.slane %v632_v29, 5  ;;  %v1249_v58 = vrot.slane %v1247_v53, 5 }
  0xfd   : > { %v2942_v22 = vmax.f32 %v2910_v23, 0.0  ;;  %v706_v23 = vsel %vm7019_vm8, %v5464_v11, %v705_v45  ;;  %v630_v28 = vrot.slane %v629_v32, 4  ;;  %v1235_v45 = vrot.slane %v1234_v15, 4  ;;  %v5937_v32 = vld [vmem:[%s8410_s1 + $0x14] sm:$0x3] }
  0xfe   : > { %v2183_v63 = vpop.f32.mrf.mxu0  ;;  %v3001_v39 = vunpack.c.l.b16 %v706_v23 }
  0xff   : > { %v2595_v42 = vpop.f32.mrf.mxu2  ;;  %2975 = vst.msk [vmem:[%s6753_s18 + $0xa0] sm:$0xff] %vm2964_vm5, %v2942_v22  ;;  %v2388_v31 = vadd.f32 %v6975_v4, %v2183_v63  ;;  %v620_v22 = vrot.slane %v619_v8, 4  ;;  %v1245_v8 = vrot.slane %v1244_v1, 4  ;;  %v6018_v63 = vld [vmem:[%s8410_s1 + $0x16] sm:$0x3] }
 0x100   : > { %v2812_v46 = vpop.f32.mrf.mxu3  ;;  %v7036_v26 = vpack.c.b16 %v3002_v34, %v3001_v39  ;;  %v4379_v53 = vsel %vm2140_vm0, %v6018_v63, 0  ;;  %v1240_v39 = vsel %vm6477_vm4, %v1235_v45, %v7010_v2 }
 0x101   : > { %v2876_v35 = vadd.f32 %v2812_v46, %v2654_v54  ;;  %5655 = vmatmul.msk.bf16.gmra.mxu0 %vm2091_vm1, %v7012_v56  ;;  %v2392_v49 = vpop.f32.mrf.mxu1  ;;  %v2655_v9 = vadd.f32 %v6992_v62, %v2388_v31  ;;  %v625_v11 = vsel %vm6477_vm4, %v620_v22, %v7003_v21  ;;  %v635_v54 = vsel %vm6477_vm4, %v630_v28, %v634_v7  ;;  %v5904_v46 = vld [vmem:[%s8410_s1 + $0x12] sm:$0x3] }
 0x102   : > { %v4157_v62 = vsel %vm2140_vm0, %v5937_v32, 0  ;;  %4388 = vmatpush.bf16.msra.mxu3 %v4379_v53  ;;  %v3859_v21 = vsel %vm2140_vm0, %v5904_v46, 0  ;;  %v2074_v31 = vunpack.c.l.b16 %v635_v54  ;;  %v1250_v34 = vsel %vm6477_vm4, %v1245_v8, %v1249_v58  ;;  %v5528_v53 = vld [vmem:[%s6461_s8 + $0xc] sm:$0xe]  ;;  %v6248_v46 = vld [vmem:[%s6461_s8 + $0x14] sm:$0x1] }
 0x103   : > { %v2911_v50 = vadd.f32 %v6731_v48, %v2876_v35  ;;  %4166 = vmatpush.bf16.msra.mxu2 %v4157_v62  ;;  %3868 = vmatpush.bf16.msra.mxu0 %v3859_v21  ;;  %v2073_v35 = vunpack.c.l.b16 %v625_v11 }
 0x104   : > { %5817 = vmatmul.msk.bf16.gmra.mxu2 %vm2091_vm1, %v6201_v57  ;;  %5736 = vmatmul.msk.bf16.gmra.mxu1 %vm2091_vm1, %v6185_v13  ;;  %v5903_v57 = vld [vmem:[%s8410_s1 + $0x10] sm:$0x3] }
 0x105   : > { %v2943_v4 = vmax.f32 %v2911_v50, 0.0  ;;  %5833 = vmatmul.msk.bf16.gmra.mxu3 %vm2091_vm1, %v7017_v55  ;;  %v3951_v15 = vsel %vm2140_vm0, %v5903_v57, 0  ;;  %v7073_v50 = vpack.c.b16 %v2074_v31, %v2073_v35  ;;  %v1320_v57 = vrot.slane %v6248_v46, 5 }
 0x106   : > { %v2185_v29 = vpop.f32.mrf.mxu0  ;;  %3960 = vmatpush.bf16.msra.mxu1 %v3951_v15  ;;  %v5544_v15 = vrot.slane %v5528_v53, 9 }
 0x107   : > { %v2598_v13 = vpop.f32.mrf.mxu2  ;;  %2976 = vst.msk [vmem:[%s6753_s18 + $0xa8] sm:$0xff] %vm2964_vm5, %v2943_v4  ;;  %v2390_v28 = vadd.f32 %v7001_v14, %v2185_v29  ;;  %v2707_v4 = vunpack.c.l.b16 %v1240_v39  ;;  %v6247_v29 = vld [vmem:[%s6461_s8 + $0x10] sm:$0xf] }
 0x108   : > { %v2815_v1 = vpop.f32.mrf.mxu3  ;;  %v1317_v54 = vrot.slane %v6247_v29, 5 }
 0x109   : > { %v2877_v23 = vadd.f32 %v2815_v1, %v2655_v9  ;;  %v2394_v5 = vpop.f32.mrf.mxu1  ;;  %v2708_v9 = vunpack.c.l.b16 %v1250_v34  ;;  %v2656_v63 = vadd.f32 %v2595_v42, %v2390_v28 }
 0x10a   : > { %v1319_v1 = vrot.slane %v1317_v54, 4 }
 0x10b   : > { %v2912_v22 = vadd.f32 %v6731_v48, %v2877_v23  ;;  %v7079_v8 = vpack.c.b16 %v2708_v9, %v2707_v4 }
 0x10d   : > { %v2944_v7 = vmax.f32 %v2912_v22, 0.0 }
 0x10e   : > { %v2188_v32 = vpop.f32.mrf.mxu0 }
 0x10f   : > { %v2600_v11 = vpop.f32.mrf.mxu2  ;;  %2977 = vst.msk [vmem:[%s6753_s18 + $0xc0] sm:$0xff] %vm2964_vm5, %v2944_v7  ;;  %v2393_v58 = vadd.f32 %v2392_v49, %v2188_v32  ;;  %v6249_v32 = vld [vmem:[%s6461_s8 + $0x10] sm:$0xf] }
 0x110   : > { %v2817_v2 = vpop.f32.mrf.mxu3 }
 0x111   : > { %v2878_v45 = vadd.f32 %v2817_v2, %v2656_v63  ;;  %5656 = vmatmul.msk.bf16.gmra.mxu0 %vm2091_vm1, %v7073_v50  ;;  %v2397_v14 = vpop.f32.mrf.mxu1  ;;  %v2657_v49 = vadd.f32 %v2598_v13, %v2393_v58  ;;  %v1321_v13 = vsel %vm7019_vm8, %v1319_v1, %v1320_v57  ;;  %v712_v63 = vrot.slane %v6249_v32, 5  ;;  %v637_v58 = vld [vmem:[%s6461_s8 + $0xc] sm:$0xe] }
 0x112   : > { %v3410_v4 = vunpack.c.l.b16 %v1321_v13  ;;  %v5465_v46 = vrot.slane %v637_v58, 9 }
 0x113   : > { %v2913_v62 = vadd.f32 %v6731_v48, %v2878_v45  ;;  %v714_v57 = vrot.slane %v712_v63, 4 }
 0x114   : > { %5870 = vmatmul.msk.bf16.vlgmr.msrb.gmra.mxu2 %vm2091_vm1, %v6503_v27  ;;  %5853 = vmatmul.msk.bf16.vlgmr.msrb.gmra.mxu1 %vm2091_vm1, %v6489_v6  ;;  %v1318_v6 = vsel %vm7019_vm8, %v5544_v15, %v1317_v54 }
 0x115   : > { %v2945_v42 = vmax.f32 %v2913_v62, 0.0  ;;  %5834 = vmatmul.msk.bf16.gmra.mxu3 %vm2091_vm1, %v7079_v8  ;;  %v3409_v7 = vunpack.c.l.b16 %v1318_v6  ;;  %v713_v6 = vsel %vm7019_vm8, %v5465_v46, %v712_v63 }
 0x116   : > { %v2190_v21 = vpop.f32.mrf.mxu0 }
 0x117   : > { %v2603_v23 = vpop.f32.mrf.mxu2  ;;  %2978 = vst.msk [vmem:[%s6753_s18 + $0xc8] sm:$0xff] %vm2964_vm5, %v2945_v42  ;;  %v2395_v22 = vadd.f32 %v2394_v5, %v2190_v21  ;;  %v7104_v5 = vpack.c.b16 %v3410_v4, %v3409_v7  ;;  %v6250_v42 = vld [vmem:[%s6461_s8 + $0x14] sm:$0x1]  ;;  %v5529_v21 = vld [vmem:[%s6461_s8 + $0x18] sm:$0xe] }
 0x118   : > { %v2820_v35 = vpop.f32.mrf.mxu3 }
 0x119   : > { %v2879_v31 = vadd.f32 %v2820_v35, %v2657_v49  ;;  %v2399_v39 = vpop.f32.mrf.mxu1  ;;  %v2658_v2 = vadd.f32 %v2600_v11, %v2395_v22  ;;  %v715_v49 = vrot.slane %v6250_v42, 5  ;;  %v6251_v11 = vld [vmem:[%s6461_s8 + $0x1c] sm:$0xf]  ;;  %v5545_v35 = vrot.slane %v5529_v21, 9 }
 0x11a   : > { %v1324_v15 = vrot.slane %v6251_v11, 5 }
 0x11b   : > { %v2914_v34 = vadd.f32 %v6731_v48, %v2879_v31  ;;  %v716_v13 = vsel %vm7019_vm8, %v714_v57, %v715_v49  ;;  %v6254_v57 = vld [vmem:[%s6461_s8 + $0x1c] sm:$0xf] }
 0x11c   : > { %v1325_v32 = vsel %vm7019_vm8, %v5545_v35, %v1324_v15  ;;  %v719_v21 = vrot.slane %v6254_v57, 5 }
 0x11d   : > { %v2946_v28 = vmax.f32 %v2914_v34, 0.0  ;;  %v6252_v34 = vld [vmem:[%s6461_s8 + $0x20] sm:$0x1]  ;;  %v3411_v42 = vunpack.c.l.b16 %v1325_v32 }
 0x11e   : > { %v2193_v9 = vpop.f32.mrf.mxu0  ;;  %v1327_v22 = vrot.slane %v6252_v34, 5  ;;  %v721_v34 = vrot.slane %v719_v21, 4 }
 0x11f   : > { %v2605_v45 = vpop.f32.mrf.mxu2  ;;  %2979 = vst.msk [vmem:[%s6753_s18 + $0xe0] sm:$0xff] %vm2964_vm5, %v2946_v28  ;;  %v2398_v62 = vadd.f32 %v2397_v14, %v2193_v9  ;;  %v3003_v9 = vunpack.c.l.b16 %v713_v6  ;;  %v6255_v6 = vld [vmem:[%s6461_s8 + $0x20] sm:$0x1] }
 0x120   : > { %v2822_v29 = vpop.f32.mrf.mxu3 }
 0x121   : > { %v2880_v54 = vadd.f32 %v2822_v29, %v2658_v2  ;;  %5837 = vmatmul.msk.bf16.vlgmr.msrb.gmra.mxu0 %vm2091_vm1, %v7036_v26  ;;  %v2402_v53 = vpop.f32.mrf.mxu1  ;;  %v2659_v14 = vadd.f32 %v2603_v23, %v2398_v62  ;;  %v3004_v23 = vunpack.c.l.b16 %v716_v13  ;;  %v7130_v2 = vld [vmem:[%s8411_s2] ss:$0 sm:$0xff]  ;;  %v722_v13 = vrot.slane %v6255_v6, 5 }
 0x123   : > { %v2915_v1 = vadd.f32 %v6731_v48, %v2880_v54  ;;  %v1326_v48 = vrot.slane %v1324_v15, 4  ;;  %v3034_v62 = vpack.c.b16 %v3004_v23, %v3003_v9 }
 0x124   : > { %5871 = vmatmul.msk.bf16.gmra.mxu2 %vm2091_vm1, %v6527_v10  ;;  %5854 = vmatmul.msk.bf16.gmra.mxu1 %vm2091_vm1, %v6520_v59 }
 0x125   : > { %v2947_v26 = vmax.f32 %v2915_v1, 0.0  ;;  %5887 = vmatmul.msk.bf16.vlgmr.msrb.gmra.mxu3 %vm2091_vm1, %v7104_v5  ;;  %v1328_v63 = vsel %vm7019_vm8, %v1326_v48, %v1327_v22  ;;  %v638_v1 = vld [vmem:[%s6461_s8 + $0x18] sm:$0xe]  ;;  %v5530_v22 = vld [vmem:[%s6461_s8 + $0x24] sm:$0xe] }
 0x126   : > { %v2195_v31 = vpop.f32.mrf.mxu0  ;;  %v3412_v49 = vunpack.c.l.b16 %v1328_v63  ;;  %v5466_v48 = vrot.slane %v638_v1, 9  ;;  %v5546_v23 = vrot.slane %v5530_v22, 9 }
 0x127   : > { %v2608_v28 = vpop.f32.mrf.mxu2  ;;  %2980 = vst.msk [vmem:[%s6753_s18 + $0xe8] sm:$0xff] %vm2964_vm5, %v2947_v26  ;;  %v2400_v29 = vadd.f32 %v2399_v39, %v2195_v31 }
 0x128   : > { %v2825_v59 = vpop.f32.mrf.mxu3  ;;  %v7138_v39 = vpack.c.b16 %v3412_v49, %v3411_v42  ;;  %v720_v63 = vsel %vm7019_vm8, %v5466_v48, %v719_v21 }
 0x129   : > { %v2881_v7 = vadd.f32 %v2825_v59, %v2659_v14  ;;  %v2404_v4 = vpop.f32.mrf.mxu1  ;;  %v2660_v11 = vadd.f32 %v2605_v45, %v2400_v29  ;;  %v6256_v59 = vld [vmem:[%s6461_s8 + $0x28] sm:$0xf] }
 0x12a   : > { %v1331_v45 = vrot.slane %v6256_v59, 5 }
 0x12b   : > { %v2916_v58 = vadd.f32 %v7130_v2, %v2881_v7 }
 0x12c   : > { %v1333_v29 = vrot.slane %v1331_v45, 4  ;;  %v1332_v21 = vsel %vm7019_vm8, %v5546_v23, %v1331_v45 }
 0x12d   : > { %v2948_v54 = vmax.f32 %v2916_v58, 0.0  ;;  %v723_v58 = vsel %vm7019_vm8, %v721_v34, %v722_v13  ;;  %v3413_v6 = vunpack.c.l.b16 %v1332_v21  ;;  %v6258_v34 = vld [vmem:[%s6461_s8 + $0x28] sm:$0xf] }
 0x12e   : > { %v2198_v46 = vpop.f32.mrf.mxu0  ;;  %v3006_v57 = vunpack.c.l.b16 %v723_v58  ;;  %v726_v22 = vrot.slane %v6258_v34, 5 }
 0x12f   : > { %v2610_v15 = vpop.f32.mrf.mxu2  ;;  %2981 = vst.msk [vmem:[%s6753_s18 + $0x100] sm:$0xff] %vm2964_vm5, %v2948_v54  ;;  %v2403_v35 = vadd.f32 %v2402_v53, %v2198_v46  ;;  %v6257_v54 = vld [vmem:[%s6461_s8 + $0x2c] sm:$0x1] }
 0x130   : > { %v2827_v26 = vpop.f32.mrf.mxu3 }
 0x131   : > { %v2882_v14 = vadd.f32 %v2827_v26, %v2660_v11  ;;  %5838 = vmatmul.msk.bf16.gmra.mxu0 %vm2091_vm1, %v3034_v62  ;;  %v2407_v31 = vpop.f32.mrf.mxu1  ;;  %v2661_v9 = vadd.f32 %v2608_v28, %v2403_v35  ;;  %v1334_v62 = vrot.slane %v6257_v54, 5  ;;  %v3005_v28 = vunpack.c.l.b16 %v720_v63  ;;  %v6259_v63 = vld [vmem:[%s6461_s8 + $0x2c] sm:$0x1] }
 0x132   : > { %v729_v58 = vrot.slane %v6259_v63, 5  ;;  %v728_v54 = vrot.slane %v726_v22, 4 }
 0x133   : > { %v2917_v7 = vadd.f32 %v7130_v2, %v2882_v14  ;;  %v1335_v11 = vsel %vm7019_vm8, %v1333_v29, %v1334_v62  ;;  %v3035_v35 = vpack.c.b16 %v3006_v57, %v3005_v28  ;;  %v5531_v62 = vld [vmem:[%s6461_s8 + $0x30] sm:$0xe] }
 0x134   : > { %5872 = vmatmul.msk.bf16.gmra.mxu2 %vm2091_vm1, %v6555_v60  ;;  %5855 = vmatmul.msk.bf16.gmra.mxu1 %vm2091_vm1, %v6546_v44  ;;  %v3414_v13 = vunpack.c.l.b16 %v1335_v11  ;;  %v5547_v57 = vrot.slane %v5531_v62, 9 }
 0x135   : > { %v2949_v53 = vmax.f32 %v2917_v7, 0.0  ;;  %5888 = vmatmul.msk.bf16.gmra.mxu3 %vm2091_vm1, %v7138_v39 }
 0x136   : > { %v2200_v32 = vpop.f32.mrf.mxu0 }
 0x137   : > { %v2613_v42 = vpop.f32.mrf.mxu2  ;;  %2982 = vst.msk [vmem:[%s6753_s18 + $0x108] sm:$0xff] %vm2964_vm5, %v2949_v53  ;;  %v2405_v26 = vadd.f32 %v2404_v4, %v2200_v32  ;;  %v639_v53 = vld [vmem:[%s6461_s8 + $0x24] sm:$0xe]  ;;  %v7167_v4 = vpack.c.b16 %v3414_v13, %v3413_v6 }
 0x138   : > { %v2830_v44 = vpop.f32.mrf.mxu3  ;;  %v5467_v29 = vrot.slane %v639_v53, 9 }
 0x139   : > { %v2883_v49 = vadd.f32 %v2830_v44, %v2661_v9  ;;  %v2409_v46 = vpop.f32.mrf.mxu1  ;;  %v2662_v59 = vadd.f32 %v2610_v15, %v2405_v26  ;;  %v6260_v44 = vld [vmem:[%s6461_s8 + $0x34] sm:$0xf] }
 0x13a   : > { %v1338_v15 = vrot.slane %v6260_v44, 5  ;;  %v727_v11 = vsel %vm7019_vm8, %v5467_v29, %v726_v22 }
 0x13b   : > { %v2918_v1 = vadd.f32 %v7130_v2, %v2883_v49 }
 0x13c   : > { %v1340_v26 = vrot.slane %v1338_v15, 4  ;;  %v1339_v22 = vsel %vm7019_vm8, %v5547_v57, %v1338_v15 }
 0x13d   : > { %v2950_v14 = vmax.f32 %v2918_v1, 0.0  ;;  %v730_v1 = vsel %vm7019_vm8, %v728_v54, %v729_v58  ;;  %v3415_v63 = vunpack.c.l.b16 %v1339_v22  ;;  %v6262_v54 = vld [vmem:[%s6461_s8 + $0x34] sm:$0xf] }
 0x13e   : > { %v2203_v48 = vpop.f32.mrf.mxu0  ;;  %v3008_v34 = vunpack.c.l.b16 %v730_v1  ;;  %v733_v62 = vrot.slane %v6262_v54, 5 }
 0x13f   : > { %v2615_v7 = vpop.f32.mrf.mxu2  ;;  %2983 = vst.msk [vmem:[%s6753_s18 + $0x120] sm:$0xff] %vm2964_vm5, %v2950_v14  ;;  %v2408_v23 = vadd.f32 %v2407_v31, %v2203_v48  ;;  %v6261_v14 = vld [vmem:[%s6461_s8 + $0x38] sm:$0x1] }
 0x140   : > { %v2832_v45 = vpop.f32.mrf.mxu3 }
 0x141   : > { %v2884_v9 = vadd.f32 %v2832_v45, %v2662_v59  ;;  %5839 = vmatmul.msk.bf16.gmra.mxu0 %vm2091_vm1, %v3035_v35  ;;  %v2412_v32 = vpop.f32.mrf.mxu1  ;;  %v2663_v28 = vadd.f32 %v2613_v42, %v2408_v23  ;;  %v1341_v35 = vrot.slane %v6261_v14, 5  ;;  %v3007_v42 = vunpack.c.l.b16 %v727_v11  ;;  %v6263_v11 = vld [vmem:[%s6461_s8 + $0x38] sm:$0x1] }
 0x142   : > { %v736_v1 = vrot.slane %v6263_v11, 5  ;;  %v735_v14 = vrot.slane %v733_v62, 4 }
 0x143   : > { %v2919_v49 = vadd.f32 %v7130_v2, %v2884_v9  ;;  %v1342_v59 = vsel %vm7019_vm8, %v1340_v26, %v1341_v35  ;;  %v3036_v23 = vpack.c.b16 %v3008_v34, %v3007_v42  ;;  %v5532_v35 = vld [vmem:[%s6461_s8 + $0x3c] sm:$0xe] }
 0x144   : > { %5873 = vmatmul.msk.bf16.gmra.mxu2 %vm2091_vm1, %v6579_v51  ;;  %5856 = vmatmul.msk.bf16.gmra.mxu1 %vm2091_vm1, %v6572_v37  ;;  %v3416_v58 = vunpack.c.l.b16 %v1342_v59  ;;  %v5548_v34 = vrot.slane %v5532_v35, 9 }
 0x145   : > { %v2951_v31 = vmax.f32 %v2919_v49, 0.0  ;;  %5889 = vmatmul.msk.bf16.gmra.mxu3 %vm2091_vm1, %v7167_v4 }
 0x146   : > { %v2205_v21 = vpop.f32.mrf.mxu0 }
 0x147   : > { %v2618_v6 = vpop.f32.mrf.mxu2  ;;  %2984 = vst.msk [vmem:[%s6753_s18 + $0x128] sm:$0xff] %vm2964_vm5, %v2951_v31  ;;  %v2410_v45 = vadd.f32 %v2409_v46, %v2205_v21  ;;  %v640_v31 = vld [vmem:[%s6461_s8 + $0x30] sm:$0xe]  ;;  %v7196_v46 = vpack.c.b16 %v3416_v58, %v3415_v63 }
 0x148   : > { %v2835_v37 = vpop.f32.mrf.mxu3  ;;  %v5468_v26 = vrot.slane %v640_v31, 9 }
 0x149   : > { %v2885_v13 = vadd.f32 %v2835_v37, %v2663_v28  ;;  %v2414_v48 = vpop.f32.mrf.mxu1  ;;  %v2664_v44 = vadd.f32 %v2615_v7, %v2410_v45  ;;  %v6264_v37 = vld [vmem:[%s6461_s8 + $0x40] sm:$0xf] }
 0x14a   : > { %v1345_v7 = vrot.slane %v6264_v37, 5  ;;  %v734_v59 = vsel %vm7019_vm8, %v5468_v26, %v733_v62 }
 0x14b   : > { %v2920_v53 = vadd.f32 %v7130_v2, %v2885_v13 }
 0x14c   : > { %v1347_v45 = vrot.slane %v1345_v7, 4  ;;  %v1346_v62 = vsel %vm7019_vm8, %v5548_v34, %v1345_v7 }
 0x14d   : > { %v2952_v9 = vmax.f32 %v2920_v53, 0.0  ;;  %v737_v53 = vsel %vm7019_vm8, %v735_v14, %v736_v1  ;;  %v3417_v11 = vunpack.c.l.b16 %v1346_v62  ;;  %v6266_v14 = vld [vmem:[%s6461_s8 + $0x40] sm:$0xf] }
 0x14e   : > { %v2208_v29 = vpop.f32.mrf.mxu0  ;;  %v3010_v54 = vunpack.c.l.b16 %v737_v53  ;;  %v740_v35 = vrot.slane %v6266_v14, 5 }
 0x14f   : > { %v2620_v49 = vpop.f32.mrf.mxu2  ;;  %2985 = vst.msk [vmem:[%s6753_s18 + $0x140] sm:$0xff] %vm2964_vm5, %v2952_v9  ;;  %v2413_v57 = vadd.f32 %v2412_v32, %v2208_v29  ;;  %v6265_v9 = vld [vmem:[%s6461_s8 + $0x44] sm:$0x1] }
 0x150   : > { %v2837_v15 = vpop.f32.mrf.mxu3 }
 0x151   : > { %v2886_v28 = vadd.f32 %v2837_v15, %v2664_v44  ;;  %5840 = vmatmul.msk.bf16.gmra.mxu0 %vm2091_vm1, %v3036_v23  ;;  %v2417_v21 = vpop.f32.mrf.mxu1  ;;  %v2665_v42 = vadd.f32 %v2618_v6, %v2413_v57  ;;  %v1348_v23 = vrot.slane %v6265_v9, 5  ;;  %v3009_v6 = vunpack.c.l.b16 %v734_v59  ;;  %v6267_v59 = vld [vmem:[%s6461_s8 + $0x44] sm:$0x1] }
 0x152   : > { %v743_v53 = vrot.slane %v6267_v59, 5  ;;  %v742_v9 = vrot.slane %v740_v35, 4 }
 0x153   : > { %v2921_v13 = vadd.f32 %v7130_v2, %v2886_v28  ;;  %v1349_v44 = vsel %vm7019_vm8, %v1347_v45, %v1348_v23  ;;  %v3037_v57 = vpack.c.b16 %v3010_v54, %v3009_v6  ;;  %v5533_v23 = vld [vmem:[%s6461_s8 + $0x48] sm:$0xe] }
 0x154   : > { %5874 = vmatmul.msk.bf16.gmra.mxu2 %vm2091_vm1, %v6606_v33  ;;  %5857 = vmatmul.msk.bf16.gmra.mxu1 %vm2091_vm1, %v6598_v18  ;;  %v3418_v1 = vunpack.c.l.b16 %v1349_v44  ;;  %v5549_v54 = vrot.slane %v5533_v23, 9 }
 0x155   : > { %v2953_v32 = vmax.f32 %v2921_v13, 0.0  ;;  %5890 = vmatmul.msk.bf16.gmra.mxu3 %vm2091_vm1, %v7196_v46 }
 0x156   : > { %v2210_v22 = vpop.f32.mrf.mxu0 }
 0x157   : > { %v2623_v63 = vpop.f32.mrf.mxu2  ;;  %2986 = vst.msk [vmem:[%s6753_s18 + $0x148] sm:$0xff] %vm2964_vm5, %v2953_v32  ;;  %v2415_v15 = vadd.f32 %v2414_v48, %v2210_v22  ;;  %v641_v32 = vld [vmem:[%s6461_s8 + $0x3c] sm:$0xe]  ;;  %v7225_v48 = vpack.c.b16 %v3418_v1, %v3417_v11 }
 0x158   : > { %v2840_v18 = vpop.f32.mrf.mxu3  ;;  %v5469_v45 = vrot.slane %v641_v32, 9 }
 0x159   : > { %v2887_v58 = vadd.f32 %v2840_v18, %v2665_v42  ;;  %v2419_v29 = vpop.f32.mrf.mxu1  ;;  %v2666_v37 = vadd.f32 %v2620_v49, %v2415_v15  ;;  %v6268_v18 = vld [vmem:[%s6461_s8 + $0x4c] sm:$0xf] }
 0x15a   : > { %v1352_v49 = vrot.slane %v6268_v18, 5  ;;  %v741_v44 = vsel %vm7019_vm8, %v5469_v45, %v740_v35 }
 0x15b   : > { %v2922_v31 = vadd.f32 %v7130_v2, %v2887_v58 }
 0x15c   : > { %v1354_v15 = vrot.slane %v1352_v49, 4  ;;  %v1353_v35 = vsel %vm7019_vm8, %v5549_v54, %v1352_v49 }
 0x15d   : > { %v2954_v28 = vmax.f32 %v2922_v31, 0.0  ;;  %v744_v31 = vsel %vm7019_vm8, %v742_v9, %v743_v53  ;;  %v3419_v59 = vunpack.c.l.b16 %v1353_v35  ;;  %v6270_v9 = vld [vmem:[%s6461_s8 + $0x4c] sm:$0xf] }
 0x15e   : > { %v2213_v26 = vpop.f32.mrf.mxu0  ;;  %v3012_v14 = vunpack.c.l.b16 %v744_v31  ;;  %v747_v23 = vrot.slane %v6270_v9, 5 }
 0x15f   : > { %v2625_v13 = vpop.f32.mrf.mxu2  ;;  %2987 = vst.msk [vmem:[%s6753_s18 + $0x160] sm:$0xff] %vm2964_vm5, %v2954_v28  ;;  %v2418_v34 = vadd.f32 %v2417_v21, %v2213_v26  ;;  %v6269_v28 = vld [vmem:[%s6461_s8 + $0x50] sm:$0x1] }
 0x160   : > { %v2842_v7 = vpop.f32.mrf.mxu3 }
 0x161   : > { %v2888_v42 = vadd.f32 %v2842_v7, %v2666_v37  ;;  %5841 = vmatmul.msk.bf16.gmra.mxu0 %vm2091_vm1, %v3037_v57  ;;  %v2422_v22 = vpop.f32.mrf.mxu1  ;;  %v2667_v6 = vadd.f32 %v2623_v63, %v2418_v34  ;;  %v1355_v57 = vrot.slane %v6269_v28, 5  ;;  %v3011_v63 = vunpack.c.l.b16 %v741_v44  ;;  %v6271_v44 = vld [vmem:[%s6461_s8 + $0x50] sm:$0x1] }
 0x162   : > { %v750_v31 = vrot.slane %v6271_v44, 5  ;;  %v749_v28 = vrot.slane %v747_v23, 4 }
 0x163   : > { %v2923_v58 = vadd.f32 %v7130_v2, %v2888_v42  ;;  %v1356_v37 = vsel %vm7019_vm8, %v1354_v15, %v1355_v57  ;;  %v3038_v34 = vpack.c.b16 %v3012_v14, %v3011_v63  ;;  %v5534_v57 = vld [vmem:[%s6461_s8 + $0x54] sm:$0xe] }
 0x164   : > { %5875 = vmatmul.msk.bf16.gmra.mxu2 %vm2091_vm1, %v6631_v30  ;;  %5858 = vmatmul.msk.bf16.gmra.mxu1 %vm2091_vm1, %v6625_v17  ;;  %v3420_v53 = vunpack.c.l.b16 %v1356_v37  ;;  %v5550_v14 = vrot.slane %v5534_v57, 9 }
 0x165   : > { %v2955_v21 = vmax.f32 %v2923_v58, 0.0  ;;  %5891 = vmatmul.msk.bf16.gmra.mxu3 %vm2091_vm1, %v7225_v48 }
 0x166   : > { %v2215_v62 = vpop.f32.mrf.mxu0 }
 0x167   : > { %v2628_v11 = vpop.f32.mrf.mxu2  ;;  %2988 = vst.msk [vmem:[%s6753_s18 + $0x168] sm:$0xff] %vm2964_vm5, %v2955_v21  ;;  %v2420_v7 = vadd.f32 %v2419_v29, %v2215_v62  ;;  %v642_v21 = vld [vmem:[%s6461_s8 + $0x48] sm:$0xe]  ;;  %v7254_v29 = vpack.c.b16 %v3420_v53, %v3419_v59 }
 0x168   : > { %v2845_v17 = vpop.f32.mrf.mxu3  ;;  %v5470_v15 = vrot.slane %v642_v21, 9 }
 0x169   : > { %v2889_v1 = vadd.f32 %v2845_v17, %v2667_v6  ;;  %v2424_v26 = vpop.f32.mrf.mxu1  ;;  %v2668_v18 = vadd.f32 %v2625_v13, %v2420_v7  ;;  %v6272_v17 = vld [vmem:[%s6461_s8 + $0x58] sm:$0xf] }
 0x16a   : > { %v1359_v13 = vrot.slane %v6272_v17, 5  ;;  %v748_v37 = vsel %vm7019_vm8, %v5470_v15, %v747_v23 }
 0x16b   : > { %v2924_v32 = vadd.f32 %v7130_v2, %v2889_v1 }
 0x16c   : > { %v1361_v7 = vrot.slane %v1359_v13, 4  ;;  %v1360_v23 = vsel %vm7019_vm8, %v5550_v14, %v1359_v13 }
 0x16d   : > { %v2956_v42 = vmax.f32 %v2924_v32, 0.0  ;;  %v751_v32 = vsel %vm7019_vm8, %v749_v28, %v750_v31  ;;  %v3421_v44 = vunpack.c.l.b16 %v1360_v23  ;;  %v6274_v28 = vld [vmem:[%s6461_s8 + $0x58] sm:$0xf] }
 0x16e   : > { %v2218_v45 = vpop.f32.mrf.mxu0  ;;  %v3014_v9 = vunpack.c.l.b16 %v751_v32  ;;  %v754_v57 = vrot.slane %v6274_v28, 5 }
 0x16f   : > { %v2630_v58 = vpop.f32.mrf.mxu2  ;;  %2989 = vst.msk [vmem:[%s6753_s18 + $0x180] sm:$0xff] %vm2964_vm5, %v2956_v42  ;;  %v2423_v54 = vadd.f32 %v2422_v22, %v2218_v45  ;;  %v6273_v42 = vld [vmem:[%s6461_s8 + $0x5c] sm:$0x1] }
 0x170   : > { %v2847_v49 = vpop.f32.mrf.mxu3 }
 0x171   : > { %v2890_v6 = vadd.f32 %v2847_v49, %v2668_v18  ;;  %5842 = vmatmul.msk.bf16.gmra.mxu0 %vm2091_vm1, %v3038_v34  ;;  %v2427_v62 = vpop.f32.mrf.mxu1  ;;  %v2669_v63 = vadd.f32 %v2628_v11, %v2423_v54  ;;  %v1362_v34 = vrot.slane %v6273_v42, 5  ;;  %v3013_v11 = vunpack.c.l.b16 %v748_v37  ;;  %v6275_v37 = vld [vmem:[%s6461_s8 + $0x5c] sm:$0x1] }
 0x172   : > { %v757_v32 = vrot.slane %v6275_v37, 5  ;;  %v756_v42 = vrot.slane %v754_v57, 4 }
 0x173   : > { %v2925_v1 = vadd.f32 %v7130_v2, %v2890_v6  ;;  %v1363_v18 = vsel %vm7019_vm8, %v1361_v7, %v1362_v34  ;;  %v3039_v54 = vpack.c.b16 %v3014_v9, %v3013_v11  ;;  %v5535_v34 = vld [vmem:[%s6461_s8 + $0x60] sm:$0xe] }
 0x174   : > { %5876 = vmatmul.msk.bf16.gmra.mxu2 %vm2091_vm1, %v6657_v20  ;;  %5859 = vmatmul.msk.bf16.gmra.mxu1 %vm2091_vm1, %v6650_v0  ;;  %v3422_v31 = vunpack.c.l.b16 %v1363_v18  ;;  %v5551_v9 = vrot.slane %v5535_v34, 9 }
 0x175   : > { %v2957_v22 = vmax.f32 %v2925_v1, 0.0  ;;  %5892 = vmatmul.msk.bf16.gmra.mxu3 %vm2091_vm1, %v7254_v29 }
 0x176   : > { %v2220_v35 = vpop.f32.mrf.mxu0 }
 0x177   : > { %v2633_v59 = vpop.f32.mrf.mxu2  ;;  %2990 = vst.msk [vmem:[%s6753_s18 + $0x188] sm:$0xff] %vm2964_vm5, %v2957_v22  ;;  %v2425_v49 = vadd.f32 %v2424_v26, %v2220_v35  ;;  %v643_v22 = vld [vmem:[%s6461_s8 + $0x54] sm:$0xe]  ;;  %v7283_v26 = vpack.c.b16 %v3422_v31, %v3421_v44 }
 0x178   : > { %v2850_v0 = vpop.f32.mrf.mxu3  ;;  %v5471_v7 = vrot.slane %v643_v22, 9 }
 0x179   : > { %v2891_v53 = vadd.f32 %v2850_v0, %v2669_v63  ;;  %v2429_v45 = vpop.f32.mrf.mxu1  ;;  %v2670_v17 = vadd.f32 %v2630_v58, %v2425_v49  ;;  %v6276_v0 = vld [vmem:[%s6461_s8 + $0x64] sm:$0xf] }
 0x17a   : > { %v1366_v58 = vrot.slane %v6276_v0, 5  ;;  %v755_v18 = vsel %vm7019_vm8, %v5471_v7, %v754_v57 }
 0x17b   : > { %v2926_v21 = vadd.f32 %v7130_v2, %v2891_v53 }
 0x17c   : > { %v1368_v49 = vrot.slane %v1366_v58, 4  ;;  %v1367_v57 = vsel %vm7019_vm8, %v5551_v9, %v1366_v58 }
 0x17d   : > { %v2958_v6 = vmax.f32 %v2926_v21, 0.0  ;;  %v758_v21 = vsel %vm7019_vm8, %v756_v42, %v757_v32  ;;  %v3423_v37 = vunpack.c.l.b16 %v1367_v57  ;;  %v6278_v42 = vld [vmem:[%s6461_s8 + $0x64] sm:$0xf] }
 0x17e   : > { %v2223_v15 = vpop.f32.mrf.mxu0  ;;  %v3016_v28 = vunpack.c.l.b16 %v758_v21  ;;  %v761_v34 = vrot.slane %v6278_v42, 5 }
 0x17f   : > { %v2635_v1 = vpop.f32.mrf.mxu2  ;;  %2991 = vst.msk [vmem:[%s6753_s18 + $0x1a0] sm:$0xff] %vm2964_vm5, %v2958_v6  ;;  %v2428_v14 = vadd.f32 %v2427_v62, %v2223_v15  ;;  %v6277_v6 = vld [vmem:[%s6461_s8 + $0x68] sm:$0x1] }
 0x180   : > { %v2852_v13 = vpop.f32.mrf.mxu3 }
 0x181   : > { %v2892_v63 = vadd.f32 %v2852_v13, %v2670_v17  ;;  %5843 = vmatmul.msk.bf16.gmra.mxu0 %vm2091_vm1, %v3039_v54  ;;  %v2432_v35 = vpop.f32.mrf.mxu1  ;;  %v2671_v11 = vadd.f32 %v2633_v59, %v2428_v14  ;;  %v1369_v54 = vrot.slane %v6277_v6, 5  ;;  %v3015_v59 = vunpack.c.l.b16 %v755_v18  ;;  %v6279_v18 = vld [vmem:[%s6461_s8 + $0x68] sm:$0x1] }
 0x182   : > { %v764_v21 = vrot.slane %v6279_v18, 5  ;;  %v763_v6 = vrot.slane %v761_v34, 4 }
 0x183   : > { %v2927_v53 = vadd.f32 %v7130_v2, %v2892_v63  ;;  %v1370_v17 = vsel %vm7019_vm8, %v1368_v49, %v1369_v54  ;;  %v3040_v14 = vpack.c.b16 %v3016_v28, %v3015_v59  ;;  %v5536_v54 = vld [vmem:[%s6461_s8 + $0x6c] sm:$0xe] }
 0x184   : > { %5877 = vmatmul.msk.bf16.gmra.mxu2 %vm2091_vm1, %v6683_v12  ;;  %5860 = vmatmul.msk.bf16.gmra.mxu1 %vm2091_vm1, %v6676_v61  ;;  %v3424_v32 = vunpack.c.l.b16 %v1370_v17  ;;  %v5552_v28 = vrot.slane %v5536_v54, 9 }
 0x185   : > { %v2959_v62 = vmax.f32 %v2927_v53, 0.0  ;;  %5893 = vmatmul.msk.bf16.gmra.mxu3 %vm2091_vm1, %v7283_v26 }
 0x186   : > { %v2225_v23 = vpop.f32.mrf.mxu0 }
 0x187   : > { %v2638_v44 = vpop.f32.mrf.mxu2  ;;  %2992 = vst.msk [vmem:[%s6753_s18 + $0x1a8] sm:$0xff] %vm2964_vm5, %v2959_v62  ;;  %v2430_v13 = vadd.f32 %v2429_v45, %v2225_v23  ;;  %v644_v62 = vld [vmem:[%s6461_s8 + $0x60] sm:$0xe]  ;;  %v7312_v45 = vpack.c.b16 %v3424_v32, %v3423_v37 }
 0x188   : > { %v2855_v61 = vpop.f32.mrf.mxu3  ;;  %v5472_v49 = vrot.slane %v644_v62, 9 }
 0x189   : > { %v2893_v31 = vadd.f32 %v2855_v61, %v2671_v11  ;;  %v2434_v15 = vpop.f32.mrf.mxu1  ;;  %v2672_v0 = vadd.f32 %v2635_v1, %v2430_v13  ;;  %v6280_v61 = vld [vmem:[%s6461_s8 + $0x70] sm:$0xf] }
 0x18a   : > { %v1373_v1 = vrot.slane %v6280_v61, 5  ;;  %v762_v17 = vsel %vm7019_vm8, %v5472_v49, %v761_v34 }
 0x18b   : > { %v2928_v22 = vadd.f32 %v7130_v2, %v2893_v31 }
 0x18c   : > { %v1375_v13 = vrot.slane %v1373_v1, 4  ;;  %v1374_v34 = vsel %vm7019_vm8, %v5552_v28, %v1373_v1 }
 0x18d   : > { %v2960_v63 = vmax.f32 %v2928_v22, 0.0  ;;  %v765_v22 = vsel %vm7019_vm8, %v763_v6, %v764_v21  ;;  %v3425_v18 = vunpack.c.l.b16 %v1374_v34  ;;  %v6282_v6 = vld [vmem:[%s6461_s8 + $0x70] sm:$0xf] }
 0x18e   : > { %v2228_v7 = vpop.f32.mrf.mxu0  ;;  %v3018_v42 = vunpack.c.l.b16 %v765_v22  ;;  %v768_v54 = vrot.slane %v6282_v6, 5 }
 0x18f   : > { %v2640_v53 = vpop.f32.mrf.mxu2  ;;  %2993 = vst.msk [vmem:[%s6753_s18 + $0x1c0] sm:$0xff] %vm2964_vm5, %v2960_v63  ;;  %v2433_v9 = vadd.f32 %v2432_v35, %v2228_v7  ;;  %v6281_v63 = vld [vmem:[%s6461_s8 + $0x74] sm:$0x1] }
 0x190   : > { %v2857_v58 = vpop.f32.mrf.mxu3 }
 0x191   : > { %v2894_v11 = vadd.f32 %v2857_v58, %v2672_v0  ;;  %5844 = vmatmul.msk.bf16.gmra.mxu0 %vm2091_vm1, %v3040_v14  ;;  %v3201_v23 = vpop.f32.mrf.mxu1  ;;  %v2673_v59 = vadd.f32 %v2638_v44, %v2433_v9  ;;  %v1376_v14 = vrot.slane %v6281_v63, 5  ;;  %v3017_v44 = vunpack.c.l.b16 %v762_v17  ;;  %v6283_v17 = vld [vmem:[%s6461_s8 + $0x74] sm:$0x1] }
 0x192   : > { %v771_v22 = vrot.slane %v6283_v17, 5  ;;  %v770_v63 = vrot.slane %v768_v54, 4 }
 0x193   : > { %v2929_v31 = vadd.f32 %v7130_v2, %v2894_v11  ;;  %v1377_v0 = vsel %vm7019_vm8, %v1375_v13, %v1376_v14  ;;  %v3041_v9 = vpack.c.b16 %v3018_v42, %v3017_v44  ;;  %v5537_v14 = vld [vmem:[%s6461_s8 + $0x78] sm:$0xe] }
 0x194   : > { %5878 = vmatmul.msk.bf16.gmra.mxu2 %vm2091_vm1, %v6713_v24  ;;  %5861 = vmatmul.msk.bf16.gmra.mxu1 %vm2091_vm1, %v6704_v3  ;;  %v3426_v21 = vunpack.c.l.b16 %v1377_v0  ;;  %v5553_v42 = vrot.slane %v5537_v14, 9 }
 0x195   : > { %v2961_v35 = vmax.f32 %v2929_v31, 0.0  ;;  %5894 = vmatmul.msk.bf16.gmra.mxu3 %vm2091_vm1, %v7312_v45 }
 0x196   : > { %v2230_v57 = vpop.f32.mrf.mxu0 }
 0x197   : > { %v3295_v37 = vpop.f32.mrf.mxu2  ;;  %2994 = vst.msk [vmem:[%s6753_s18 + $0x1c8] sm:$0xff] %vm2964_vm5, %v2961_v35  ;;  %v2435_v58 = vadd.f32 %v2434_v15, %v2230_v57  ;;  %v645_v35 = vld [vmem:[%s6461_s8 + $0x6c] sm:$0xe]  ;;  %v7341_v15 = vpack.c.b16 %v3426_v21, %v3425_v18 }
 0x198   : > { %v2860_v3 = vpop.f32.mrf.mxu3  ;;  %v5473_v13 = vrot.slane %v645_v35, 9 }
 0x199   : > { %v2895_v32 = vadd.f32 %v2860_v3, %v2673_v59  ;;  %v3203_v7 = vpop.f32.mrf.mxu1  ;;  %v2674_v61 = vadd.f32 %v2640_v53, %v2435_v58  ;;  %8440 = vst [vmem:[#allocation8_spill] sm:$0xff] %v7341_v15  ;;  %v6284_v3 = vld [vmem:[%s6461_s8 + $0x7c] sm:$0xf] }
 0x19a   : > { %v1380_v53 = vrot.slane %v6284_v3, 5  ;;  %v769_v0 = vsel %vm7019_vm8, %v5473_v13, %v768_v54 }
 0x19b   : > { %v2930_v62 = vadd.f32 %v7130_v2, %v2895_v32  ;;  %v3019_v6 = vunpack.c.l.b16 %v769_v0  ;;  %v6287_v0 = vld [vmem:[%s6461_s8 + $0x80] sm:$0x1] }
 0x19c   : > { %v1382_v58 = vrot.slane %v1380_v53, 4 }
 0x19d   : > { %v2962_v11 = vmax.f32 %v2930_v62, 0.0  ;;  %v772_v62 = vsel %vm7019_vm8, %v770_v63, %v771_v22  ;;  %v6286_v63 = vld [vmem:[%s6461_s8 + $0x7c] sm:$0xf] }
 0x19e   : > { %v3109_v49 = vpop.f32.mrf.mxu0  ;;  %v775_v14 = vrot.slane %v6286_v63, 5 }
 0x19f   : > { %v3297_v31 = vpop.f32.mrf.mxu2  ;;  %2995 = vst.msk [vmem:[%s6753_s18 + $0x1e0] sm:$0xff] %vm2964_vm5, %v2962_v11  ;;  %v3202_v28 = vadd.f32 %v3201_v23, %v3109_v49  ;;  %v6285_v11 = vld [vmem:[%s6461_s8 + $0x80] sm:$0x1] }
 0x1a0   : > { %v2862_v1 = vpop.f32.mrf.mxu3 }
 0x1a1   : > { %v2896_v59 = vadd.f32 %v2862_v1, %v2674_v61  ;;  %5845 = vmatmul.msk.bf16.gmra.mxu0 %vm2091_vm1, %v3041_v9  ;;  %v3206_v57 = vpop.f32.mrf.mxu1  ;;  %v3375_v44 = vadd.f32 %v3295_v37, %v3202_v28  ;;  %v1383_v9 = vrot.slane %v6285_v11, 5  ;;  %v3020_v37 = vunpack.c.l.b16 %v772_v62 }
 0x1a2   : > { %v1381_v61 = vsel %vm7019_vm8, %v5553_v42, %v1380_v53  ;;  %v778_v62 = vrot.slane %v6287_v0, 5  ;;  %v777_v11 = vrot.slane %v775_v14, 4 }
 0x1a3   : > { %v2931_v32 = vadd.f32 %v7130_v2, %v2896_v59  ;;  %v1384_v54 = vsel %vm7019_vm8, %v1382_v58, %v1383_v9  ;;  %v3042_v28 = vpack.c.b16 %v3020_v37, %v3019_v6  ;;  %v3427_v17 = vunpack.c.l.b16 %v1381_v61  ;;  %v5538_v9 = vld [vmem:[%s6461_s8 + $0x84] sm:$0xe] }
 0x1a4   : > { %5879 = vmatmul.msk.bf16.gmra.mxu2 %vm2091_vm1, %v6764_v41  ;;  %5862 = vmatmul.msk.bf16.gmra.mxu1 %vm2091_vm1, %v6748_v16  ;;  %v3428_v22 = vunpack.c.l.b16 %v1384_v54  ;;  %v5554_v37 = vrot.slane %v5538_v9, 9 }
 0x1a5   : > { %v2963_v23 = vmax.f32 %v2931_v32, 0.0  ;;  %5895 = vmatmul.msk.bf16.gmra.mxu3 %vm2091_vm1, %v7341_v15  ;;  %v646_v32 = vld [vmem:[%s6461_s8 + $0x78] sm:$0xe] }
 0x1a6   : > { %v3111_v34 = vpop.f32.mrf.mxu0  ;;  %v7369_v42 = vpack.c.b16 %v3428_v22, %v3427_v17  ;;  %v5474_v58 = vrot.slane %v646_v32, 9 }
 0x1a7   : > { %v3300_v18 = vpop.f32.mrf.mxu2  ;;  %2996 = vst.msk [vmem:[%s6753_s18 + $0x1e8] sm:$0xff] %vm2964_vm5, %v2963_v23  ;;  %v3204_v35 = vadd.f32 %v3203_v7, %v3111_v34 }
 0x1a8   : > { %v3517_v16 = vpop.f32.mrf.mxu3  ;;  %8441 = vst [vmem:[#allocation9_spill] sm:$0xff] %v7369_v42  ;;  %v776_v54 = vsel %vm7019_vm8, %v5474_v58, %v775_v14 }
 0x1a9   : > { %v3597_v21 = vadd.f32 %v3517_v16, %v3375_v44  ;;  %v3208_v49 = vpop.f32.mrf.mxu1  ;;  %v3376_v3 = vadd.f32 %v3297_v31, %v3204_v35  ;;  %v6288_v16 = vld [vmem:[%s6461_s8 + $0x88] sm:$0xf]  ;;  %v779_v35 = vsel %vm7019_vm8, %v777_v11, %v778_v62  ;;  %v3021_v63 = vunpack.c.l.b16 %v776_v54  ;;  %v6291_v54 = vld [vmem:[%s6461_s8 + $0x8c] sm:$0x1] }
 0x1aa   : > { %v6290_v11 = vld [vmem:[%s6461_s8 + $0x88] sm:$0xf] }
 0x1ab   : > { %v3629_v1 = vadd.f32 %v7130_v2, %v3597_v21  ;;  %v1387_v21 = vrot.slane %v6288_v16, 5  ;;  %v782_v9 = vrot.slane %v6290_v11, 5 }
 0x1ad   : > { %v3661_v59 = vmax.f32 %v3629_v1, 0.0  ;;  %v1389_v1 = vrot.slane %v1387_v21, 4 }
 0x1ae   : > { %v3114_v13 = vpop.f32.mrf.mxu0 }
 0x1af   : > { %3725 = vrot.lane.b32.xlu0 %v3661_v59, %s6386_s28  ;;  %v3302_v53 = vpop.f32.mrf.mxu2  ;;  %v3207_v44 = vadd.f32 %v3206_v57, %v3114_v13  ;;  %v6289_v59 = vld [vmem:[%s6461_s8 + $0x8c] sm:$0x1] }
 0x1b0   : > { %v3519_v23 = vpop.f32.mrf.mxu3 }
 0x1b1   : > { %v3598_v7 = vadd.f32 %v3519_v23, %v3376_v3  ;;  %5846 = vmatmul.msk.bf16.gmra.mxu0 %vm2091_vm1, %v3042_v28  ;;  %v3211_v34 = vpop.f32.mrf.mxu1  ;;  %v3377_v6 = vadd.f32 %v3300_v18, %v3207_v44  ;;  %v1390_v28 = vrot.slane %v6289_v59, 5  ;;  %v3022_v18 = vunpack.c.l.b16 %v779_v35 }
 0x1b2   : > { %v1388_v3 = vsel %vm7019_vm8, %v5554_v37, %v1387_v21  ;;  %v785_v35 = vrot.slane %v6291_v54, 5  ;;  %v784_v59 = vrot.slane %v782_v9, 4 }
 0x1b3   : > { %v3630_v31 = vadd.f32 %v7130_v2, %v3598_v7  ;;  %v1391_v14 = vsel %vm7019_vm8, %v1389_v1, %v1390_v28  ;;  %v3043_v44 = vpack.c.b16 %v3022_v18, %v3021_v63  ;;  %v3429_v0 = vunpack.c.l.b16 %v1388_v3  ;;  %v5539_v28 = vld [vmem:[%s6461_s8 + $0x90] sm:$0xe] }
 0x1b4   : > { %5880 = vmatmul.msk.bf16.gmra.mxu2 %vm2091_vm1, %v6824_v36  ;;  %5863 = vmatmul.msk.bf16.gmra.mxu1 %vm2091_vm1, %v6809_v25  ;;  %v3430_v62 = vunpack.c.l.b16 %v1391_v14  ;;  %v5555_v18 = vrot.slane %v5539_v28, 9 }
 0x1b5   : > { %5896 = vmatmul.msk.bf16.gmra.mxu3 %vm2091_vm1, %v7369_v42  ;;  %v3662_v57 = vmax.f32 %v3630_v31, 0.0  ;;  %v647_v31 = vld [vmem:[%s6461_s8 + $0x84] sm:$0xe]  ;;  %v5601_v42 = vld [vmem:[%s6461_s8 + $0x8c] sm:$0x1] }
 0x1b6   : > { %v3116_v61 = vpop.f32.mrf.mxu0  ;;  %v7396_v37 = vpack.c.b16 %v3430_v62, %v3429_v0  ;;  %v5475_v1 = vrot.slane %v647_v31, 9 }
 0x1b7   : > { %3727 = vrot.lane.b32.xlu0 %v3662_v57, %s6386_s28  ;;  %v3305_v25 = vpop.f32.mrf.mxu2  ;;  %v3209_v32 = vadd.f32 %v3208_v49, %v3116_v61 }
 0x1b8   : > { %v3522_v17 = vpop.f32.mrf.mxu3  ;;  %8442 = vst [vmem:[#allocation10_spill] sm:$0xff] %v7396_v37  ;;  %v783_v14 = vsel %vm7019_vm8, %v5475_v1, %v782_v9 }
 0x1b9   : > { %v3599_v22 = vadd.f32 %v3522_v17, %v3377_v6  ;;  %v3213_v13 = vpop.f32.mrf.mxu1  ;;  %v3378_v16 = vadd.f32 %v3302_v53, %v3209_v32  ;;  %v6292_v17 = vld [vmem:[%s6461_s8 + $0x94] sm:$0xf]  ;;  %v786_v32 = vsel %vm7019_vm8, %v784_v59, %v785_v35  ;;  %v3023_v11 = vunpack.c.l.b16 %v783_v14 }
 0x1ba   : > { %v6294_v59 = vld [vmem:[%s6461_s8 + $0x94] sm:$0xf] }
 0x1bb   : > { %v3631_v23 = vadd.f32 %v7130_v2, %v3599_v22  ;;  %v1394_v22 = vrot.slane %v6292_v17, 5  ;;  %v789_v28 = vrot.slane %v6294_v59, 5 }
 0x1bd   : > { %v3663_v7 = vmax.f32 %v3631_v23, 0.0  ;;  %v1396_v23 = vrot.slane %v1394_v22, 4 }
 0x1be   : > { %v3119_v58 = vpop.f32.mrf.mxu0 }
 0x1bf   : > { %3729 = vrot.lane.b32.xlu1 %v3663_v7, %s6386_s28  ;;  %v3307_v21 = vpop.f32.mrf.mxu2  ;;  %v3212_v49 = vadd.f32 %v3211_v34, %v3119_v58  ;;  %v6293_v7 = vld [vmem:[%s6461_s8 + $0x98] sm:$0x1] }
 0x1c0   : > { %v3524_v57 = vpop.f32.mrf.mxu3 }
 0x1c1   : > { %v3600_v6 = vadd.f32 %v3524_v57, %v3378_v16  ;;  %5847 = vmatmul.msk.bf16.gmra.mxu0 %vm2091_vm1, %v3043_v44  ;;  %v3216_v61 = vpop.f32.mrf.mxu1  ;;  %v3379_v63 = vadd.f32 %v3305_v25, %v3212_v49  ;;  %v1397_v44 = vrot.slane %v6293_v7, 5  ;;  %v3024_v25 = vunpack.c.l.b16 %v786_v32 }
 0x1c2   : > { %v1395_v16 = vsel %vm7019_vm8, %v5555_v18, %v1394_v22  ;;  %v791_v32 = vrot.slane %v789_v28, 4 }
 0x1c3   : > { %v3632_v53 = vadd.f32 %v7130_v2, %v3600_v6  ;;  %v1398_v9 = vsel %vm7019_vm8, %v1396_v23, %v1397_v44  ;;  %v3044_v49 = vpack.c.b16 %v3024_v25, %v3023_v11  ;;  %v3431_v54 = vunpack.c.l.b16 %v1395_v16  ;;  %v6295_v23 = vld [vmem:[%s6461_s8 + $0x98] sm:$0x1]  ;;  %v5540_v44 = vld [vmem:[%s6461_s8 + $0x9c] sm:$0xe] }
 0x1c4   : > { %5881 = vmatmul.msk.bf16.gmra.mxu2 %vm2091_vm1, %v6872_v19  ;;  %5864 = vmatmul.msk.bf16.gmra.mxu1 %vm2091_vm1, %v6859_v40  ;;  %v3432_v35 = vunpack.c.l.b16 %v1398_v9  ;;  %v792_v7 = vrot.slane %v6295_v23, 5  ;;  %v5556_v25 = vrot.slane %v5540_v44, 9 }
 0x1c5   : > { %5897 = vmatmul.msk.bf16.gmra.mxu3 %vm2091_vm1, %v7396_v37  ;;  %v3664_v34 = vmax.f32 %v3632_v53, 0.0  ;;  %v648_v53 = vld [vmem:[%s6461_s8 + $0x90] sm:$0xe] }
 0x1c6   : > { %v3121_v3 = vpop.f32.mrf.mxu0  ;;  %v7423_v18 = vpack.c.b16 %v3432_v35, %v3431_v54  ;;  %v5476_v14 = vrot.slane %v648_v53, 9 }
 0x1c7   : > { %3731 = vrot.lane.b32.xlu1 %v3664_v34, %s6386_s28  ;;  %v3310_v40 = vpop.f32.mrf.mxu2  ;;  %v3214_v31 = vadd.f32 %v3213_v13, %v3121_v3 }
 0x1c8   : > { %v3527_v0 = vpop.f32.mrf.mxu3  ;;  %8443 = vst [vmem:[#allocation11_spill] sm:$0xff] %v7423_v18  ;;  %v790_v9 = vsel %vm7019_vm8, %v5476_v14, %v789_v28 }
 0x1c9   : > { %v3601_v62 = vadd.f32 %v3527_v0, %v3379_v63  ;;  %v3218_v58 = vpop.f32.mrf.mxu1  ;;  %v3380_v17 = vadd.f32 %v3307_v21, %v3214_v31  ;;  %v6296_v0 = vld [vmem:[%s6461_s8 + $0xa0] sm:$0xf]  ;;  %v793_v31 = vsel %vm7019_vm8, %v791_v32, %v792_v7  ;;  %v3025_v59 = vunpack.c.l.b16 %v790_v9 }
 0x1ca   : > { %v6298_v7 = vld [vmem:[%s6461_s8 + $0xa0] sm:$0xf] }
 0x1cb   : > { %v3633_v57 = vadd.f32 %v7130_v2, %v3601_v62  ;;  %v1401_v62 = vrot.slane %v6296_v0, 5  ;;  %v796_v44 = vrot.slane %v6298_v7, 5 }
 0x1cd   : > { %v3665_v6 = vmax.f32 %v3633_v57, 0.0  ;;  %v1403_v57 = vrot.slane %v1401_v62, 4 }
 0x1ce   : > { %v3124_v1 = vpop.f32.mrf.mxu0 }
 0x1cf   : > { %3733 = vrot.lane.b32.xlu2 %v3665_v6, %s6386_s28  ;;  %v3312_v22 = vpop.f32.mrf.mxu2  ;;  %v3217_v13 = vadd.f32 %v3216_v61, %v3124_v1  ;;  %v6297_v6 = vld [vmem:[%s6461_s8 + $0xa4] sm:$0x1] }
 0x1d0   : > { %v3529_v34 = vpop.f32.mrf.mxu3 }
 0x1d1   : > { %v3602_v63 = vadd.f32 %v3529_v34, %v3380_v17  ;;  %5848 = vmatmul.msk.bf16.gmra.mxu0 %vm2091_vm1, %v3044_v49  ;;  %v3221_v3 = vpop.f32.mrf.mxu1  ;;  %v3381_v11 = vadd.f32 %v3310_v40, %v3217_v13  ;;  %v1404_v49 = vrot.slane %v6297_v6, 5  ;;  %v3026_v40 = vunpack.c.l.b16 %v793_v31 }
 0x1d2   : > { %v1402_v17 = vsel %vm7019_vm8, %v5556_v25, %v1401_v62  ;;  %v798_v31 = vrot.slane %v796_v44, 4 }
 0x1d3   : > { %v3634_v21 = vadd.f32 %v7130_v2, %v3602_v63  ;;  %v1405_v28 = vsel %vm7019_vm8, %v1403_v57, %v1404_v49  ;;  %v3045_v13 = vpack.c.b16 %v3026_v40, %v3025_v59  ;;  %v3433_v14 = vunpack.c.l.b16 %v1402_v17  ;;  %v6299_v57 = vld [vmem:[%s6461_s8 + $0xa4] sm:$0x1]  ;;  %v5541_v49 = vld [vmem:[%s6461_s8 + $0xa8] sm:$0xe] }
 0x1d4   : > { %5882 = vmatmul.msk.bf16.gmra.mxu2 %vm2091_vm1, %v6918_v52  ;;  %5865 = vmatmul.msk.bf16.gmra.mxu1 %vm2091_vm1, %v6904_v47  ;;  %v3434_v32 = vunpack.c.l.b16 %v1405_v28  ;;  %v799_v6 = vrot.slane %v6299_v57, 5  ;;  %v8445_v59 = vld [vmem:[#allocation7_spill] sm:$0xff]  ;;  %v8446_v40 = vld [vmem:[#allocation6_spill] sm:$0xff]  ;;  %v5557_v28 = vrot.slane %v5541_v49, 9 }
 0x1d5   : > { %5898 = vmatmul.msk.bf16.gmra.mxu3 %vm2091_vm1, %v7423_v18  ;;  %v3666_v61 = vmax.f32 %v3634_v21, 0.0  ;;  %v649_v21 = vld [vmem:[%s6461_s8 + $0x9c] sm:$0xe]  ;;  %v5599_v18 = vld [vmem:[%s6461_s8 + $0x74] sm:$0x1] }
 0x1d6   : > { %v3126_v16 = vpop.f32.mrf.mxu0  ;;  %v5477_v9 = vrot.slane %v649_v21, 9 }
 0x1d7   : > { %3735 = vrot.lane.b32.xlu2 %v3666_v61, %s6386_s28  ;;  %v3315_v47 = vpop.f32.mrf.mxu2  ;;  %v3219_v34 = vadd.f32 %v3218_v58, %v3126_v16  ;;  %v7450_v58 = vpack.c.b16 %v3434_v32, %v3433_v14 }
 0x1d8   : > { %v3532_v54 = vpop.f32.mrf.mxu3 }
 0x1d9   : > { %v3603_v35 = vadd.f32 %v3532_v54, %v3381_v11  ;;  %v3223_v1 = vpop.f32.mrf.mxu1  ;;  %v3382_v0 = vadd.f32 %v3312_v22, %v3219_v34  ;;  %8444 = vst [vmem:[#allocation12_spill] sm:$0xff] %v7450_v58  ;;  %v6300_v54 = vld [vmem:[%s6461_s8 + $0xac] sm:$0xf]  ;;  %v797_v34 = vsel %vm7019_vm8, %v5477_v9, %v796_v44 }
 0x1da   : > { %v3027_v21 = vunpack.c.l.b16 %v797_v34 }
 0x1db   : > { %v3635_v53 = vadd.f32 %v7130_v2, %v3603_v35  ;;  %v1408_v35 = vrot.slane %v6300_v54, 5 }
 0x1dd   : > { %v3667_v63 = vmax.f32 %v3635_v53, 0.0 }
 0x1de   : > { %v3129_v23 = vpop.f32.mrf.mxu0 }
 0x1df   : > { %3737 = vrot.lane.b32.xlu0 %v3667_v63, %s6386_s28  ;;  %v3317_v62 = vpop.f32.mrf.mxu2  ;;  %v3222_v25 = vadd.f32 %v3221_v3, %v3129_v23  ;;  %v800_v63 = vsel %vm7019_vm8, %v798_v31, %v799_v6 }
 0x1e0   : > { %v3534_v61 = vpop.f32.mrf.mxu3 }
 0x1e1   : > { %v3604_v11 = vadd.f32 %v3534_v61, %v3382_v0  ;;  %5849 = vmatmul.msk.bf16.gmra.mxu0 %vm2091_vm1, %v3045_v13  ;;  %v3226_v16 = vpop.f32.mrf.mxu1  ;;  %v3383_v17 = vadd.f32 %v3315_v47, %v3222_v25  ;;  %v6301_v13 = vld [vmem:[%s6461_s8 + $0xb0] sm:$0x1]  ;;  %v3028_v47 = vunpack.c.l.b16 %v800_v63  ;;  %v1409_v61 = vsel %vm7019_vm8, %v5557_v28, %v1408_v35 }
 0x1e2   : > { %v1411_v14 = vrot.slane %v6301_v13, 5  ;;  %v3435_v6 = vunpack.c.l.b16 %v1409_v61  ;;  %v6304_v13 = vld [vmem:[%s6461_s8 + $0xb8] sm:$0xf] }
 0x1e3   : > { %v3636_v22 = vadd.f32 %v7130_v2, %v3604_v11  ;;  %v1410_v2 = vrot.slane %v1408_v35, 4  ;;  %v7475_v11 = vld [vmem:[%s8411_s2] ss:$0 sm:$0xff]  ;;  %v3046_v57 = vpack.c.b16 %v3028_v47, %v3027_v21  ;;  %v6305_v21 = vld [vmem:[%s6461_s8 + $0xb0] sm:$0x1] }
 0x1e4   : > { %5883 = vmatmul.msk.bf16.gmra.mxu2 %vm2091_vm1, %v8445_v59  ;;  %5866 = vmatmul.msk.bf16.gmra.mxu1 %vm2091_vm1, %v8446_v40  ;;  %v806_v47 = vrot.slane %v6305_v21, 5  ;;  %v651_v21 = vld [vmem:[%s6461_s8 + $0xb4] sm:$0xe] }
 0x1e5   : > { %5899 = vmatmul.msk.bf16.gmra.mxu3 %vm2091_vm1, %v7450_v58  ;;  %v3668_v3 = vmax.f32 %v3636_v22, 0.0  ;;  %v1412_v44 = vsel %vm7019_vm8, %v1410_v2, %v1411_v14  ;;  %v6303_v22 = vld [vmem:[%s6461_s8 + $0xac] sm:$0xf]  ;;  %v5542_v2 = vld [vmem:[%s6461_s8 + $0xb4] sm:$0xe]  ;;  %v1415_v14 = vrot.slane %v6304_v13, 5 }
 0x1e6   : > { %v3131_v53 = vpop.f32.mrf.mxu0  ;;  %v3436_v49 = vunpack.c.l.b16 %v1412_v44  ;;  %v803_v35 = vrot.slane %v6303_v22, 5  ;;  %v5598_v58 = vld [vmem:[%s6461_s8 + $0x68] sm:$0x1] }
 0x1e7   : > { %3739 = vrot.lane.b32.xlu1 %v3668_v3, %s6386_s28  ;;  %v3320_v32 = vpop.f32.mrf.mxu2  ;;  %v3224_v9 = vadd.f32 %v3223_v1, %v3131_v53 }
 0x1e8   : > { %v3537_v23 = vpop.f32.mrf.mxu3  ;;  %v7482_v1 = vpack.c.b16 %v3436_v49, %v3435_v6 }
 0x1e9   : > { %v3605_v7 = vadd.f32 %v3537_v23, %v3383_v17  ;;  %v3228_v0 = vpop.f32.mrf.mxu1  ;;  %v3384_v40 = vadd.f32 %v3317_v62, %v3224_v9  ;;  %v650_v17 = vld [vmem:[%s6461_s8 + $0xa8] sm:$0xe]  ;;  %v6306_v9 = vld [vmem:[%s6461_s8 + $0xbc] sm:$0x1] }
 0x1ea   : > { %8447 = vst [vmem:[#allocation6_spill] sm:$0xff] %v7482_v1  ;;  %v5478_v23 = vrot.slane %v650_v17, 9 }
 0x1eb   : > { %v3637_v25 = vadd.f32 %v7475_v11, %v3605_v7  ;;  %v805_v7 = vrot.slane %v803_v35, 4 }
 0x1ec   : > { %v804_v6 = vsel %vm7019_vm8, %v5478_v23, %v803_v35 }
 0x1ed   : > { %v3669_v31 = vmax.f32 %v3637_v25, 0.0  ;;  %v1417_v25 = vrot.slane %v1415_v14, 4  ;;  %v807_v49 = vsel %vm7019_vm8, %v805_v7, %v806_v47  ;;  %v3029_v17 = vunpack.c.l.b16 %v804_v6  ;;  %v6307_v47 = vld [vmem:[%s6461_s8 + $0xb8] sm:$0xf] }
 0x1ee   : > { %v3134_v54 = vpop.f32.mrf.mxu0 }
 0x1ef   : > { %3741 = vrot.lane.b32.xlu2 %v3669_v31, %s6386_s28  ;;  %v3322_v3 = vpop.f32.mrf.mxu2  ;;  %v3227_v63 = vadd.f32 %v3226_v16, %v3134_v54  ;;  %v5558_v16 = vrot.slane %v5542_v2, 9  ;;  %v1418_v31 = vrot.slane %v6306_v9, 5  ;;  %v5479_v9 = vrot.slane %v651_v21, 9 }
 0x1f0   : > { %v3539_v28 = vpop.f32.mrf.mxu3 }
 0x1f1   : > { %v3606_v34 = vadd.f32 %v3539_v28, %v3384_v40  ;;  %5850 = vmatmul.msk.bf16.gmra.mxu0 %vm2091_vm1, %v3046_v57  ;;  %v3231_v53 = vpop.f32.mrf.mxu1  ;;  %v3385_v44 = vadd.f32 %v3320_v32, %v3227_v63  ;;  %v1416_v22 = vsel %vm7019_vm8, %v5558_v16, %v1415_v14  ;;  %v3030_v28 = vunpack.c.l.b16 %v807_v49 }
 0x1f2   : > { %v1419_v35 = vsel %vm7019_vm8, %v1417_v25, %v1418_v31  ;;  %v3437_v2 = vunpack.c.l.b16 %v1416_v22  ;;  %v810_v14 = vrot.slane %v6307_v47, 5  ;;  %v6308_v31 = vld [vmem:[%s6461_s8 + $0xc4] sm:$0xf] }
 0x1f3   : > { %v3638_v62 = vadd.f32 %v7475_v11, %v3606_v34  ;;  %v3438_v13 = vunpack.c.l.b16 %v1419_v35  ;;  %v3047_v7 = vpack.c.b16 %v3030_v28, %v3029_v17  ;;  %v6101_v35 = vld [vmem:[%s8410_s1 + $0x1c] sm:$0x3] }
 0x1f4   : > { %5884 = vmatmul.msk.bf16.gmra.mxu2 %vm2091_vm1, %v7017_v55  ;;  %5867 = vmatmul.msk.bf16.gmra.mxu1 %vm2091_vm1, %v7012_v56  ;;  %v812_v22 = vrot.slane %v810_v14, 4  ;;  %v811_v21 = vsel %vm7019_vm8, %v5479_v9, %v810_v14  ;;  %v6067_v14 = vld [vmem:[%s8410_s1 + $0x18] sm:$0x3] }
 0x1f5   : > { %5900 = vmatmul.msk.bf16.gmra.mxu3 %vm2091_vm1, %v7482_v1  ;;  %v3670_v61 = vmax.f32 %v3638_v62, 0.0  ;;  %v7512_v25 = vpack.c.b16 %v3438_v13, %v3437_v2  ;;  %v4790_v2 = vsel %vm2140_vm0, %v6101_v35, 0  ;;  %v5560_v13 = vld [vmem:[%s6461_s8 + $0x18] sm:$0xf]  ;;  %v5597_v1 = vld [vmem:[%s6461_s8 + $0x5c] sm:$0x1] }
 0x1f6   : > { %v3136_v57 = vpop.f32.mrf.mxu0  ;;  %4799 = vmatpush.bf16.msrb.mxu2 %v4790_v2 }
 0x1f7   : > { %3743 = vrot.lane.b32.xlu0 %v3670_v61, %s6386_s28  ;;  %v3325_v56 = vpop.f32.mrf.mxu2  ;;  %v3229_v63 = vadd.f32 %v3228_v0, %v3136_v57  ;;  %8448 = vst [vmem:[#allocation13_spill] sm:$0xff] %v7512_v25  ;;  %v5543_v0 = vld [vmem:[%s6461_s8 + $0xc0] sm:$0xe]  ;;  %v1422_v57 = vrot.slane %v6308_v31, 5 }
 0x1f8   : > { %v3542_v54 = vpop.f32.mrf.mxu3  ;;  %v5559_v28 = vrot.slane %v5543_v0, 9 }
 0x1f9   : > { %v3607_v32 = vadd.f32 %v3542_v54, %v3385_v44  ;;  %v7502_v40 = vpop.f32.mrf.mxu1  ;;  %v3386_v16 = vadd.f32 %v3322_v3, %v3229_v63 }
 0x1fa   : > { %v1423_v31 = vsel %vm7019_vm8, %v5559_v28, %v1422_v57 }
 0x1fb   : > { %v3639_v34 = vadd.f32 %v7475_v11, %v3607_v32  ;;  %v6309_v32 = vld [vmem:[%s6461_s8 + $0xbc] sm:$0x1] }
 0x1fc   : > { %v813_v3 = vrot.slane %v6309_v32, 5 }
 0x1fd   : > { %v3671_v23 = vmax.f32 %v3639_v34, 0.0  ;;  %v6310_v34 = vld [vmem:[%s6461_s8 + $0xc8] sm:$0x1] }
 0x1fe   : > { %v3139_v62 = vpop.f32.mrf.mxu0  ;;  %v1425_v63 = vrot.slane %v6310_v34, 5  ;;  %v814_v47 = vsel %vm7019_vm8, %v812_v22, %v813_v3  ;;  %v3031_v22 = vunpack.c.l.b16 %v811_v21  ;;  %v1480_v3 = vshrl.u32 %v5560_v13, 16 }
 0x1ff   : > { %3745 = vrot.lane.b32.xlu1 %v3671_v23, %s6386_s28  ;;  %v7510_v61 = vpop.f32.mrf.mxu2  ;;  %v3232_v49 = vadd.f32 %v3231_v53, %v3139_v62  ;;  %v1424_v53 = vrot.slane %v1422_v57, 4  ;;  %v6068_v62 = vld [vmem:[%s8410_s1 + $0x1a] sm:$0x3]  ;;  %v3032_v32 = vunpack.c.l.b16 %v814_v47 }
 0x200   : > { %v3544_v44 = vpop.f32.mrf.mxu3  ;;  %v1482_v47 = vrot.slane %v1480_v3, 4 }
 0x201   : > { %v3608_v6 = vadd.f32 %v3544_v44, %v3386_v16  ;;  %5851 = vmatmul.msk.bf16.gmra.mxu0 %vm2091_vm1, %v3047_v7  ;;  %v7517_v54 = vpop.f32.mrf.mxu1  ;;  %v3387_v7 = vadd.f32 %v3325_v56, %v3232_v49  ;;  %v5561_v44 = vld [vmem:[%s6461_s8 + $0x1c] sm:$0xf]  ;;  %v4604_v56 = vsel %vm2140_vm0, %v6068_v62, 0  ;;  %v1426_v2 = vsel %vm7019_vm8, %v1424_v53, %v1425_v63 }
 0x202   : > { %4613 = vmatpush.bf16.msrb.mxu0 %v4604_v56  ;;  %v3439_v62 = vunpack.c.l.b16 %v1423_v31  ;;  %v3440_v21 = vunpack.c.l.b16 %v1426_v2  ;;  %v3048_v56 = vpack.c.b16 %v3032_v32, %v3031_v22 }
 0x203   : > { %v3640_v17 = vadd.f32 %v7475_v11, %v3608_v6  ;;  %v4696_v6 = vsel %vm2140_vm0, %v6067_v14, 0 }
 0x204   : > { %5885 = vmatmul.msk.bf16.gmra.mxu2 %vm2091_vm1, %v7079_v8  ;;  %5868 = vmatmul.msk.bf16.gmra.mxu1 %vm2091_vm1, %v7073_v50  ;;  %v6118_v50 = vld [vmem:[%s8410_s1 + $0x1e] sm:$0x3] }
 0x205   : > { %5901 = vmatmul.msk.bf16.gmra.mxu3 %vm2091_vm1, %v7512_v25  ;;  %v3672_v23 = vmax.f32 %v3640_v17, 0.0  ;;  %v5012_v0 = vsel %vm2140_vm0, %v6118_v50, 0  ;;  %v1483_v17 = vshll.u32 %v5560_v13, 16  ;;  %4705 = vmatpush.bf16.msrb.mxu1 %v4696_v6  ;;  %v1493_v50 = vshrl.u32 %v5561_v44, 16 }
 0x206   : > { %v3141_v16 = vpop.f32.mrf.mxu0  ;;  %5021 = vmatpush.bf16.msrb.mxu3 %v5012_v0 }
 0x207   : > { %3747 = vrot.lane.b32.xlu2 %v3672_v23, %s6386_s28  ;;  %v3330_v9 = vpop.f32.mrf.mxu2  ;;  %v1489_v23 = vshll.u32 %v5561_v44, 16  ;;  %v3234_v28 = vadd.f32 %v7502_v40, %v3141_v16  ;;  %v1485_v0 = vrot.slane %v1483_v17, 5  ;;  %v6202_v40 = vld [vmem:[%s6461_s8 + $0x18] sm:$0xff] }
 0x208   : > { %v3547_v49 = vpop.f32.mrf.mxu3 }
 0x209   : > { %v3609_v35 = vadd.f32 %v3547_v49, %v3387_v7  ;;  %v3238_v34 = vpop.f32.mrf.mxu1  ;;  %v1491_v14 = vrot.slane %v1489_v23, 5  ;;  %v1495_v7 = vrot.slane %v1493_v50, 4  ;;  %v5592_v49 = vld [vmem:[%s6461_s8 + $0x20] sm:$0x1]  ;;  %v3388_v53 = vadd.f32 %v7510_v61, %v3234_v28  ;;  %v6311_v61 = vld [vmem:[%s6461_s8 + $0xc] sm:$0xff] }
 0x20a   : > { %v1486_v16 = vor.u32 %v1485_v0, %v1482_v47  ;;  %v1499_v17 = vshll.u32 %v5592_v49, 16  ;;  %v5563_v47 = vld [vmem:[%s6461_s8 + $0x28] sm:$0xf] }
 0x20b   : > { %v3641_v57 = vadd.f32 %v7475_v11, %v3609_v35  ;;  %v7560_v35 = vpack.c.b16 %v3440_v21, %v3439_v62  ;;  %v1496_v32 = vor.u32 %v1495_v7, %v1491_v14  ;;  %v5562_v62 = vld [vmem:[%s6461_s8 + $0x24] sm:$0xf] }
 0x20c   : > { %v1487_v23 = vrot.slane %v1486_v16, 4  ;;  %v1501_v28 = vrot.slane %v1499_v17, 5  ;;  %v1504_v7 = vshrl.u32 %v5562_v62, 16 }
 0x20d   : > { %v3673_v13 = vmax.f32 %v3641_v57, 0.0  ;;  %8449 = vst [vmem:[#allocation14_spill] sm:$0xff] %v7560_v35 }
 0x20e   : > { %v3144_v6 = vpop.f32.mrf.mxu0  ;;  %v1506_v17 = vrot.slane %v1504_v7, 4 }
 0x20f   : > { %3749 = vrot.lane.b32.xlu0 %v3673_v13, %s6386_s28  ;;  %v3332_v63 = vpop.f32.mrf.mxu2  ;;  %v3237_v3 = vadd.f32 %v7517_v54, %v3144_v6  ;;  %v1497_v54 = vrot.slane %v1496_v32, 4  ;;  %v1507_v6 = vshll.u32 %v5562_v62, 16  ;;  %v5593_v62 = vld [vmem:[%s6461_s8 + $0x2c] sm:$0x1] }
 0x210   : > { %v3549_v44 = vpop.f32.mrf.mxu3 }
 0x211   : > { %v3610_v31 = vadd.f32 %v3549_v44, %v3388_v53  ;;  %5852 = vmatmul.msk.bf16.gmra.mxu0 %vm2091_vm1, %v3048_v56  ;;  %v3241_v22 = vpop.f32.mrf.mxu1  ;;  %v3389_v57 = vadd.f32 %v3330_v9, %v3237_v3  ;;  %v1492_v56 = vsel %vm6477_vm4, %v1487_v23, %v1491_v14  ;;  %v1502_v9 = vsel %vm6477_vm4, %v1497_v54, %v1501_v28 }
 0x212   : > { %v1513_v44 = vshll.u32 %v5563_v47, 16  ;;  %v4282_v3 = vunpack.c.l.b16 %v1492_v56  ;;  %v4283_v32 = vunpack.c.l.b16 %v1502_v9  ;;  %v1523_v9 = vshll.u32 %v5593_v62, 16 }
 0x213   : > { %v3642_v2 = vadd.f32 %v7475_v11, %v3610_v31 }
 0x214   : > { %6002 = vmatmul.msk.bf16.vlgmr.msra.gmra.mxu2 %vm2091_vm1, %v6202_v40  ;;  %5921 = vmatmul.msk.bf16.vlgmr.msra.gmra.mxu1 %vm2091_vm1, %v6311_v61  ;;  %v1517_v40 = vshrl.u32 %v5563_v47, 16  ;;  %v1515_v14 = vrot.slane %v1513_v44, 5  ;;  %v7581_v47 = vpack.c.b16 %v4283_v32, %v4282_v3  ;;  %v6312_v44 = vld [vmem:[%s6461_s8 + $0x18] sm:$0xff]  ;;  %v1525_v3 = vrot.slane %v1523_v9, 5  ;;  %v5564_v32 = vld [vmem:[%s6461_s8 + $0x30] sm:$0xf] }
 0x215   : > { %5902 = vmatmul.msk.bf16.gmra.mxu3 %vm2091_vm1, %v7560_v35  ;;  %v3674_v50 = vmax.f32 %v3642_v2, 0.0  ;;  %v1509_v2 = vrot.slane %v1507_v6, 5  ;;  %v1528_v62 = vshrl.u32 %v5564_v32, 16  ;;  %v5595_v35 = vld [vmem:[%s6461_s8 + $0x44] sm:$0x1] }
 0x216   : > { %v3146_v21 = vpop.f32.mrf.mxu0  ;;  %v1519_v23 = vrot.slane %v1517_v40, 4 }
 0x217   : > { %3751 = vrot.lane.b32.xlu1 %v3674_v50, %s6386_s28  ;;  %v3335_v0 = vpop.f32.mrf.mxu2  ;;  %v3239_v31 = vadd.f32 %v3238_v34, %v3146_v21  ;;  %v6203_v34 = vld [vmem:[%s6461_s8 + $0x24] sm:$0xff]  ;;  %v1510_v21 = vor.u32 %v1509_v2, %v1506_v17  ;;  %v5565_v2 = vld [vmem:[%s6461_s8 + $0x34] sm:$0xf] }
 0x218   : > { %v3552_v13 = vpop.f32.mrf.mxu3 }
 0x219   : > { %v3611_v49 = vadd.f32 %v3552_v13, %v3389_v57  ;;  %v3243_v53 = vpop.f32.mrf.mxu1  ;;  %v3390_v57 = vadd.f32 %v3332_v63, %v3239_v31  ;;  %v1511_v40 = vrot.slane %v1510_v21, 4 }
 0x21b   : > { %v3643_v16 = vadd.f32 %v7475_v11, %v3611_v49  ;;  %v1520_v49 = vor.u32 %v1519_v23, %v1515_v14 }
 0x21d   : > { %v3675_v61 = vmax.f32 %v3643_v16, 0.0  ;;  %v1521_v31 = vrot.slane %v1520_v49, 4 }
 0x21e   : > { %v3149_v50 = vpop.f32.mrf.mxu0 }
 0x21f   : > { %3753 = vrot.lane.b32.xlu2 %v3675_v61, %s6386_s28  ;;  %v3337_v54 = vpop.f32.mrf.mxu2  ;;  %v3242_v7 = vadd.f32 %v3241_v22, %v3149_v50  ;;  %v1516_v50 = vsel %vm6477_vm4, %v1511_v40, %v1515_v14 }
 0x220   : > { %v3554_v28 = vpop.f32.mrf.mxu3  ;;  %v4284_v9 = vunpack.c.l.b16 %v1516_v50 }
 0x221   : > { %v3612_v13 = vadd.f32 %v3554_v28, %v3390_v57  ;;  %v3726_v56 = vpop.permute.xlu0 %3725  ;;  %5905 = vmatmul.msk.bf16.vlgmr.msra.gmra.mxu0 %vm2091_vm1, %v6503_v27  ;;  %v3246_v6 = vpop.f32.mrf.mxu1  ;;  %v3391_v16 = vadd.f32 %v3335_v0, %v3242_v7  ;;  %v1531_v57 = vshll.u32 %v5564_v32, 16  ;;  %v1526_v0 = vsel %vm6477_vm4, %v1521_v31, %v1525_v3  ;;  %v5594_v3 = vld [vmem:[%s6461_s8 + $0x38] sm:$0x1] }
 0x222   : > { %3822 = vst.msk [vmem:[%s6753_s18] sm:$0xff] %vm3821_vm9, %v3726_v56  ;;  %v1541_v56 = vshrl.u32 %v5565_v2, 16 }
 0x223   : > { %v3644_v63 = vadd.f32 %v7475_v11, %v3612_v13  ;;  %v1537_v13 = vshll.u32 %v5565_v2, 16  ;;  %v1533_v40 = vrot.slane %v1531_v57, 5 }
 0x224   : > { %6003 = vmatmul.msk.bf16.gmra.mxu2 %vm2091_vm1, %v6203_v34  ;;  %5922 = vmatmul.msk.bf16.gmra.mxu1 %vm2091_vm1, %v6312_v44  ;;  %v1530_v44 = vrot.slane %v1528_v62, 4  ;;  %v1543_v32 = vrot.slane %v1541_v56, 4 }
 0x225   : > { %6019 = vmatmul.msk.bf16.vlgmr.msra.gmra.mxu3 %vm2091_vm1, %v7581_v47  ;;  %v3676_v22 = vmax.f32 %v3644_v63, 0.0  ;;  %v4285_v63 = vunpack.c.l.b16 %v1526_v0 }
 0x226   : > { %v3151_v17 = vpop.f32.mrf.mxu0 }
 0x227   : > { %3755 = vrot.lane.b32.xlu0 %v3676_v22, %s6386_s28  ;;  %v3340_v61 = vpop.f32.mrf.mxu2  ;;  %v3244_v14 = vadd.f32 %v3243_v53, %v3151_v17  ;;  %v6204_v53 = vld [vmem:[%s6461_s8 + $0x30] sm:$0xff]  ;;  %v1534_v17 = vor.u32 %v1533_v40, %v1530_v44  ;;  %v5566_v40 = vld [vmem:[%s6461_s8 + $0x3c] sm:$0xf] }
 0x228   : > { %v3557_v23 = vpop.f32.mrf.mxu3 }
 0x229   : > { %v3613_v28 = vadd.f32 %v3557_v23, %v3391_v16  ;;  %v3728_v34 = vpop.permute.xlu0 %3727  ;;  %v3734_v21 = vpop.permute.xlu2 %3733  ;;  %v1539_v16 = vrot.slane %v1537_v13, 5  ;;  %v3392_v2 = vadd.f32 %v3337_v54, %v3244_v14  ;;  %v1547_v13 = vshll.u32 %v5594_v3, 16 }
 0x22a   : > { %3823 = vst.msk [vmem:[%s6753_s18 + $0x8] sm:$0xff] %vm3821_vm9, %v3728_v34  ;;  %v3248_v7 = vpop.f32.mrf.mxu1  ;;  %v7608_v34 = vpack.c.b16 %v4285_v63, %v4284_v9 }
 0x22b   : > { %v3645_v49 = vadd.f32 %v7475_v11, %v3613_v28  ;;  %3826 = vst.msk [vmem:[%s6753_s18 + $0x40] sm:$0xff] %vm3821_vm9, %v3734_v21  ;;  %v1544_v0 = vor.u32 %v1543_v32, %v1539_v16  ;;  %v1549_v44 = vrot.slane %v1547_v13, 5  ;;  %v5567_v32 = vld [vmem:[%s6461_s8 + $0x40] sm:$0xf] }
 0x22d   : > { %v3677_v22 = vmax.f32 %v3645_v49, 0.0  ;;  %v6313_v49 = vld [vmem:[%s6461_s8 + $0x24] sm:$0xff]  ;;  %v1545_v63 = vrot.slane %v1544_v0, 4 }
 0x22e   : > { %v3154_v31 = vpop.f32.mrf.mxu0 }
 0x22f   : > { %3757 = vrot.lane.b32.xlu1 %v3677_v22, %s6386_s28  ;;  %v3342_v23 = vpop.f32.mrf.mxu2  ;;  %v3247_v21 = vadd.f32 %v3246_v6, %v3154_v31  ;;  %v1535_v6 = vrot.slane %v1534_v17, 4 }
 0x230   : > { %v3559_v28 = vpop.f32.mrf.mxu3 }
 0x231   : > { %v3614_v50 = vadd.f32 %v3559_v28, %v3392_v2  ;;  %v3730_v62 = vpop.permute.xlu1 %3729  ;;  %v3736_v57 = vpop.permute.xlu2 %3735  ;;  %5906 = vmatmul.msk.bf16.gmra.mxu0 %vm2091_vm1, %v6527_v10  ;;  %v3393_v9 = vadd.f32 %v3340_v61, %v3247_v21  ;;  %v1540_v2 = vsel %vm6477_vm4, %v1535_v6, %v1539_v16  ;;  %v1552_v28 = vshrl.u32 %v5566_v40, 16 }
 0x232   : > { %3824 = vst.msk [vmem:[%s6753_s18 + $0x20] sm:$0xff] %vm3821_vm9, %v3730_v62  ;;  %v3251_v54 = vpop.f32.mrf.mxu1  ;;  %v1550_v61 = vsel %vm6477_vm4, %v1545_v63, %v1549_v44  ;;  %v1561_v62 = vshll.u32 %v5567_v32, 16 }
 0x233   : > { %v3646_v56 = vadd.f32 %v7475_v11, %v3614_v50  ;;  %3827 = vst.msk [vmem:[%s6753_s18 + $0x48] sm:$0xff] %vm3821_vm9, %v3736_v57  ;;  %v1565_v57 = vshrl.u32 %v5567_v32, 16  ;;  %v1554_v16 = vrot.slane %v1552_v28, 4  ;;  %v1571_v28 = vshll.u32 %v5595_v35, 16  ;;  %v5569_v35 = vld [vmem:[%s6461_s8 + $0x4c] sm:$0xf] }
 0x234   : > { %6004 = vmatmul.msk.bf16.gmra.mxu2 %vm2091_vm1, %v6204_v53  ;;  %5923 = vmatmul.msk.bf16.gmra.mxu1 %vm2091_vm1, %v6313_v49  ;;  %v1555_v53 = vshll.u32 %v5566_v40, 16  ;;  %v4287_v49 = vunpack.c.l.b16 %v1550_v61 }
 0x235   : > { %6020 = vmatmul.msk.bf16.gmra.mxu3 %vm2091_vm1, %v7608_v34  ;;  %v3678_v14 = vmax.f32 %v3646_v56, 0.0  ;;  %v4286_v56 = vunpack.c.l.b16 %v1540_v2  ;;  %v1567_v40 = vrot.slane %v1565_v57, 4 }
 0x236   : > { %v3156_v22 = vpop.f32.mrf.mxu0  ;;  %v1557_v6 = vrot.slane %v1555_v53, 5 }
 0x237   : > { %3759 = vrot.lane.b32.xlu2 %v3678_v14, %s6386_s28  ;;  %v3345_v31 = vpop.f32.mrf.mxu2  ;;  %v3249_v13 = vadd.f32 %v3248_v7, %v3156_v22 }
 0x238   : > { %v3562_v3 = vpop.f32.mrf.mxu3  ;;  %v1558_v25 = vor.u32 %v1557_v6, %v1554_v16 }
 0x239   : > { %v3615_v17 = vadd.f32 %v3562_v3, %v3393_v9  ;;  %v3732_v50 = vpop.permute.xlu1 %3731  ;;  %v1563_v9 = vrot.slane %v1561_v62, 5  ;;  %v3394_v63 = vadd.f32 %v3342_v23, %v3249_v13  ;;  %v6314_v23 = vld [vmem:[%s6461_s8 + $0x30] sm:$0xff]  ;;  %v1573_v13 = vrot.slane %v1571_v28, 5 }
 0x23a   : > { %3825 = vst.msk [vmem:[%s6753_s18 + $0x28] sm:$0xff] %vm3821_vm9, %v3732_v50  ;;  %v3253_v21 = vpop.f32.mrf.mxu1  ;;  %v7635_v50 = vpack.c.b16 %v4287_v49, %v4286_v56  ;;  %v1559_v62 = vrot.slane %v1558_v25, 4  ;;  %v5568_v56 = vld [vmem:[%s6461_s8 + $0x48] sm:$0xf] }
 0x23b   : > { %v3647_v0 = vadd.f32 %v7475_v11, %v3615_v17  ;;  %v6205_v17 = vld [vmem:[%s6461_s8 + $0x3c] sm:$0xff]  ;;  %v1568_v2 = vor.u32 %v1567_v40, %v1563_v9  ;;  %v1576_v40 = vshrl.u32 %v5568_v56, 16  ;;  %v1579_v25 = vshll.u32 %v5568_v56, 16 }
 0x23d   : > { %v3679_v14 = vmax.f32 %v3647_v0, 0.0  ;;  %v1569_v0 = vrot.slane %v1568_v2, 4 }
 0x23e   : > { %v3159_v3 = vpop.f32.mrf.mxu0 }
 0x23f   : > { %3761 = vrot.lane.b32.xlu0 %v3679_v14, %s6386_s28  ;;  %v3347_v44 = vpop.f32.mrf.mxu2  ;;  %v3252_v22 = vadd.f32 %v3251_v54, %v3159_v3  ;;  %v1564_v14 = vsel %vm6477_vm4, %v1559_v62, %v1563_v9  ;;  %v1578_v9 = vrot.slane %v1576_v40, 4 }
 0x240   : > { %v3564_v32 = vpop.f32.mrf.mxu3  ;;  %v4288_v28 = vunpack.c.l.b16 %v1564_v14 }
 0x241   : > { %v3616_v7 = vadd.f32 %v3564_v32, %v3394_v63  ;;  %5907 = vmatmul.msk.bf16.gmra.mxu0 %vm2091_vm1, %v6555_v60  ;;  %v3395_v54 = vadd.f32 %v3345_v31, %v3252_v22  ;;  %v1574_v31 = vsel %vm6477_vm4, %v1569_v0, %v1573_v13  ;;  %v1585_v32 = vshll.u32 %v5569_v35, 16 }
 0x242   : > { %v3256_v53 = vpop.f32.mrf.mxu1 }
 0x243   : > { %v3648_v61 = vadd.f32 %v7475_v11, %v3616_v7 }
 0x244   : > { %6005 = vmatmul.msk.bf16.gmra.mxu2 %vm2091_vm1, %v6205_v17  ;;  %5924 = vmatmul.msk.bf16.gmra.mxu1 %vm2091_vm1, %v6314_v23  ;;  %v1589_v17 = vshrl.u32 %v5569_v35, 16  ;;  %v1581_v23 = vrot.slane %v1579_v25, 5 }
 0x245   : > { %6021 = vmatmul.msk.bf16.gmra.mxu3 %vm2091_vm1, %v7635_v50  ;;  %v3680_v57 = vmax.f32 %v3648_v61, 0.0  ;;  %v4289_v61 = vunpack.c.l.b16 %v1574_v31 }
 0x246   : > { %v3161_v49 = vpop.f32.mrf.mxu0 }
 0x247   : > { %3763 = vrot.lane.b32.xlu1 %v3680_v57, %s6386_s28  ;;  %v3350_v16 = vpop.f32.mrf.mxu2  ;;  %v3254_v2 = vadd.f32 %v3253_v21, %v3161_v49  ;;  %v1587_v57 = vrot.slane %v1585_v32, 5  ;;  %v1582_v21 = vor.u32 %v1581_v23, %v1578_v9  ;;  %v5570_v9 = vld [vmem:[%s6461_s8 + $0x54] sm:$0xf] }
 0x248   : > { %v3567_v6 = vpop.f32.mrf.mxu3 }
 0x249   : > { %v3617_v3 = vadd.f32 %v3567_v6, %v3395_v54  ;;  %v3742_v63 = vpop.permute.xlu2 %3741  ;;  %v1591_v54 = vrot.slane %v1589_v17, 4  ;;  %v5596_v6 = vld [vmem:[%s6461_s8 + $0x50] sm:$0x1]  ;;  %v3396_v0 = vadd.f32 %v3347_v44, %v3254_v2  ;;  %v6315_v17 = vld [vmem:[%s6461_s8 + $0x3c] sm:$0xff] }
 0x24a   : > { %3830 = vst.msk [vmem:[%s6753_s18 + $0x80] sm:$0xff] %vm3821_vm9, %v3742_v63  ;;  %v3258_v7 = vpop.f32.mrf.mxu1  ;;  %v7658_v63 = vpack.c.b16 %v4289_v61, %v4288_v28  ;;  %v1595_v31 = vshll.u32 %v5596_v6, 16 }
 0x24b   : > { %v3649_v22 = vadd.f32 %v7475_v11, %v3617_v3  ;;  %v6206_v3 = vld [vmem:[%s6461_s8 + $0x48] sm:$0xff]  ;;  %v1592_v25 = vor.u32 %v1591_v54, %v1587_v57 }
 0x24c   : > { %v1597_v61 = vrot.slane %v1595_v31, 5 }
 0x24d   : > { %v3681_v62 = vmax.f32 %v3649_v22, 0.0  ;;  %v1583_v22 = vrot.slane %v1582_v21, 4  ;;  %v1593_v28 = vrot.slane %v1592_v25, 4 }
 0x24e   : > { %v3164_v56 = vpop.f32.mrf.mxu0 }
 0x24f   : > { %3765 = vrot.lane.b32.xlu2 %v3681_v62, %s6386_s28  ;;  %v3352_v13 = vpop.f32.mrf.mxu2  ;;  %v3257_v40 = vadd.f32 %v3256_v53, %v3164_v56  ;;  %v5571_v62 = vld [vmem:[%s6461_s8 + $0x58] sm:$0xf]  ;;  %v1588_v6 = vsel %vm6477_vm4, %v1583_v22, %v1587_v57 }
 0x250   : > { %v3569_v35 = vpop.f32.mrf.mxu3 }
 0x251   : > { %v3618_v49 = vadd.f32 %v3569_v35, %v3396_v0  ;;  %v3738_v14 = vpop.permute.xlu0 %3737  ;;  %5908 = vmatmul.msk.bf16.gmra.mxu0 %vm2091_vm1, %v6579_v51  ;;  %v3397_v2 = vadd.f32 %v3350_v16, %v3257_v40  ;;  %v1600_v0 = vshrl.u32 %v5570_v9, 16  ;;  %v1603_v35 = vshll.u32 %v5570_v9, 16 }
 0x252   : > { %3828 = vst.msk [vmem:[%s6753_s18 + $0x60] sm:$0xff] %vm3821_vm9, %v3738_v14  ;;  %v3261_v44 = vpop.f32.mrf.mxu1  ;;  %v1598_v16 = vsel %vm6477_vm4, %v1593_v28, %v1597_v61  ;;  %v1613_v14 = vshrl.u32 %v5571_v62, 16 }
 0x253   : > { %v3650_v32 = vadd.f32 %v7475_v11, %v3618_v49  ;;  %v1609_v49 = vshll.u32 %v5571_v62, 16  ;;  %v1602_v57 = vrot.slane %v1600_v0, 4  ;;  %v1605_v22 = vrot.slane %v1603_v35, 5 }
 0x254   : > { %6006 = vmatmul.msk.bf16.gmra.mxu2 %vm2091_vm1, %v6206_v3  ;;  %5925 = vmatmul.msk.bf16.gmra.mxu1 %vm2091_vm1, %v6315_v17  ;;  %v4291_v17 = vunpack.c.l.b16 %v1598_v16  ;;  %v1615_v9 = vrot.slane %v1613_v14, 4  ;;  %v1619_v16 = vshll.u32 %v5597_v1, 16  ;;  %v6316_v14 = vld [vmem:[%s6461_s8 + $0x48] sm:$0xff]  ;;  %v5572_v1 = vld [vmem:[%s6461_s8 + $0x60] sm:$0xf] }
 0x255   : > { %6022 = vmatmul.msk.bf16.gmra.mxu3 %vm2091_vm1, %v7658_v63  ;;  %v3682_v53 = vmax.f32 %v3650_v32, 0.0  ;;  %v4290_v32 = vunpack.c.l.b16 %v1588_v6 }
 0x256   : > { %v3166_v23 = vpop.f32.mrf.mxu0 }
 0x257   : > { %3767 = vrot.lane.b32.xlu0 %v3682_v53, %s6386_s28  ;;  %v3355_v54 = vpop.f32.mrf.mxu2  ;;  %v3259_v31 = vadd.f32 %v3258_v7, %v3166_v23  ;;  %v1606_v7 = vor.u32 %v1605_v22, %v1602_v57  ;;  %v5573_v22 = vld [vmem:[%s6461_s8 + $0x64] sm:$0xf] }
 0x258   : > { %v3572_v56 = vpop.f32.mrf.mxu3 }
 0x259   : > { %v3619_v3 = vadd.f32 %v3572_v56, %v3397_v2  ;;  %v3740_v21 = vpop.permute.xlu1 %3739  ;;  %v1611_v2 = vrot.slane %v1609_v49, 5  ;;  %v3398_v28 = vadd.f32 %v3352_v13, %v3259_v31 }
 0x25a   : > { %3829 = vst.msk [vmem:[%s6753_s18 + $0x68] sm:$0xff] %vm3821_vm9, %v3740_v21  ;;  %v3263_v40 = vpop.f32.mrf.mxu1  ;;  %v7683_v21 = vpack.c.b16 %v4291_v17, %v4290_v32  ;;  %v1621_v17 = vrot.slane %v1619_v16, 5 }
 0x25b   : > { %v3651_v25 = vadd.f32 %v7475_v11, %v3619_v3  ;;  %v6207_v3 = vld [vmem:[%s6461_s8 + $0x54] sm:$0xff]  ;;  %v1616_v35 = vor.u32 %v1615_v9, %v1611_v2 }
 0x25d   : > { %v3683_v53 = vmax.f32 %v3651_v25, 0.0  ;;  %v1607_v25 = vrot.slane %v1606_v7, 4  ;;  %v1617_v32 = vrot.slane %v1616_v35, 4 }
 0x25e   : > { %v3169_v56 = vpop.f32.mrf.mxu0 }
 0x25f   : > { %3769 = vrot.lane.b32.xlu1 %v3683_v53, %s6386_s28  ;;  %v3357_v61 = vpop.f32.mrf.mxu2  ;;  %v3262_v0 = vadd.f32 %v3261_v44, %v3169_v56  ;;  %v1612_v56 = vsel %vm6477_vm4, %v1607_v25, %v1611_v2 }
 0x260   : > { %v3574_v62 = vpop.f32.mrf.mxu3 }
 0x261   : > { %v3620_v23 = vadd.f32 %v3574_v62, %v3398_v28  ;;  %v3748_v6 = vpop.permute.xlu2 %3747  ;;  %5909 = vmatmul.msk.bf16.gmra.mxu0 %vm2091_vm1, %v6606_v33  ;;  %v3399_v31 = vadd.f32 %v3355_v54, %v3262_v0  ;;  %v1624_v28 = vshrl.u32 %v5572_v1, 16  ;;  %v1627_v62 = vshll.u32 %v5572_v1, 16 }
 0x262   : > { %3833 = vst.msk [vmem:[%s6753_s18 + $0xa8] sm:$0xff] %vm3821_vm9, %v3748_v6  ;;  %v3266_v13 = vpop.f32.mrf.mxu1  ;;  %v1622_v54 = vsel %vm6477_vm4, %v1617_v32, %v1621_v17  ;;  %v1637_v6 = vshrl.u32 %v5573_v22, 16 }
 0x263   : > { %v3652_v49 = vadd.f32 %v7475_v11, %v3620_v23  ;;  %v1633_v23 = vshll.u32 %v5573_v22, 16  ;;  %v1626_v2 = vrot.slane %v1624_v28, 4  ;;  %v1629_v25 = vrot.slane %v1627_v62, 5 }
 0x264   : > { %6007 = vmatmul.msk.bf16.gmra.mxu2 %vm2091_vm1, %v6207_v3  ;;  %5926 = vmatmul.msk.bf16.gmra.mxu1 %vm2091_vm1, %v6316_v14  ;;  %v4293_v14 = vunpack.c.l.b16 %v1622_v54  ;;  %v1639_v1 = vrot.slane %v1637_v6, 4  ;;  %v1643_v54 = vshll.u32 %v5598_v58, 16  ;;  %v6317_v6 = vld [vmem:[%s6461_s8 + $0x54] sm:$0xff]  ;;  %v5574_v58 = vld [vmem:[%s6461_s8 + $0x6c] sm:$0xf] }
 0x265   : > { %6023 = vmatmul.msk.bf16.gmra.mxu3 %vm2091_vm1, %v7683_v21  ;;  %v3684_v44 = vmax.f32 %v3652_v49, 0.0  ;;  %v4292_v49 = vunpack.c.l.b16 %v1612_v56 }
 0x266   : > { %v3171_v57 = vpop.f32.mrf.mxu0 }
 0x267   : > { %3771 = vrot.lane.b32.xlu2 %v3684_v44, %s6386_s28  ;;  %v3360_v53 = vpop.f32.mrf.mxu2  ;;  %v3264_v16 = vadd.f32 %v3263_v40, %v3171_v57  ;;  %v1630_v40 = vor.u32 %v1629_v25, %v1626_v2  ;;  %v5575_v25 = vld [vmem:[%s6461_s8 + $0x70] sm:$0xf] }
 0x268   : > { %v3577_v9 = vpop.f32.mrf.mxu3 }
 0x269   : > { %v3621_v3 = vadd.f32 %v3577_v9, %v3399_v31  ;;  %v3744_v7 = vpop.permute.xlu0 %3743  ;;  %v1635_v31 = vrot.slane %v1633_v23, 5  ;;  %v3400_v32 = vadd.f32 %v3357_v61, %v3264_v16 }
 0x26a   : > { %3831 = vst.msk [vmem:[%s6753_s18 + $0x88] sm:$0xff] %vm3821_vm9, %v3744_v7  ;;  %v3268_v0 = vpop.f32.mrf.mxu1  ;;  %v7708_v7 = vpack.c.b16 %v4293_v14, %v4292_v49  ;;  %v1645_v14 = vrot.slane %v1643_v54, 5 }
 0x26b   : > { %v3653_v35 = vadd.f32 %v7475_v11, %v3621_v3  ;;  %v6208_v3 = vld [vmem:[%s6461_s8 + $0x60] sm:$0xff]  ;;  %v1640_v62 = vor.u32 %v1639_v1, %v1635_v31 }
 0x26d   : > { %v3685_v44 = vmax.f32 %v3653_v35, 0.0  ;;  %v1631_v35 = vrot.slane %v1630_v40, 4  ;;  %v1641_v49 = vrot.slane %v1640_v62, 4 }
 0x26e   : > { %v3174_v9 = vpop.f32.mrf.mxu0 }
 0x26f   : > { %3773 = vrot.lane.b32.xlu0 %v3685_v44, %s6386_s28  ;;  %v3362_v17 = vpop.f32.mrf.mxu2  ;;  %v3267_v28 = vadd.f32 %v3266_v13, %v3174_v9  ;;  %v1636_v9 = vsel %vm6477_vm4, %v1631_v35, %v1635_v31 }
 0x270   : > { %v3579_v22 = vpop.f32.mrf.mxu3 }
 0x271   : > { %v3622_v57 = vadd.f32 %v3579_v22, %v3400_v32  ;;  %v3746_v56 = vpop.permute.xlu1 %3745  ;;  %5910 = vmatmul.msk.bf16.gmra.mxu0 %vm2091_vm1, %v6631_v30  ;;  %v3401_v16 = vadd.f32 %v3360_v53, %v3267_v28  ;;  %v1648_v32 = vshrl.u32 %v5574_v58, 16  ;;  %v1651_v22 = vshll.u32 %v5574_v58, 16 }
 0x272   : > { %3832 = vst.msk [vmem:[%s6753_s18 + $0xa0] sm:$0xff] %vm3821_vm9, %v3746_v56  ;;  %v3271_v61 = vpop.f32.mrf.mxu1  ;;  %v1646_v53 = vsel %vm6477_vm4, %v1641_v49, %v1645_v14  ;;  %v1661_v56 = vshrl.u32 %v5575_v25, 16 }
 0x273   : > { %v3654_v23 = vadd.f32 %v7475_v11, %v3622_v57  ;;  %v1657_v57 = vshll.u32 %v5575_v25, 16  ;;  %v1650_v31 = vrot.slane %v1648_v32, 4  ;;  %v1653_v35 = vrot.slane %v1651_v22, 5 }
 0x274   : > { %6008 = vmatmul.msk.bf16.gmra.mxu2 %vm2091_vm1, %v6208_v3  ;;  %5927 = vmatmul.msk.bf16.gmra.mxu1 %vm2091_vm1, %v6317_v6  ;;  %v4295_v6 = vunpack.c.l.b16 %v1646_v53  ;;  %v1663_v58 = vrot.slane %v1661_v56, 4  ;;  %v1667_v53 = vshll.u32 %v5599_v18, 16  ;;  %v6318_v56 = vld [vmem:[%s6461_s8 + $0x60] sm:$0xff]  ;;  %v5576_v18 = vld [vmem:[%s6461_s8 + $0x78] sm:$0xf] }
 0x275   : > { %6024 = vmatmul.msk.bf16.gmra.mxu3 %vm2091_vm1, %v7708_v7  ;;  %v3686_v13 = vmax.f32 %v3654_v23, 0.0  ;;  %v4294_v23 = vunpack.c.l.b16 %v1636_v9 }
 0x276   : > { %v3176_v2 = vpop.f32.mrf.mxu0 }
 0x277   : > { %3775 = vrot.lane.b32.xlu1 %v3686_v13, %s6386_s28  ;;  %v3365_v44 = vpop.f32.mrf.mxu2  ;;  %v3269_v54 = vadd.f32 %v3268_v0, %v3176_v2  ;;  %v1654_v0 = vor.u32 %v1653_v35, %v1650_v31  ;;  %v5577_v35 = vld [vmem:[%s6461_s8 + $0x7c] sm:$0xf] }
 0x278   : > { %v3582_v1 = vpop.f32.mrf.mxu3 }
 0x279   : > { %v3623_v3 = vadd.f32 %v3582_v1, %v3401_v16  ;;  %v3754_v40 = vpop.permute.xlu2 %3753  ;;  %v1659_v16 = vrot.slane %v1657_v57, 5  ;;  %v3402_v49 = vadd.f32 %v3362_v17, %v3269_v54 }
 0x27a   : > { %3836 = vst.msk [vmem:[%s6753_s18 + $0xe0] sm:$0xff] %vm3821_vm9, %v3754_v40  ;;  %v3273_v28 = vpop.f32.mrf.mxu1  ;;  %v7733_v40 = vpack.c.b16 %v4295_v6, %v4294_v23  ;;  %v1669_v6 = vrot.slane %v1667_v53, 5 }
 0x27b   : > { %v3655_v62 = vadd.f32 %v7475_v11, %v3623_v3  ;;  %v6209_v3 = vld [vmem:[%s6461_s8 + $0x6c] sm:$0xff]  ;;  %v1664_v22 = vor.u32 %v1663_v58, %v1659_v16 }
 0x27d   : > { %v3687_v13 = vmax.f32 %v3655_v62, 0.0  ;;  %v1655_v62 = vrot.slane %v1654_v0, 4  ;;  %v1665_v23 = vrot.slane %v1664_v22, 4  ;;  %v1681_v0 = vshll.u32 %v5577_v35, 16 }
 0x27e   : > { %v3179_v1 = vpop.f32.mrf.mxu0 }
 0x27f   : > { %3777 = vrot.lane.b32.xlu2 %v3687_v13, %s6386_s28  ;;  %v3367_v14 = vpop.f32.mrf.mxu2  ;;  %v3272_v32 = vadd.f32 %v3271_v61, %v3179_v1  ;;  %v1660_v58 = vsel %vm6477_vm4, %v1655_v62, %v1659_v16  ;;  %v1672_v1 = vshrl.u32 %v5576_v18, 16 }
 0x280   : > { %v3584_v25 = vpop.f32.mrf.mxu3  ;;  %v4296_v53 = vunpack.c.l.b16 %v1660_v58 }
 0x281   : > { %v3624_v2 = vadd.f32 %v3584_v25, %v3402_v49  ;;  %v3750_v9 = vpop.permute.xlu0 %3749  ;;  %5911 = vmatmul.msk.bf16.gmra.mxu0 %vm2091_vm1, %v6657_v20  ;;  %v3403_v54 = vadd.f32 %v3365_v44, %v3272_v32  ;;  %v1675_v49 = vshll.u32 %v5576_v18, 16  ;;  %v1670_v44 = vsel %vm6477_vm4, %v1665_v23, %v1669_v6  ;;  %v7758_v32 = vld [vmem:[%s8411_s2] ss:$0 sm:$0xff] }
 0x282   : > { %3834 = vst.msk [vmem:[%s6753_s18 + $0xc0] sm:$0xff] %vm3821_vm9, %v3750_v9  ;;  %v3276_v17 = vpop.f32.mrf.mxu1  ;;  %v5600_v18 = vld [vmem:[%s6461_s8 + $0x80] sm:$0x1] }
 0x283   : > { %v3656_v57 = vadd.f32 %v7475_v11, %v3624_v2  ;;  %v1685_v2 = vshrl.u32 %v5577_v35, 16  ;;  %v1677_v62 = vrot.slane %v1675_v49, 5 }
 0x284   : > { %6009 = vmatmul.msk.bf16.gmra.mxu2 %vm2091_vm1, %v6209_v3  ;;  %5928 = vmatmul.msk.bf16.gmra.mxu1 %vm2091_vm1, %v6318_v56  ;;  %v1674_v56 = vrot.slane %v1672_v1, 4 }
 0x285   : > { %6025 = vmatmul.msk.bf16.gmra.mxu3 %vm2091_vm1, %v7733_v40  ;;  %v3688_v61 = vmax.f32 %v3656_v57, 0.0  ;;  %v4297_v57 = vunpack.c.l.b16 %v1670_v44  ;;  %v1687_v23 = vrot.slane %v1685_v2, 4  ;;  %v1691_v44 = vshll.u32 %v5600_v18, 16  ;;  %v6320_v2 = vld [vmem:[%s6461_s8 + $0x6c] sm:$0xff] }
 0x286   : > { %v3181_v31 = vpop.f32.mrf.mxu0 }
 0x287   : > { %3779 = vrot.lane.b32.xlu0 %v3688_v61, %s6386_s28  ;;  %v3370_v11 = vpop.f32.mrf.mxu2  ;;  %v3274_v22 = vadd.f32 %v3273_v28, %v3181_v31  ;;  %v7763_v37 = vpack.c.b16 %v4297_v57, %v4296_v53  ;;  %v1678_v28 = vor.u32 %v1677_v62, %v1674_v56  ;;  %v1693_v57 = vrot.slane %v1691_v44, 5  ;;  %v5578_v56 = vld [vmem:[%s6461_s8 + $0x84] sm:$0xf] }
 0x288   : > { %v3587_v13 = vpop.f32.mrf.mxu3 }
 0x289   : > { %v3625_v25 = vadd.f32 %v3587_v13, %v3403_v54  ;;  %v3752_v3 = vpop.permute.xlu1 %3751  ;;  %v1683_v54 = vrot.slane %v1681_v0, 5  ;;  %v3404_v35 = vadd.f32 %v3367_v14, %v3274_v22 }
 0x28a   : > { %3835 = vst.msk [vmem:[%s6753_s18 + $0xc8] sm:$0xff] %vm3821_vm9, %v3752_v3  ;;  %v3278_v9 = vpop.f32.mrf.mxu1 }
 0x28b   : > { %v3657_v16 = vadd.f32 %v7758_v32, %v3625_v25  ;;  %v6210_v25 = vld [vmem:[%s6461_s8 + $0x78] sm:$0xff]  ;;  %v1688_v49 = vor.u32 %v1687_v23, %v1683_v54 }
 0x28d   : > { %v3689_v61 = vmax.f32 %v3657_v16, 0.0  ;;  %v1679_v16 = vrot.slane %v1678_v28, 4  ;;  %v1689_v53 = vrot.slane %v1688_v49, 4 }
 0x28e   : > { %v3184_v6 = vpop.f32.mrf.mxu0 }
 0x28f   : > { %3781 = vrot.lane.b32.xlu1 %v3689_v61, %s6386_s28  ;;  %v3372_v13 = vpop.f32.mrf.mxu2  ;;  %v3277_v1 = vadd.f32 %v3276_v17, %v3184_v6  ;;  %v5579_v61 = vld [vmem:[%s6461_s8 + $0x88] sm:$0xf]  ;;  %v1684_v18 = vsel %vm6477_vm4, %v1679_v16, %v1683_v54 }
 0x290   : > { %v3589_v3 = vpop.f32.mrf.mxu3 }
 0x291   : > { %v3626_v31 = vadd.f32 %v3589_v3, %v3404_v35  ;;  %v3760_v58 = vpop.permute.xlu2 %3759  ;;  %5912 = vmatmul.msk.bf16.gmra.mxu0 %vm2091_vm1, %v6683_v12  ;;  %v3405_v22 = vadd.f32 %v3370_v11, %v3277_v1  ;;  %v1696_v35 = vshrl.u32 %v5578_v56, 16  ;;  %v1699_v3 = vshll.u32 %v5578_v56, 16 }
 0x292   : > { %3839 = vst.msk [vmem:[%s6753_s18 + $0x108] sm:$0xff] %vm3821_vm9, %v3760_v58  ;;  %v3962_v14 = vpop.f32.mrf.mxu1  ;;  %v1694_v11 = vsel %vm6477_vm4, %v1689_v53, %v1693_v57  ;;  %v1709_v58 = vshrl.u32 %v5579_v61, 16 }
 0x293   : > { %v3658_v0 = vadd.f32 %v7758_v32, %v3626_v31  ;;  %v1705_v31 = vshll.u32 %v5579_v61, 16  ;;  %v1698_v54 = vrot.slane %v1696_v35, 4  ;;  %v1701_v16 = vrot.slane %v1699_v3, 5 }
 0x294   : > { %6010 = vmatmul.msk.bf16.gmra.mxu2 %vm2091_vm1, %v6210_v25  ;;  %5929 = vmatmul.msk.bf16.gmra.mxu1 %vm2091_vm1, %v6320_v2  ;;  %v4299_v2 = vunpack.c.l.b16 %v1694_v11  ;;  %v1711_v56 = vrot.slane %v1709_v58, 4  ;;  %v1715_v11 = vshll.u32 %v5601_v42, 16  ;;  %v6321_v58 = vld [vmem:[%s6461_s8 + $0x78] sm:$0xff]  ;;  %v5580_v42 = vld [vmem:[%s6461_s8 + $0x90] sm:$0xf] }
 0x295   : > { %6026 = vmatmul.msk.bf16.gmra.mxu3 %vm2091_vm1, %v7763_v37  ;;  %v3690_v17 = vmax.f32 %v3658_v0, 0.0  ;;  %v4298_v0 = vunpack.c.l.b16 %v1684_v18 }
 0x296   : > { %v3186_v62 = vpop.f32.mrf.mxu0 }
 0x297   : > { %3783 = vrot.lane.b32.xlu2 %v3690_v17, %s6386_s28  ;;  %v4168_v23 = vpop.f32.mrf.mxu2  ;;  %v3279_v44 = vadd.f32 %v3278_v9, %v3186_v62  ;;  %v1702_v9 = vor.u32 %v1701_v16, %v1698_v54  ;;  %v5581_v16 = vld [vmem:[%s6461_s8 + $0x94] sm:$0xf] }
 0x298   : > { %v3592_v6 = vpop.f32.mrf.mxu3 }
 0x299   : > { %v3627_v25 = vadd.f32 %v3592_v6, %v3405_v22  ;;  %v3756_v28 = vpop.permute.xlu0 %3755  ;;  %v1707_v22 = vrot.slane %v1705_v31, 5  ;;  %v3406_v53 = vadd.f32 %v3372_v13, %v3279_v44 }
 0x29a   : > { %3837 = vst.msk [vmem:[%s6753_s18 + $0xe8] sm:$0xff] %vm3821_vm9, %v3756_v28  ;;  %v3964_v1 = vpop.f32.mrf.mxu1  ;;  %v7788_v28 = vpack.c.b16 %v4299_v2, %v4298_v0  ;;  %v1717_v2 = vrot.slane %v1715_v11, 5 }
 0x29b   : > { %v3659_v49 = vadd.f32 %v7758_v32, %v3627_v25  ;;  %v6211_v25 = vld [vmem:[%s6461_s8 + $0x84] sm:$0xff]  ;;  %v1712_v3 = vor.u32 %v1711_v56, %v1707_v22 }
 0x29d   : > { %v3691_v17 = vmax.f32 %v3659_v49, 0.0  ;;  %v1703_v49 = vrot.slane %v1702_v9, 4  ;;  %v1713_v0 = vrot.slane %v1712_v3, 4 }
 0x29e   : > { %v3870_v6 = vpop.f32.mrf.mxu0 }
 0x29f   : > { %3785 = vrot.lane.b32.xlu0 %v3691_v17, %s6386_s28  ;;  %v4170_v57 = vpop.f32.mrf.mxu2  ;;  %v3963_v35 = vadd.f32 %v3962_v14, %v3870_v6  ;;  %v1708_v6 = vsel %vm6477_vm4, %v1703_v49, %v1707_v22 }
 0x2a0   : > { %v3594_v61 = vpop.f32.mrf.mxu3 }
 0x2a1   : > { %v3628_v62 = vadd.f32 %v3594_v61, %v3406_v53  ;;  %v3758_v18 = vpop.permute.xlu1 %3757  ;;  %5913 = vmatmul.msk.bf16.gmra.mxu0 %vm2091_vm1, %v6713_v24  ;;  %v4248_v44 = vadd.f32 %v4168_v23, %v3963_v35  ;;  %v1720_v53 = vshrl.u32 %v5580_v42, 16  ;;  %v1723_v61 = vshll.u32 %v5580_v42, 16 }
 0x2a2   : > { %3838 = vst.msk [vmem:[%s6753_s18 + $0x100] sm:$0xff] %vm3821_vm9, %v3758_v18  ;;  %v3967_v13 = vpop.f32.mrf.mxu1  ;;  %v1718_v23 = vsel %vm6477_vm4, %v1713_v0, %v1717_v2  ;;  %v1733_v18 = vshrl.u32 %v5581_v16, 16  ;;  %v5602_v0 = vld [vmem:[%s6461_s8 + $0x98] sm:$0x1] }
 0x2a3   : > { %v3660_v31 = vadd.f32 %v7758_v32, %v3628_v62  ;;  %v1729_v62 = vshll.u32 %v5581_v16, 16  ;;  %v4301_v22 = vunpack.c.l.b16 %v1718_v23  ;;  %v1725_v49 = vrot.slane %v1723_v61, 5 }
 0x2a4   : > { %6011 = vmatmul.msk.bf16.gmra.mxu2 %vm2091_vm1, %v6211_v25  ;;  %5930 = vmatmul.msk.bf16.gmra.mxu1 %vm2091_vm1, %v6321_v58  ;;  %v1722_v58 = vrot.slane %v1720_v53, 4  ;;  %v1735_v42 = vrot.slane %v1733_v18, 4  ;;  %v1739_v23 = vshll.u32 %v5602_v0, 16  ;;  %v6322_v18 = vld [vmem:[%s6461_s8 + $0x84] sm:$0xff] }
 0x2a5   : > { %6027 = vmatmul.msk.bf16.gmra.mxu3 %vm2091_vm1, %v7788_v28  ;;  %v3692_v14 = vmax.f32 %v3660_v31, 0.0  ;;  %v4300_v31 = vunpack.c.l.b16 %v1708_v6 }
 0x2a6   : > { %v3872_v54 = vpop.f32.mrf.mxu0 }
 0x2a7   : > { %3787 = vrot.lane.b32.xlu1 %v3692_v14, %s6386_s28  ;;  %v4173_v17 = vpop.f32.mrf.mxu2  ;;  %v3965_v11 = vadd.f32 %v3964_v1, %v3872_v54  ;;  %v7814_v15 = vpack.c.b16 %v4301_v22, %v4300_v31  ;;  %v1726_v1 = vor.u32 %v1725_v49, %v1722_v58  ;;  %v1741_v22 = vrot.slane %v1739_v23, 5  ;;  %v5582_v58 = vld [vmem:[%s6461_s8 + $0x9c] sm:$0xf] }
 0x2a8   : > { %v4390_v56 = vpop.f32.mrf.mxu3 }
 0x2a9   : > { %v4470_v25 = vadd.f32 %v4390_v56, %v4248_v44  ;;  %v3766_v9 = vpop.permute.xlu2 %3765  ;;  %v1731_v44 = vrot.slane %v1729_v62, 5  ;;  %v4249_v2 = vadd.f32 %v4170_v57, %v3965_v11 }
 0x2aa   : > { %3842 = vst.msk [vmem:[%s6753_s18 + $0x140] sm:$0xff] %vm3821_vm9, %v3766_v9  ;;  %v3969_v35 = vpop.f32.mrf.mxu1 }
 0x2ab   : > { %v4502_v3 = vadd.f32 %v7758_v32, %v4470_v25  ;;  %v6212_v25 = vld [vmem:[%s6461_s8 + $0x90] sm:$0xff]  ;;  %v1736_v61 = vor.u32 %v1735_v42, %v1731_v44 }
 0x2ad   : > { %v4534_v14 = vmax.f32 %v4502_v3, 0.0  ;;  %v1727_v3 = vrot.slane %v1726_v1, 4  ;;  %v1737_v31 = vrot.slane %v1736_v61, 4 }
 0x2ae   : > { %v3875_v56 = vpop.f32.mrf.mxu0 }
 0x2af   : > { %6035 = vst.msk [vmem:[%s6753_s18 + $0x10] sm:$0xff] %vm2964_vm5, %v4534_v14  ;;  %v4175_v16 = vpop.f32.mrf.mxu2  ;;  %v3968_v53 = vadd.f32 %v3967_v13, %v3875_v56  ;;  %v5583_v14 = vld [vmem:[%s6461_s8 + $0xa0] sm:$0xf]  ;;  %v1732_v0 = vsel %vm6477_vm4, %v1727_v3, %v1731_v44 }
 0x2b0   : > { %v4392_v9 = vpop.f32.mrf.mxu3 }
 0x2b1   : > { %v4471_v54 = vadd.f32 %v4392_v9, %v4249_v2  ;;  %v3762_v6 = vpop.permute.xlu0 %3761  ;;  %5914 = vmatmul.msk.bf16.gmra.mxu0 %vm2091_vm1, %v6764_v41  ;;  %v4250_v11 = vadd.f32 %v4173_v17, %v3968_v53  ;;  %v1744_v2 = vshrl.u32 %v5582_v58, 16  ;;  %v1747_v9 = vshll.u32 %v5582_v58, 16 }
 0x2b2   : > { %3840 = vst.msk [vmem:[%s6753_s18 + $0x120] sm:$0xff] %vm3821_vm9, %v3762_v6  ;;  %v3972_v57 = vpop.f32.mrf.mxu1  ;;  %v1742_v17 = vsel %vm6477_vm4, %v1737_v31, %v1741_v22  ;;  %v1757_v6 = vshrl.u32 %v5583_v14, 16  ;;  %v5603_v31 = vld [vmem:[%s6461_s8 + $0xa4] sm:$0x1] }
 0x2b3   : > { %v4503_v62 = vadd.f32 %v7758_v32, %v4471_v54  ;;  %v1753_v54 = vshll.u32 %v5583_v14, 16  ;;  %v4303_v44 = vunpack.c.l.b16 %v1742_v17  ;;  %v1749_v3 = vrot.slane %v1747_v9, 5 }
 0x2b4   : > { %6012 = vmatmul.msk.bf16.gmra.mxu2 %vm2091_vm1, %v6212_v25  ;;  %5931 = vmatmul.msk.bf16.gmra.mxu1 %vm2091_vm1, %v6322_v18  ;;  %v1746_v18 = vrot.slane %v1744_v2, 4  ;;  %v1759_v58 = vrot.slane %v1757_v6, 4  ;;  %v1763_v17 = vshll.u32 %v5603_v31, 16  ;;  %v6323_v6 = vld [vmem:[%s6461_s8 + $0x90] sm:$0xff] }
 0x2b5   : > { %v4535_v13 = vmax.f32 %v4503_v62, 0.0  ;;  %6028 = vmatmul.msk.bf16.gmra.mxu3 %vm2091_vm1, %v7814_v15  ;;  %v4302_v62 = vunpack.c.l.b16 %v1732_v0 }
 0x2b6   : > { %v3877_v49 = vpop.f32.mrf.mxu0 }
 0x2b7   : > { %6036 = vst.msk [vmem:[%s6753_s18 + $0x18] sm:$0xff] %vm2964_vm5, %v4535_v13  ;;  %v4178_v42 = vpop.f32.mrf.mxu2  ;;  %v3970_v23 = vadd.f32 %v3969_v35, %v3877_v49  ;;  %v7841_v41 = vpack.c.b16 %v4303_v44, %v4302_v62  ;;  %v1750_v35 = vor.u32 %v1749_v3, %v1746_v18  ;;  %v1765_v44 = vrot.slane %v1763_v17, 5  ;;  %v5584_v18 = vld [vmem:[%s6461_s8 + $0xa8] sm:$0xf] }
 0x2b8   : > { %v4395_v56 = vpop.f32.mrf.mxu3 }
 0x2b9   : > { %v4472_v25 = vadd.f32 %v4395_v56, %v4250_v11  ;;  %v3764_v1 = vpop.permute.xlu1 %3763  ;;  %v1755_v11 = vrot.slane %v1753_v54, 5  ;;  %v4251_v22 = vadd.f32 %v4175_v16, %v3970_v23 }
 0x2ba   : > { %3841 = vst.msk [vmem:[%s6753_s18 + $0x128] sm:$0xff] %vm3821_vm9, %v3764_v1  ;;  %v3974_v53 = vpop.f32.mrf.mxu1 }
 0x2bb   : > { %v4504_v61 = vadd.f32 %v7758_v32, %v4472_v25  ;;  %v6213_v25 = vld [vmem:[%s6461_s8 + $0x9c] sm:$0xff]  ;;  %v1760_v9 = vor.u32 %v1759_v58, %v1755_v11 }
 0x2bd   : > { %v4536_v13 = vmax.f32 %v4504_v61, 0.0  ;;  %v1751_v61 = vrot.slane %v1750_v35, 4  ;;  %v1761_v62 = vrot.slane %v1760_v9, 4 }
 0x2be   : > { %v3880_v56 = vpop.f32.mrf.mxu0 }
 0x2bf   : > { %6037 = vst.msk [vmem:[%s6753_s18 + $0x30] sm:$0xff] %vm2964_vm5, %v4536_v13  ;;  %v4180_v14 = vpop.f32.mrf.mxu2  ;;  %v3973_v2 = vadd.f32 %v3972_v57, %v3880_v56  ;;  %v5585_v13 = vld [vmem:[%s6461_s8 + $0xac] sm:$0xf]  ;;  %v1756_v31 = vsel %vm6477_vm4, %v1751_v61, %v1755_v11 }
 0x2c0   : > { %v4397_v1 = vpop.f32.mrf.mxu3 }
 0x2c1   : > { %v4473_v49 = vadd.f32 %v4397_v1, %v4251_v22  ;;  %v3772_v0 = vpop.permute.xlu2 %3771  ;;  %5915 = vmatmul.msk.bf16.gmra.mxu0 %vm2091_vm1, %v6824_v36  ;;  %v4252_v23 = vadd.f32 %v4178_v42, %v3973_v2  ;;  %v1768_v22 = vshrl.u32 %v5584_v18, 16  ;;  %v1771_v1 = vshll.u32 %v5584_v18, 16 }
 0x2c2   : > { %3845 = vst.msk [vmem:[%s6753_s18 + $0x168] sm:$0xff] %vm3821_vm9, %v3772_v0  ;;  %v3977_v16 = vpop.f32.mrf.mxu1  ;;  %v1766_v42 = vsel %vm6477_vm4, %v1761_v62, %v1765_v44  ;;  %v1781_v0 = vshrl.u32 %v5585_v13, 16  ;;  %v5604_v62 = vld [vmem:[%s6461_s8 + $0xb0] sm:$0x1] }
 0x2c3   : > { %v4505_v54 = vadd.f32 %v7758_v32, %v4473_v49  ;;  %v1777_v49 = vshll.u32 %v5585_v13, 16  ;;  %v4305_v11 = vunpack.c.l.b16 %v1766_v42  ;;  %v1773_v61 = vrot.slane %v1771_v1, 5 }
 0x2c4   : > { %6013 = vmatmul.msk.bf16.gmra.mxu2 %vm2091_vm1, %v6213_v25  ;;  %5932 = vmatmul.msk.bf16.gmra.mxu1 %vm2091_vm1, %v6323_v6  ;;  %v1770_v6 = vrot.slane %v1768_v22, 4  ;;  %v1783_v18 = vrot.slane %v1781_v0, 4  ;;  %v1787_v42 = vshll.u32 %v5604_v62, 16  ;;  %v6324_v0 = vld [vmem:[%s6461_s8 + $0x9c] sm:$0xff] }
 0x2c5   : > { %v4537_v57 = vmax.f32 %v4505_v54, 0.0  ;;  %6029 = vmatmul.msk.bf16.gmra.mxu3 %vm2091_vm1, %v7841_v41  ;;  %v4304_v54 = vunpack.c.l.b16 %v1756_v31 }
 0x2c6   : > { %v3882_v3 = vpop.f32.mrf.mxu0 }
 0x2c7   : > { %6038 = vst.msk [vmem:[%s6753_s18 + $0x38] sm:$0xff] %vm2964_vm5, %v4537_v57  ;;  %v4183_v58 = vpop.f32.mrf.mxu2  ;;  %v3975_v17 = vadd.f32 %v3974_v53, %v3882_v3  ;;  %v7868_v36 = vpack.c.b16 %v4305_v11, %v4304_v54  ;;  %v1774_v53 = vor.u32 %v1773_v61, %v1770_v6  ;;  %v1789_v11 = vrot.slane %v1787_v42, 5  ;;  %v5586_v6 = vld [vmem:[%s6461_s8 + $0xb4] sm:$0xf] }
 0x2c8   : > { %v4400_v56 = vpop.f32.mrf.mxu3 }
 0x2c9   : > { %v4474_v25 = vadd.f32 %v4400_v56, %v4252_v23  ;;  %v3768_v35 = vpop.permute.xlu0 %3767  ;;  %v1779_v23 = vrot.slane %v1777_v49, 5  ;;  %v4253_v44 = vadd.f32 %v4180_v14, %v3975_v17 }
 0x2ca   : > { %3843 = vst.msk [vmem:[%s6753_s18 + $0x148] sm:$0xff] %vm3821_vm9, %v3768_v35  ;;  %v3979_v2 = vpop.f32.mrf.mxu1 }
 0x2cb   : > { %v4506_v9 = vadd.f32 %v7758_v32, %v4474_v25  ;;  %v6214_v25 = vld [vmem:[%s6461_s8 + $0xa8] sm:$0xff]  ;;  %v1784_v1 = vor.u32 %v1783_v18, %v1779_v23 }
 0x2cd   : > { %v4538_v57 = vmax.f32 %v4506_v9, 0.0  ;;  %v1775_v9 = vrot.slane %v1774_v53, 4  ;;  %v1785_v54 = vrot.slane %v1784_v1, 4 }
 0x2ce   : > { %v3885_v56 = vpop.f32.mrf.mxu0 }
 0x2cf   : > { %6039 = vst.msk [vmem:[%s6753_s18 + $0x50] sm:$0xff] %vm2964_vm5, %v4538_v57  ;;  %v4185_v13 = vpop.f32.mrf.mxu2  ;;  %v3978_v22 = vadd.f32 %v3977_v16, %v3885_v56  ;;  %v5587_v57 = vld [vmem:[%s6461_s8 + $0xb8] sm:$0xf]  ;;  %v1780_v62 = vsel %vm6477_vm4, %v1775_v9, %v1779_v23 }
 0x2d0   : > { %v4402_v35 = vpop.f32.mrf.mxu3 }
 0x2d1   : > { %v4475_v3 = vadd.f32 %v4402_v35, %v4253_v44  ;;  %v3770_v31 = vpop.permute.xlu1 %3769  ;;  %5916 = vmatmul.msk.bf16.gmra.mxu0 %vm2091_vm1, %v6872_v19  ;;  %v4254_v17 = vadd.f32 %v4183_v58, %v3978_v22  ;;  %v1792_v44 = vshrl.u32 %v5586_v6, 16  ;;  %v1795_v35 = vshll.u32 %v5586_v6, 16 }
 0x2d2   : > { %3844 = vst.msk [vmem:[%s6753_s18 + $0x160] sm:$0xff] %vm3821_vm9, %v3770_v31  ;;  %v3982_v14 = vpop.f32.mrf.mxu1  ;;  %v1790_v58 = vsel %vm6477_vm4, %v1785_v54, %v1789_v11  ;;  %v1805_v31 = vshrl.u32 %v5587_v57, 16  ;;  %v5605_v54 = vld [vmem:[%s6461_s8 + $0xbc] sm:$0x1] }
 0x2d3   : > { %v4507_v49 = vadd.f32 %v7758_v32, %v4475_v3  ;;  %v1801_v3 = vshll.u32 %v5587_v57, 16  ;;  %v4307_v23 = vunpack.c.l.b16 %v1790_v58  ;;  %v1797_v9 = vrot.slane %v1795_v35, 5 }
 0x2d4   : > { %6014 = vmatmul.msk.bf16.gmra.mxu2 %vm2091_vm1, %v6214_v25  ;;  %5933 = vmatmul.msk.bf16.gmra.mxu1 %vm2091_vm1, %v6324_v0  ;;  %v1794_v0 = vrot.slane %v1792_v44, 4  ;;  %v1807_v6 = vrot.slane %v1805_v31, 4  ;;  %v1811_v58 = vshll.u32 %v5605_v54, 16  ;;  %v6325_v31 = vld [vmem:[%s6461_s8 + $0xa8] sm:$0xff] }
 0x2d5   : > { %v4539_v16 = vmax.f32 %v4507_v49, 0.0  ;;  %6030 = vmatmul.msk.bf16.gmra.mxu3 %vm2091_vm1, %v7868_v36  ;;  %v4306_v49 = vunpack.c.l.b16 %v1780_v62 }
 0x2d6   : > { %v3887_v61 = vpop.f32.mrf.mxu0 }
 0x2d7   : > { %6040 = vst.msk [vmem:[%s6753_s18 + $0x58] sm:$0xff] %vm2964_vm5, %v4539_v16  ;;  %v4188_v18 = vpop.f32.mrf.mxu2  ;;  %v3980_v42 = vadd.f32 %v3979_v2, %v3887_v61  ;;  %v7895_v19 = vpack.c.b16 %v4307_v23, %v4306_v49  ;;  %v1798_v2 = vor.u32 %v1797_v9, %v1794_v0  ;;  %v1813_v23 = vrot.slane %v1811_v58, 5  ;;  %v5588_v0 = vld [vmem:[%s6461_s8 + $0xc0] sm:$0xf] }
 0x2d8   : > { %v4405_v56 = vpop.f32.mrf.mxu3 }
 0x2d9   : > { %v4476_v25 = vadd.f32 %v4405_v56, %v4254_v17  ;;  %v3778_v53 = vpop.permute.xlu2 %3777  ;;  %v1803_v17 = vrot.slane %v1801_v3, 5  ;;  %v4255_v11 = vadd.f32 %v4185_v13, %v3980_v42 }
 0x2da   : > { %3848 = vst.msk [vmem:[%s6753_s18 + $0x1a0] sm:$0xff] %vm3821_vm9, %v3778_v53  ;;  %v3984_v22 = vpop.f32.mrf.mxu1 }
 0x2db   : > { %v4508_v1 = vadd.f32 %v7758_v32, %v4476_v25  ;;  %v6215_v25 = vld [vmem:[%s6461_s8 + $0xb4] sm:$0xff]  ;;  %v1808_v35 = vor.u32 %v1807_v6, %v1803_v17 }
 0x2dd   : > { %v4540_v16 = vmax.f32 %v4508_v1, 0.0  ;;  %v1799_v1 = vrot.slane %v1798_v2, 4  ;;  %v1809_v49 = vrot.slane %v1808_v35, 4 }
 0x2de   : > { %v3890_v56 = vpop.f32.mrf.mxu0 }
 0x2df   : > { %6041 = vst.msk [vmem:[%s6753_s18 + $0x70] sm:$0xff] %vm2964_vm5, %v4540_v16  ;;  %v4190_v57 = vpop.f32.mrf.mxu2  ;;  %v3983_v44 = vadd.f32 %v3982_v14, %v3890_v56  ;;  %v5589_v16 = vld [vmem:[%s6461_s8 + $0xc4] sm:$0xf]  ;;  %v1804_v54 = vsel %vm6477_vm4, %v1799_v1, %v1803_v17 }
 0x2e0   : > { %v4407_v53 = vpop.f32.mrf.mxu3 }
 0x2e1   : > { %v4477_v61 = vadd.f32 %v4407_v53, %v4255_v11  ;;  %v3774_v62 = vpop.permute.xlu0 %3773  ;;  %5917 = vmatmul.msk.bf16.gmra.mxu0 %vm2091_vm1, %v6918_v52  ;;  %v4256_v42 = vadd.f32 %v4188_v18, %v3983_v44  ;;  %v1816_v11 = vshrl.u32 %v5588_v0, 16  ;;  %v1819_v53 = vshll.u32 %v5588_v0, 16 }
 0x2e2   : > { %3846 = vst.msk [vmem:[%s6753_s18 + $0x180] sm:$0xff] %vm3821_vm9, %v3774_v62  ;;  %v3987_v13 = vpop.f32.mrf.mxu1  ;;  %v1814_v18 = vsel %vm6477_vm4, %v1809_v49, %v1813_v23  ;;  %v1829_v62 = vshrl.u32 %v5589_v16, 16  ;;  %v5606_v49 = vld [vmem:[%s6461_s8 + $0xc8] sm:$0x1] }
 0x2e3   : > { %v4509_v3 = vadd.f32 %v7758_v32, %v4477_v61  ;;  %v1825_v61 = vshll.u32 %v5589_v16, 16  ;;  %v4309_v17 = vunpack.c.l.b16 %v1814_v18  ;;  %v1821_v1 = vrot.slane %v1819_v53, 5 }
 0x2e4   : > { %6015 = vmatmul.msk.bf16.gmra.mxu2 %vm2091_vm1, %v6215_v25  ;;  %5934 = vmatmul.msk.bf16.gmra.mxu1 %vm2091_vm1, %v6325_v31  ;;  %v1818_v31 = vrot.slane %v1816_v11, 4  ;;  %v1831_v0 = vrot.slane %v1829_v62, 4  ;;  %v1835_v18 = vshll.u32 %v5606_v49, 16  ;;  %v6326_v62 = vld [vmem:[%s6461_s8 + $0xb4] sm:$0xff] }
 0x2e5   : > { %v4541_v14 = vmax.f32 %v4509_v3, 0.0  ;;  %6031 = vmatmul.msk.bf16.gmra.mxu3 %vm2091_vm1, %v7895_v19  ;;  %v4308_v3 = vunpack.c.l.b16 %v1804_v54 }
 0x2e6   : > { %v3892_v9 = vpop.f32.mrf.mxu0 }
 0x2e7   : > { %6042 = vst.msk [vmem:[%s6753_s18 + $0x78] sm:$0xff] %vm2964_vm5, %v4541_v14  ;;  %v4193_v6 = vpop.f32.mrf.mxu2  ;;  %v3985_v58 = vadd.f32 %v3984_v22, %v3892_v9  ;;  %v7922_v52 = vpack.c.b16 %v4309_v17, %v4308_v3  ;;  %v1822_v22 = vor.u32 %v1821_v1, %v1818_v31  ;;  %v1837_v17 = vrot.slane %v1835_v18, 5 }
 0x2e8   : > { %v4410_v56 = vpop.f32.mrf.mxu3 }
 0x2e9   : > { %v4478_v25 = vadd.f32 %v4410_v56, %v4256_v42  ;;  %v3776_v2 = vpop.permute.xlu1 %3775  ;;  %v1827_v42 = vrot.slane %v1825_v61, 5  ;;  %v4257_v23 = vadd.f32 %v4190_v57, %v3985_v58  ;;  %8450 = vst [vmem:[#allocation15_spill] sm:$0xff] %v7922_v52 }
 0x2ea   : > { %3847 = vst.msk [vmem:[%s6753_s18 + $0x188] sm:$0xff] %vm3821_vm9, %v3776_v2  ;;  %v3989_v44 = vpop.f32.mrf.mxu1 }
 0x2eb   : > { %v4510_v35 = vadd.f32 %v7758_v32, %v4478_v25  ;;  %v6216_v25 = vld [vmem:[%s6461_s8 + $0xc0] sm:$0xff]  ;;  %v1832_v53 = vor.u32 %v1831_v0, %v1827_v42  ;;  %v5591_v0 = vld [vmem:[%s6461_s8 + $0xd0] sm:$0xf] }
 0x2ed   : > { %v4542_v14 = vmax.f32 %v4510_v35, 0.0  ;;  %v1823_v35 = vrot.slane %v1822_v22, 4  ;;  %v1833_v3 = vrot.slane %v1832_v53, 4 }
 0x2ee   : > { %v3895_v56 = vpop.f32.mrf.mxu0 }
 0x2ef   : > { %6043 = vst.msk [vmem:[%s6753_s18 + $0x90] sm:$0xff] %vm2964_vm5, %v4542_v14  ;;  %v4195_v16 = vpop.f32.mrf.mxu2  ;;  %v3988_v11 = vadd.f32 %v3987_v13, %v3895_v56  ;;  %v5590_v14 = vld [vmem:[%s6461_s8 + $0xcc] sm:$0xf] }
 0x2f0   : > { %v4412_v2 = vpop.f32.mrf.mxu3  ;;  %v1840_v22 = vshrl.u32 %v5590_v14, 16 }
 0x2f1   : > { %v4479_v9 = vadd.f32 %v4412_v2, %v4257_v23  ;;  %v3784_v54 = vpop.permute.xlu2 %3783  ;;  %5918 = vmatmul.msk.bf16.gmra.mxu0 %vm2091_vm1, %v8445_v59  ;;  %v4258_v58 = vadd.f32 %v4193_v6, %v3988_v11  ;;  %v1828_v2 = vsel %vm6477_vm4, %v1823_v35, %v1827_v42  ;;  %v1853_v11 = vshrl.u32 %v5591_v0, 16  ;;  %v6217_v59 = vld [vmem:[%s6461_s8 + $0xcc] sm:$0xff] }
 0x2f2   : > { %3851 = vst.msk [vmem:[%s6753_s18 + $0x1c8] sm:$0xff] %vm3821_vm9, %v3784_v54  ;;  %v3992_v57 = vpop.f32.mrf.mxu1  ;;  %v1849_v54 = vshll.u32 %v5591_v0, 16  ;;  %v1842_v35 = vrot.slane %v1840_v22, 4 }
 0x2f3   : > { %v4511_v61 = vadd.f32 %v7758_v32, %v4479_v9  ;;  %v1843_v9 = vshll.u32 %v5590_v14, 16 }
 0x2f4   : > { %6016 = vmatmul.msk.bf16.gmra.mxu2 %vm2091_vm1, %v6216_v25  ;;  %5935 = vmatmul.msk.bf16.gmra.mxu1 %vm2091_vm1, %v6326_v62  ;;  %v1838_v25 = vsel %vm6477_vm4, %v1833_v3, %v1837_v17  ;;  %v4310_v62 = vunpack.c.l.b16 %v1828_v2  ;;  %v1851_v3 = vrot.slane %v1849_v54, 5  ;;  %v1855_v17 = vrot.slane %v1853_v11, 4  ;;  %v6327_v54 = vld [vmem:[%s6461_s8 + $0xc0] sm:$0xff] }
 0x2f5   : > { %v4543_v13 = vmax.f32 %v4511_v61, 0.0  ;;  %6032 = vmatmul.msk.bf16.gmra.mxu3 %vm2091_vm1, %v7922_v52 }
 0x2f6   : > { %v3897_v31 = vpop.f32.mrf.mxu0  ;;  %v1856_v22 = vor.u32 %v1855_v17, %v1851_v3 }
 0x2f7   : > { %6044 = vst.msk [vmem:[%s6753_s18 + $0x98] sm:$0xff] %vm2964_vm5, %v4543_v13  ;;  %v4198_v1 = vpop.f32.mrf.mxu2  ;;  %v3990_v18 = vadd.f32 %v3989_v44, %v3897_v31  ;;  %v4311_v13 = vunpack.c.l.b16 %v1838_v25 }
 0x2f8   : > { %v4415_v56 = vpop.f32.mrf.mxu3 }
 0x2f9   : > { %v4480_v49 = vadd.f32 %v4415_v56, %v4258_v58  ;;  %v3780_v23 = vpop.permute.xlu0 %3779  ;;  %v1845_v58 = vrot.slane %v1843_v9, 5  ;;  %v4259_v56 = vadd.f32 %v4195_v16, %v3990_v18  ;;  %v7952_v31 = vpack.c.b16 %v4311_v13, %v4310_v62 }
 0x2fa   : > { %3849 = vst.msk [vmem:[%s6753_s18 + $0x1a8] sm:$0xff] %vm3821_vm9, %v3780_v23  ;;  %v3994_v6 = vpop.f32.mrf.mxu1  ;;  %v5607_v23 = vld [vmem:[%s6461_s8 + $0xd4] sm:$0x1] }
 0x2fb   : > { %v4512_v53 = vadd.f32 %v7758_v32, %v4480_v49  ;;  %v1846_v25 = vor.u32 %v1845_v58, %v1842_v35  ;;  %v1859_v16 = vshll.u32 %v5607_v23, 16 }
 0x2fd   : > { %v4544_v61 = vmax.f32 %v4512_v53, 0.0  ;;  %v1847_v18 = vrot.slane %v1846_v25, 4  ;;  %v1861_v62 = vrot.slane %v1859_v16, 5 }
 0x2fe   : > { %v3900_v42 = vpop.f32.mrf.mxu0 }
 0x2ff   : > { %6045 = vst.msk [vmem:[%s6753_s18 + $0xb0] sm:$0xff] %vm2964_vm5, %v4544_v61  ;;  %v4200_v14 = vpop.f32.mrf.mxu2  ;;  %v3993_v44 = vadd.f32 %v3992_v57, %v3900_v42  ;;  %v1857_v61 = vrot.slane %v1856_v22, 4 }
 0x300   : > { %v4417_v0 = vpop.f32.mrf.mxu3 }
 0x301   : > { %v4481_v52 = vadd.f32 %v4417_v0, %v4259_v56  ;;  %v3782_v49 = vpop.permute.xlu1 %3781  ;;  %5919 = vmatmul.msk.bf16.gmra.mxu0 %vm2091_vm1, %v7017_v55  ;;  %v4260_v11 = vadd.f32 %v4198_v1, %v3993_v44  ;;  %v1862_v58 = vsel %vm6477_vm4, %v1857_v61, %v1861_v62 }
 0x302   : > { %3850 = vst.msk [vmem:[%s6753_s18 + $0x1c0] sm:$0xff] %vm3821_vm9, %v3782_v49  ;;  %v3997_v2 = vpop.f32.mrf.mxu1  ;;  %v4313_v0 = vunpack.c.l.b16 %v1862_v58 }
 0x303   : > { %v4513_v9 = vadd.f32 %v7758_v32, %v4481_v52 }
 0x304   : > { %6017 = vmatmul.msk.bf16.gmra.mxu2 %vm2091_vm1, %v6217_v59  ;;  %5936 = vmatmul.msk.bf16.gmra.mxu1 %vm2091_vm1, %v6327_v54  ;;  %v1852_v59 = vsel %vm6477_vm4, %v1847_v18, %v1851_v3  ;;  %v6328_v54 = vld [vmem:[%s6461_s8 + $0x1c] sm:$0xf] }
 0x305   : > { %v4545_v57 = vmax.f32 %v4513_v9, 0.0  ;;  %6033 = vmatmul.msk.bf16.gmra.mxu3 %vm2091_vm1, %v7952_v31  ;;  %v4312_v23 = vunpack.c.l.b16 %v1852_v59 }
 0x306   : > { %v3902_v53 = vpop.f32.mrf.mxu0 }
 0x307   : > { %6046 = vst.msk [vmem:[%s6753_s18 + $0xb8] sm:$0xff] %vm2964_vm5, %v4545_v57  ;;  %v4203_v13 = vpop.f32.mrf.mxu2  ;;  %v3995_v17 = vadd.f32 %v3994_v6, %v3902_v53  ;;  %v7973_v38 = vpack.c.b16 %v4313_v0, %v4312_v23  ;;  %v1929_v57 = vrot.slane %v6328_v54, 5 }
 0x308   : > { %v4420_v42 = vpop.f32.mrf.mxu3 }
 0x309   : > { %v4482_v52 = vadd.f32 %v4420_v42, %v4260_v11  ;;  %v4261_v44 = vadd.f32 %v4200_v14, %v3995_v17  ;;  %v5608_v14 = vld [vmem:[%s6461_s8 + $0x18] sm:$0xe]  ;;  %v1931_v62 = vrot.slane %v1929_v57, 4  ;;  %v6329_v42 = vld [vmem:[%s6461_s8 + $0x20] sm:$0x1] }
 0x30a   : > { %v3999_v35 = vpop.f32.mrf.mxu1  ;;  %v5624_v61 = vrot.slane %v5608_v14, 9 }
 0x30b   : > { %v4514_v1 = vadd.f32 %v7758_v32, %v4482_v52  ;;  %v1932_v52 = vrot.slane %v6329_v42, 5  ;;  %v6331_v42 = vld [vmem:[%s6461_s8 + $0x2c] sm:$0x1] }
 0x30c   : > { %v1930_v17 = vsel %vm7019_vm8, %v5624_v61, %v1929_v57 }
 0x30d   : > { %v4546_v56 = vmax.f32 %v4514_v1, 0.0 }
 0x30e   : > { %v3905_v49 = vpop.f32.mrf.mxu0 }
 0x30f   : > { %6047 = vst.msk [vmem:[%s6753_s18 + $0xd0] sm:$0xff] %vm2964_vm5, %v4546_v56  ;;  %v4205_v25 = vpop.f32.mrf.mxu2  ;;  %v3998_v9 = vadd.f32 %v3997_v2, %v3905_v49  ;;  %v4915_v49 = vunpack.c.l.b16 %v1930_v17 }
 0x310   : > { %v4422_v22 = vpop.f32.mrf.mxu3 }
 0x311   : > { %v4483_v16 = vadd.f32 %v4422_v22, %v4261_v44  ;;  %v3786_v3 = vpop.permute.xlu0 %3785  ;;  %5920 = vmatmul.msk.bf16.gmra.mxu0 %vm2091_vm1, %v7079_v8  ;;  %v4262_v53 = vadd.f32 %v4203_v13, %v3998_v9  ;;  %v1933_v13 = vsel %vm7019_vm8, %v1931_v62, %v1932_v52  ;;  %v1939_v52 = vrot.slane %v6331_v42, 5 }
 0x312   : > { %3852 = vst.msk [vmem:[%s6753_s18 + $0x1e0] sm:$0xff] %vm3821_vm9, %v3786_v3  ;;  %v4002_v6 = vpop.f32.mrf.mxu1  ;;  %v4916_v44 = vunpack.c.l.b16 %v1933_v13 }
 0x313   : > { %v4515_v11 = vadd.f32 %v7758_v32, %v4483_v16 }
 0x314   : > { %6102 = vmatmul.msk.bf16.vlgmr.msrb.gmra.mxu2 %vm2091_vm1, %v7581_v47  ;;  %6085 = vmatmul.msk.bf16.vlgmr.msrb.gmra.mxu1 %vm2091_vm1, %v6503_v27  ;;  %v4947_v57 = vpack.c.b16 %v4916_v44, %v4915_v49 }
 0x315   : > { %v4547_v2 = vmax.f32 %v4515_v11, 0.0  ;;  %6034 = vmatmul.msk.bf16.gmra.mxu3 %vm2091_vm1, %v7973_v38 }
 0x316   : > { %v3907_v18 = vpop.f32.mrf.mxu0 }
 0x317   : > { %6048 = vst.msk [vmem:[%s6753_s18 + $0xd8] sm:$0xff] %vm2964_vm5, %v4547_v2  ;;  %v4208_v59 = vpop.f32.mrf.mxu2  ;;  %v4000_v23 = vadd.f32 %v3999_v35, %v3907_v18  ;;  %v6330_v35 = vld [vmem:[%s6461_s8 + $0x28] sm:$0xf]  ;;  %v5609_v18 = vld [vmem:[%s6461_s8 + $0x24] sm:$0xe] }
 0x318   : > { %v4425_v58 = vpop.f32.mrf.mxu3  ;;  %v1936_v2 = vrot.slane %v6330_v35, 5 }
 0x319   : > { %v4484_v1 = vadd.f32 %v4425_v58, %v4262_v53  ;;  %v3788_v47 = vpop.permute.xlu1 %3787  ;;  %v4263_v16 = vadd.f32 %v4205_v25, %v4000_v23 }
 0x31a   : > { %3853 = vst.msk [vmem:[%s6753_s18 + $0x1e8] sm:$0xff] %vm3821_vm9, %v3788_v47  ;;  %v4004_v27 = vpop.f32.mrf.mxu1  ;;  %v1938_v62 = vrot.slane %v1936_v2, 4 }
 0x31b   : > { %v4516_v56 = vadd.f32 %v7758_v32, %v4484_v1 }
 0x31d   : > { %v4548_v0 = vmax.f32 %v4516_v56, 0.0 }
 0x31e   : > { %v3910_v22 = vpop.f32.mrf.mxu0 }
 0x31f   : > { %6049 = vst.msk [vmem:[%s6753_s18 + $0xf0] sm:$0xff] %vm2964_vm5, %v4548_v0  ;;  %v4210_v3 = vpop.f32.mrf.mxu2  ;;  %v4003_v11 = vadd.f32 %v4002_v6, %v3910_v22 }
 0x320   : > { %v4427_v9 = vpop.f32.mrf.mxu3 }
 0x321   : > { %v4485_v54 = vadd.f32 %v4427_v9, %v4263_v16  ;;  %6069 = vmatmul.msk.bf16.vlgmr.msrb.gmra.mxu0 %vm2091_vm1, %v7104_v5  ;;  %v4264_v6 = vadd.f32 %v4208_v59, %v4003_v11  ;;  %v5625_v5 = vrot.slane %v5609_v18, 9 }
 0x322   : > { %v4007_v14 = vpop.f32.mrf.mxu1 }
 0x323   : > { %v4517_v53 = vadd.f32 %v7758_v32, %v4485_v54 }
 0x324   : > { %6103 = vmatmul.msk.bf16.gmra.mxu2 %vm2091_vm1, %v7608_v34  ;;  %6086 = vmatmul.msk.bf16.gmra.mxu1 %vm2091_vm1, %v6527_v10  ;;  %v1937_v34 = vsel %vm7019_vm8, %v5625_v5, %v1936_v2  ;;  %v1940_v10 = vsel %vm7019_vm8, %v1938_v62, %v1939_v52 }
 0x325   : > { %v4549_v25 = vmax.f32 %v4517_v53, 0.0  ;;  %6119 = vmatmul.msk.bf16.vlgmr.msrb.gmra.mxu3 %vm2091_vm1, %v4947_v57  ;;  %v4917_v23 = vunpack.c.l.b16 %v1937_v34  ;;  %v4918_v0 = vunpack.c.l.b16 %v1940_v10  ;;  %v5610_v53 = vld [vmem:[%s6461_s8 + $0x30] sm:$0xe] }
 0x326   : > { %v3912_v61 = vpop.f32.mrf.mxu0 }
 0x327   : > { %6050 = vst.msk [vmem:[%s6753_s18 + $0xf8] sm:$0xff] %vm2964_vm5, %v4549_v25  ;;  %v4213_v58 = vpop.f32.mrf.mxu2  ;;  %v4005_v13 = vadd.f32 %v4004_v27, %v3912_v61  ;;  %v4948_v11 = vpack.c.b16 %v4918_v0, %v4917_v23  ;;  %v6332_v27 = vld [vmem:[%s6461_s8 + $0x34] sm:$0xf] }
 0x328   : > { %v4430_v1 = vpop.f32.mrf.mxu3  ;;  %v1943_v35 = vrot.slane %v6332_v27, 5 }
 0x329   : > { %v4486_v47 = vadd.f32 %v4430_v1, %v4264_v6  ;;  %v4265_v44 = vadd.f32 %v4210_v3, %v4005_v13  ;;  %v6333_v6 = vld [vmem:[%s6461_s8 + $0x38] sm:$0x1] }
 0x32a   : > { %v4009_v17 = vpop.f32.mrf.mxu1  ;;  %v1945_v25 = vrot.slane %v1943_v35, 4  ;;  %v1946_v61 = vrot.slane %v6333_v6, 5 }
 0x32b   : > { %v4518_v59 = vadd.f32 %v7758_v32, %v4486_v47 }
 0x32d   : > { %v4550_v56 = vmax.f32 %v4518_v59, 0.0 }
 0x32e   : > { %v3915_v49 = vpop.f32.mrf.mxu0 }
 0x32f   : > { %6051 = vst.msk [vmem:[%s6753_s18 + $0x110] sm:$0xff] %vm2964_vm5, %v4550_v56  ;;  %v4215_v22 = vpop.f32.mrf.mxu2  ;;  %v4008_v54 = vadd.f32 %v4007_v14, %v3915_v49 }
 0x330   : > { %v4432_v16 = vpop.f32.mrf.mxu3 }
 0x331   : > { %v4487_v9 = vadd.f32 %v4432_v16, %v4265_v44  ;;  %6070 = vmatmul.msk.bf16.gmra.mxu0 %vm2091_vm1, %v7138_v39  ;;  %v4266_v14 = vadd.f32 %v4213_v58, %v4008_v54  ;;  %v5626_v39 = vrot.slane %v5610_v53, 9  ;;  %v5611_v54 = vld [vmem:[%s6461_s8 + $0x3c] sm:$0xe] }
 0x332   : > { %v4012_v57 = vpop.f32.mrf.mxu1  ;;  %v5627_v27 = vrot.slane %v5611_v54, 9 }
 0x333   : > { %v4519_v2 = vadd.f32 %v7758_v32, %v4487_v9  ;;  %v8044_v9 = vld [vmem:[%s8411_s2] ss:$0 sm:$0xff] }
 0x334   : > { %6104 = vmatmul.msk.bf16.gmra.mxu2 %vm2091_vm1, %v7635_v50  ;;  %6087 = vmatmul.msk.bf16.gmra.mxu1 %vm2091_vm1, %v6555_v60  ;;  %v1944_v50 = vsel %vm7019_vm8, %v5626_v39, %v1943_v35  ;;  %v1947_v60 = vsel %vm7019_vm8, %v1945_v25, %v1946_v61 }
 0x335   : > { %v4551_v3 = vmax.f32 %v4519_v2, 0.0  ;;  %6120 = vmatmul.msk.bf16.gmra.mxu3 %vm2091_vm1, %v4948_v11  ;;  %v4919_v34 = vunpack.c.l.b16 %v1944_v50  ;;  %v4920_v10 = vunpack.c.l.b16 %v1947_v60  ;;  %v6336_v2 = vld [vmem:[%s6461_s8 + $0x44] sm:$0x1] }
 0x336   : > { %v3917_v18 = vpop.f32.mrf.mxu0  ;;  %v1953_v53 = vrot.slane %v6336_v2, 5 }
 0x337   : > { %6052 = vst.msk [vmem:[%s6753_s18 + $0x118] sm:$0xff] %vm2964_vm5, %v4551_v3  ;;  %v4218_v5 = vpop.f32.mrf.mxu2  ;;  %v4010_v1 = vadd.f32 %v4009_v17, %v3917_v18  ;;  %v4949_v44 = vpack.c.b16 %v4920_v10, %v4919_v34 }
 0x338   : > { %v4435_v62 = vpop.f32.mrf.mxu3 }
 0x339   : > { %v4488_v42 = vadd.f32 %v4435_v62, %v4266_v14  ;;  %v4267_v13 = vadd.f32 %v4215_v22, %v4010_v1 }
 0x33a   : > { %v4014_v52 = vpop.f32.mrf.mxu1 }
 0x33b   : > { %v4520_v58 = vadd.f32 %v7758_v32, %v4488_v42  ;;  %v6334_v32 = vld [vmem:[%s6461_s8 + $0x40] sm:$0xf] }
 0x33c   : > { %v1950_v17 = vrot.slane %v6334_v32, 5 }
 0x33d   : > { %v4552_v47 = vmax.f32 %v4520_v58, 0.0 }
 0x33e   : > { %v3920_v59 = vpop.f32.mrf.mxu0  ;;  %v1952_v35 = vrot.slane %v1950_v17, 4 }
 0x33f   : > { %6053 = vst.msk [vmem:[%s6753_s18 + $0x130] sm:$0xff] %vm2964_vm5, %v4552_v47  ;;  %v4220_v56 = vpop.f32.mrf.mxu2  ;;  %v4013_v49 = vadd.f32 %v4012_v57, %v3920_v59 }
 0x340   : > { %v4437_v23 = vpop.f32.mrf.mxu3 }
 0x341   : > { %v4489_v0 = vadd.f32 %v4437_v23, %v4267_v13  ;;  %6071 = vmatmul.msk.bf16.gmra.mxu0 %vm2091_vm1, %v7167_v4  ;;  %v4268_v11 = vadd.f32 %v4218_v5, %v4013_v49  ;;  %v5612_v23 = vld [vmem:[%s6461_s8 + $0x48] sm:$0xe] }
 0x342   : > { %v4017_v16 = vpop.f32.mrf.mxu1 }
 0x343   : > { %v4521_v22 = vadd.f32 %v8044_v9, %v4489_v0 }
 0x344   : > { %6105 = vmatmul.msk.bf16.gmra.mxu2 %vm2091_vm1, %v7658_v63  ;;  %6088 = vmatmul.msk.bf16.gmra.mxu1 %vm2091_vm1, %v6579_v51  ;;  %v1951_v63 = vsel %vm7019_vm8, %v5627_v27, %v1950_v17  ;;  %v1954_v51 = vsel %vm7019_vm8, %v1952_v35, %v1953_v53 }
 0x345   : > { %v4553_v4 = vmax.f32 %v4521_v22, 0.0  ;;  %6121 = vmatmul.msk.bf16.gmra.mxu3 %vm2091_vm1, %v4949_v44  ;;  %v4921_v5 = vunpack.c.l.b16 %v1951_v63  ;;  %v4922_v62 = vunpack.c.l.b16 %v1954_v51 }
 0x346   : > { %v3922_v57 = vpop.f32.mrf.mxu0 }
 0x347   : > { %6054 = vst.msk [vmem:[%s6753_s18 + $0x138] sm:$0xff] %vm2964_vm5, %v4553_v4  ;;  %v4223_v3 = vpop.f32.mrf.mxu2  ;;  %v4015_v6 = vadd.f32 %v4014_v52, %v3922_v57  ;;  %v4950_v34 = vpack.c.b16 %v4922_v62, %v4921_v5  ;;  %v6337_v52 = vld [vmem:[%s6461_s8 + $0x4c] sm:$0xf]  ;;  %v5613_v62 = vld [vmem:[%s6461_s8 + $0x54] sm:$0xe] }
 0x348   : > { %v4440_v14 = vpop.f32.mrf.mxu3  ;;  %v1957_v59 = vrot.slane %v6337_v52, 5 }
 0x349   : > { %v4490_v18 = vadd.f32 %v4440_v14, %v4268_v11  ;;  %v4269_v50 = vadd.f32 %v4220_v56, %v4015_v6 }
 0x34a   : > { %v4019_v39 = vpop.f32.mrf.mxu1  ;;  %v1959_v44 = vrot.slane %v1957_v59, 4 }
 0x34b   : > { %v4522_v25 = vadd.f32 %v8044_v9, %v4490_v18 }
 0x34d   : > { %v4554_v61 = vmax.f32 %v4522_v25, 0.0 }
 0x34e   : > { %v3925_v42 = vpop.f32.mrf.mxu0 }
 0x34f   : > { %6055 = vst.msk [vmem:[%s6753_s18 + $0x150] sm:$0xff] %vm2964_vm5, %v4554_v61  ;;  %v4225_v60 = vpop.f32.mrf.mxu2  ;;  %v4018_v47 = vadd.f32 %v4017_v16, %v3925_v42  ;;  %v6338_v16 = vld [vmem:[%s6461_s8 + $0x50] sm:$0x1] }
 0x350   : > { %v4442_v58 = vpop.f32.mrf.mxu3  ;;  %v1960_v32 = vrot.slane %v6338_v16, 5 }
 0x351   : > { %v4491_v1 = vadd.f32 %v4442_v58, %v4269_v50  ;;  %6072 = vmatmul.msk.bf16.gmra.mxu0 %vm2091_vm1, %v7196_v46  ;;  %v4270_v0 = vadd.f32 %v4223_v3, %v4018_v47  ;;  %v5628_v46 = vrot.slane %v5612_v23, 9 }
 0x352   : > { %v4022_v10 = vpop.f32.mrf.mxu1 }
 0x353   : > { %v4523_v13 = vadd.f32 %v8044_v9, %v4491_v1  ;;  %v6340_v1 = vld [vmem:[%s6461_s8 + $0x5c] sm:$0x1] }
 0x354   : > { %6106 = vmatmul.msk.bf16.gmra.mxu2 %vm2091_vm1, %v7683_v21  ;;  %6089 = vmatmul.msk.bf16.gmra.mxu1 %vm2091_vm1, %v6606_v33  ;;  %v1958_v21 = vsel %vm7019_vm8, %v5628_v46, %v1957_v59  ;;  %v1961_v33 = vsel %vm7019_vm8, %v1959_v44, %v1960_v32  ;;  %v1967_v47 = vrot.slane %v6340_v1, 5 }
 0x355   : > { %v4555_v56 = vmax.f32 %v4523_v13, 0.0  ;;  %6122 = vmatmul.msk.bf16.gmra.mxu3 %vm2091_vm1, %v4950_v34  ;;  %v4923_v35 = vunpack.c.l.b16 %v1958_v21  ;;  %v4924_v2 = vunpack.c.l.b16 %v1961_v33 }
 0x356   : > { %v3927_v49 = vpop.f32.mrf.mxu0 }
 0x357   : > { %6056 = vst.msk [vmem:[%s6753_s18 + $0x158] sm:$0xff] %vm2964_vm5, %v4555_v56  ;;  %v4228_v17 = vpop.f32.mrf.mxu2  ;;  %v4020_v57 = vadd.f32 %v4019_v39, %v3927_v49  ;;  %v4951_v25 = vpack.c.b16 %v4924_v2, %v4923_v35  ;;  %v6339_v39 = vld [vmem:[%s6461_s8 + $0x58] sm:$0xf] }
 0x358   : > { %v4445_v22 = vpop.f32.mrf.mxu3  ;;  %v1964_v61 = vrot.slane %v6339_v39, 5 }
 0x359   : > { %v4492_v54 = vadd.f32 %v4445_v22, %v4270_v0  ;;  %v4271_v3 = vadd.f32 %v4225_v60, %v4020_v57  ;;  %v5614_v57 = vld [vmem:[%s6461_s8 + $0x60] sm:$0xe] }
 0x35a   : > { %v4024_v4 = vpop.f32.mrf.mxu1  ;;  %v1966_v58 = vrot.slane %v1964_v61, 4 }
 0x35b   : > { %v4524_v11 = vadd.f32 %v8044_v9, %v4492_v54 }
 0x35d   : > { %v4556_v27 = vmax.f32 %v4524_v11, 0.0 }
 0x35e   : > { %v3930_v53 = vpop.f32.mrf.mxu0 }
 0x35f   : > { %6057 = vst.msk [vmem:[%s6753_s18 + $0x170] sm:$0xff] %vm2964_vm5, %v4556_v27  ;;  %v4230_v14 = vpop.f32.mrf.mxu2  ;;  %v4023_v51 = vadd.f32 %v4022_v10, %v3930_v53 }
 0x360   : > { %v4447_v18 = vpop.f32.mrf.mxu3 }
 0x361   : > { %v4493_v63 = vadd.f32 %v4447_v18, %v4271_v3  ;;  %6073 = vmatmul.msk.bf16.gmra.mxu0 %vm2091_vm1, %v7225_v48  ;;  %v4272_v50 = vadd.f32 %v4228_v17, %v4023_v51  ;;  %v5629_v48 = vrot.slane %v5613_v62, 9  ;;  %v6342_v3 = vld [vmem:[%s6461_s8 + $0x68] sm:$0x1] }
 0x362   : > { %v4027_v6 = vpop.f32.mrf.mxu1 }
 0x363   : > { %v4525_v5 = vadd.f32 %v8044_v9, %v4493_v63 }
 0x364   : > { %6107 = vmatmul.msk.bf16.gmra.mxu2 %vm2091_vm1, %v7708_v7  ;;  %6090 = vmatmul.msk.bf16.gmra.mxu1 %vm2091_vm1, %v6631_v30  ;;  %v1965_v7 = vsel %vm7019_vm8, %v5629_v48, %v1964_v61  ;;  %v1968_v30 = vsel %vm7019_vm8, %v1966_v58, %v1967_v47 }
 0x365   : > { %v4557_v42 = vmax.f32 %v4525_v5, 0.0  ;;  %6123 = vmatmul.msk.bf16.gmra.mxu3 %vm2091_vm1, %v4951_v25  ;;  %v4925_v0 = vunpack.c.l.b16 %v1965_v7  ;;  %v4926_v49 = vunpack.c.l.b16 %v1968_v30  ;;  %v5615_v7 = vld [vmem:[%s6461_s8 + $0x6c] sm:$0xe] }
 0x366   : > { %v3932_v60 = vpop.f32.mrf.mxu0 }
 0x367   : > { %6058 = vst.msk [vmem:[%s6753_s18 + $0x178] sm:$0xff] %vm2964_vm5, %v4557_v42  ;;  %v4233_v34 = vpop.f32.mrf.mxu2  ;;  %v4025_v23 = vadd.f32 %v4024_v4, %v3932_v60  ;;  %v4952_v54 = vpack.c.b16 %v4926_v49, %v4925_v0  ;;  %v6341_v4 = vld [vmem:[%s6461_s8 + $0x64] sm:$0xf]  ;;  %v6344_v0 = vld [vmem:[%s6461_s8 + $0x74] sm:$0x1] }
 0x368   : > { %v4450_v10 = vpop.f32.mrf.mxu3  ;;  %v1971_v33 = vrot.slane %v6341_v4, 5  ;;  %v1981_v49 = vrot.slane %v6344_v0, 5 }
 0x369   : > { %v4494_v52 = vadd.f32 %v4450_v10, %v4272_v50  ;;  %v4273_v44 = vadd.f32 %v4230_v14, %v4025_v23  ;;  %v1974_v14 = vrot.slane %v6342_v3, 5  ;;  %v6343_v10 = vld [vmem:[%s6461_s8 + $0x70] sm:$0xf]  ;;  %v6345_v3 = vld [vmem:[%s6461_s8 + $0x7c] sm:$0xf] }
 0x36a   : > { %v4029_v59 = vpop.f32.mrf.mxu1  ;;  %v1973_v53 = vrot.slane %v1971_v33, 4 }
 0x36b   : > { %v4526_v13 = vadd.f32 %v8044_v9, %v4494_v52  ;;  %v1978_v52 = vrot.slane %v6343_v10, 5 }
 0x36d   : > { %v4558_v56 = vmax.f32 %v4526_v13, 0.0 }
 0x36e   : > { %v3935_v46 = vpop.f32.mrf.mxu0 }
 0x36f   : > { %6059 = vst.msk [vmem:[%s6753_s18 + $0x190] sm:$0xff] %vm2964_vm5, %v4558_v56  ;;  %v4235_v16 = vpop.f32.mrf.mxu2  ;;  %v4028_v22 = vadd.f32 %v4027_v6, %v3935_v46  ;;  %v1980_v56 = vrot.slane %v1978_v52, 4 }
 0x370   : > { %v4452_v32 = vpop.f32.mrf.mxu3 }
 0x371   : > { %v4495_v17 = vadd.f32 %v4452_v32, %v4273_v44  ;;  %6074 = vmatmul.msk.bf16.gmra.mxu0 %vm2091_vm1, %v7254_v29  ;;  %v4274_v35 = vadd.f32 %v4233_v34, %v4028_v22  ;;  %v5630_v29 = vrot.slane %v5614_v57, 9 }
 0x372   : > { %v4032_v21 = vpop.f32.mrf.mxu1 }
 0x373   : > { %v4527_v11 = vadd.f32 %v8044_v9, %v4495_v17 }
 0x374   : > { %6108 = vmatmul.msk.bf16.gmra.mxu2 %vm2091_vm1, %v7733_v40  ;;  %6091 = vmatmul.msk.bf16.gmra.mxu1 %vm2091_vm1, %v6657_v20  ;;  %v1972_v40 = vsel %vm7019_vm8, %v5630_v29, %v1971_v33  ;;  %v1975_v20 = vsel %vm7019_vm8, %v1973_v53, %v1974_v14  ;;  %v1985_v14 = vrot.slane %v6345_v3, 5 }
 0x375   : > { %v4559_v27 = vmax.f32 %v4527_v11, 0.0  ;;  %6124 = vmatmul.msk.bf16.gmra.mxu3 %vm2091_vm1, %v4952_v54  ;;  %v4927_v5 = vunpack.c.l.b16 %v1972_v40  ;;  %v4928_v62 = vunpack.c.l.b16 %v1975_v20 }
 0x376   : > { %v3937_v2 = vpop.f32.mrf.mxu0  ;;  %v1987_v20 = vrot.slane %v1985_v14, 4 }
 0x377   : > { %6060 = vst.msk [vmem:[%s6753_s18 + $0x198] sm:$0xff] %vm2964_vm5, %v4559_v27  ;;  %v4238_v18 = vpop.f32.mrf.mxu2  ;;  %v4030_v39 = vadd.f32 %v4029_v59, %v3937_v2  ;;  %v4953_v47 = vpack.c.b16 %v4928_v62, %v4927_v5 }
 0x378   : > { %v4455_v63 = vpop.f32.mrf.mxu3 }
 0x379   : > { %v4496_v51 = vadd.f32 %v4455_v63, %v4274_v35  ;;  %v4275_v50 = vadd.f32 %v4235_v16, %v4030_v39  ;;  %v5616_v63 = vld [vmem:[%s6461_s8 + $0x78] sm:$0xe] }
 0x37a   : > { %v4034_v25 = vpop.f32.mrf.mxu1 }
 0x37b   : > { %v4528_v6 = vadd.f32 %v8044_v9, %v4496_v51 }
 0x37d   : > { %v4560_v61 = vmax.f32 %v4528_v6, 0.0  ;;  %v6346_v6 = vld [vmem:[%s6461_s8 + $0x80] sm:$0x1] }
 0x37e   : > { %v3940_v42 = vpop.f32.mrf.mxu0  ;;  %v1988_v39 = vrot.slane %v6346_v6, 5 }
 0x37f   : > { %6061 = vst.msk [vmem:[%s6753_s18 + $0x1b0] sm:$0xff] %vm2964_vm5, %v4560_v61  ;;  %v4240_v60 = vpop.f32.mrf.mxu2  ;;  %v4033_v1 = vadd.f32 %v4032_v21, %v3940_v42 }
 0x380   : > { %v4457_v48 = vpop.f32.mrf.mxu3 }
 0x381   : > { %v4497_v58 = vadd.f32 %v4457_v48, %v4275_v50  ;;  %6075 = vmatmul.msk.bf16.gmra.mxu0 %vm2091_vm1, %v7283_v26  ;;  %v4276_v13 = vadd.f32 %v4238_v18, %v4033_v1  ;;  %v5631_v26 = vrot.slane %v5615_v7, 9 }
 0x382   : > { %v4037_v34 = vpop.f32.mrf.mxu1 }
 0x383   : > { %v4529_v59 = vadd.f32 %v8044_v9, %v4497_v58 }
 0x384   : > { %6109 = vmatmul.msk.bf16.gmra.mxu2 %vm2091_vm1, %v7763_v37  ;;  %6092 = vmatmul.msk.bf16.gmra.mxu1 %vm2091_vm1, %v6683_v12  ;;  %v1979_v37 = vsel %vm7019_vm8, %v5631_v26, %v1978_v52  ;;  %v1982_v12 = vsel %vm7019_vm8, %v1980_v56, %v1981_v49  ;;  %v6347_v26 = vld [vmem:[%s6461_s8 + $0x88] sm:$0xf]  ;;  %v5617_v49 = vld [vmem:[%s6461_s8 + $0x84] sm:$0xe] }
 0x385   : > { %v4561_v30 = vmax.f32 %v4529_v59, 0.0  ;;  %6125 = vmatmul.msk.bf16.gmra.mxu3 %vm2091_vm1, %v4953_v47  ;;  %v4929_v21 = vunpack.c.l.b16 %v1979_v37  ;;  %v4930_v4 = vunpack.c.l.b16 %v1982_v12  ;;  %v1992_v56 = vrot.slane %v6347_v26, 5 }
 0x386   : > { %v3942_v23 = vpop.f32.mrf.mxu0  ;;  %v5633_v37 = vrot.slane %v5617_v49, 9 }
 0x387   : > { %6062 = vst.msk [vmem:[%s6753_s18 + $0x1b8] sm:$0xff] %vm2964_vm5, %v4561_v30  ;;  %v4243_v46 = vpop.f32.mrf.mxu2  ;;  %v4035_v22 = vadd.f32 %v4034_v25, %v3942_v23  ;;  %v4954_v29 = vpack.c.b16 %v4930_v4, %v4929_v21  ;;  %v8451_v30 = vld [vmem:[#allocation8_spill] sm:$0xff]  ;;  %v1994_v12 = vrot.slane %v1992_v56, 4 }
 0x388   : > { %v4460_v44 = vpop.f32.mrf.mxu3 }
 0x389   : > { %v4498_v16 = vadd.f32 %v4460_v44, %v4276_v13  ;;  %v4277_v11 = vadd.f32 %v4240_v60, %v4035_v22 }
 0x38a   : > { %v4039_v32 = vpop.f32.mrf.mxu1 }
 0x38b   : > { %v4530_v17 = vadd.f32 %v8044_v9, %v4498_v16 }
 0x38d   : > { %v4562_v54 = vmax.f32 %v4530_v17, 0.0  ;;  %v6348_v17 = vld [vmem:[%s6461_s8 + $0x8c] sm:$0x1] }
 0x38e   : > { %v3945_v33 = vpop.f32.mrf.mxu0  ;;  %v1995_v22 = vrot.slane %v6348_v17, 5 }
 0x38f   : > { %6063 = vst.msk [vmem:[%s6753_s18 + $0x1d0] sm:$0xff] %vm2964_vm5, %v4562_v54  ;;  %v4245_v57 = vpop.f32.mrf.mxu2  ;;  %v4038_v2 = vadd.f32 %v4037_v34, %v3945_v33 }
 0x390   : > { %v4462_v27 = vpop.f32.mrf.mxu3 }
 0x391   : > { %v4499_v35 = vadd.f32 %v4462_v27, %v4277_v11  ;;  %6076 = vmatmul.msk.bf16.gmra.mxu0 %vm2091_vm1, %v7312_v45  ;;  %v4278_v25 = vadd.f32 %v4243_v46, %v4038_v2  ;;  %v5632_v45 = vrot.slane %v5616_v63, 9  ;;  %v8452_v46 = vld [vmem:[#allocation2_spill] sm:$0xff]  ;;  %v1996_v11 = vsel %vm7019_vm8, %v1994_v12, %v1995_v22  ;;  %v5619_v22 = vld [vmem:[%s6461_s8 + $0x9c] sm:$0xe] }
 0x392   : > { %v4707_v53 = vpop.f32.mrf.mxu1 }
 0x393   : > { %v4531_v18 = vadd.f32 %v8044_v9, %v4499_v35 }
 0x394   : > { %6110 = vmatmul.msk.bf16.gmra.mxu2 %vm2091_vm1, %v7788_v28  ;;  %6093 = vmatmul.msk.bf16.gmra.mxu1 %vm2091_vm1, %v6713_v24  ;;  %v1986_v28 = vsel %vm7019_vm8, %v5632_v45, %v1985_v14  ;;  %v1989_v24 = vsel %vm7019_vm8, %v1987_v20, %v1988_v39  ;;  %v6349_v20 = vld [vmem:[%s6461_s8 + $0x94] sm:$0xf] }
 0x395   : > { %v4563_v51 = vmax.f32 %v4531_v18, 0.0  ;;  %6126 = vmatmul.msk.bf16.gmra.mxu3 %vm2091_vm1, %v4954_v29  ;;  %v4931_v58 = vunpack.c.l.b16 %v1986_v28  ;;  %v4932_v1 = vunpack.c.l.b16 %v1989_v24  ;;  %v4934_v29 = vunpack.c.l.b16 %v1996_v11 }
 0x396   : > { %v3947_v40 = vpop.f32.mrf.mxu0  ;;  %v1999_v6 = vrot.slane %v6349_v20, 5 }
 0x397   : > { %6064 = vst.msk [vmem:[%s6753_s18 + $0x1d8] sm:$0xff] %vm2964_vm5, %v4563_v51  ;;  %v4801_v61 = vpop.f32.mrf.mxu2  ;;  %v4040_v60 = vadd.f32 %v4039_v32, %v3947_v40  ;;  %v4955_v13 = vpack.c.b16 %v4932_v1, %v4931_v58 }
 0x398   : > { %v4465_v5 = vpop.f32.mrf.mxu3 }
 0x399   : > { %v4500_v62 = vadd.f32 %v4465_v5, %v4278_v25  ;;  %v4279_v34 = vadd.f32 %v4245_v57, %v4040_v60  ;;  %v8453_v25 = vld [vmem:[#allocation9_spill] sm:$0xff]  ;;  %v8454_v5 = vld [vmem:[#allocation3_spill] sm:$0xff] }
 0x39a   : > { %v4709_v42 = vpop.f32.mrf.mxu1  ;;  %v6350_v60 = vld [vmem:[%s6461_s8 + $0x98] sm:$0x1] }
 0x39b   : > { %v4532_v50 = vadd.f32 %v8044_v9, %v4500_v62 }
 0x39d   : > { %v4564_v48 = vmax.f32 %v4532_v50, 0.0  ;;  %v2001_v50 = vrot.slane %v1999_v6, 4 }
 0x39e   : > { %v4615_v47 = vpop.f32.mrf.mxu0 }
 0x39f   : > { %6065 = vst.msk [vmem:[%s6753_s18 + $0x1f0] sm:$0xff] %vm2964_vm5, %v4564_v48  ;;  %v4803_v10 = vpop.f32.mrf.mxu2  ;;  %v4708_v7 = vadd.f32 %v4707_v53, %v4615_v47  ;;  %v2002_v48 = vrot.slane %v6350_v60, 5  ;;  %v5620_v60 = vld [vmem:[%s6461_s8 + $0xa8] sm:$0xe] }
 0x3a0   : > { %v4467_v52 = vpop.f32.mrf.mxu3 }
 0x3a1   : > { %v4501_v59 = vadd.f32 %v4467_v52, %v4279_v34  ;;  %6077 = vmatmul.msk.bf16.gmra.mxu0 %vm2091_vm1, %v8451_v30  ;;  %v4881_v16 = vadd.f32 %v4801_v61, %v4708_v7  ;;  %v5618_v61 = vld [vmem:[%s6461_s8 + $0x90] sm:$0xe] }
 0x3a2   : > { %v4712_v23 = vpop.f32.mrf.mxu1  ;;  %v5634_v24 = vrot.slane %v5618_v61, 9 }
 0x3a3   : > { %v4533_v0 = vadd.f32 %v8044_v9, %v4501_v59 }
 0x3a4   : > { %6111 = vmatmul.msk.bf16.gmra.mxu2 %vm2091_vm1, %v7814_v15  ;;  %6094 = vmatmul.msk.bf16.gmra.mxu1 %vm2091_vm1, %v8452_v46  ;;  %v1993_v15 = vsel %vm7019_vm8, %v5633_v37, %v1992_v56  ;;  %v6351_v37 = vld [vmem:[%s6461_s8 + $0xa0] sm:$0xf] }
 0x3a5   : > { %v4565_v44 = vmax.f32 %v4533_v0, 0.0  ;;  %6127 = vmatmul.msk.bf16.gmra.mxu3 %vm2091_vm1, %v4955_v13  ;;  %v4933_v2 = vunpack.c.l.b16 %v1993_v15  ;;  %v2006_v12 = vrot.slane %v6351_v37, 5  ;;  %v5635_v15 = vrot.slane %v5619_v22, 9  ;;  %v8459_v22 = vld [vmem:[#allocation12_spill] sm:$0xff] }
 0x3a6   : > { %v4617_v32 = vpop.f32.mrf.mxu0 }
 0x3a7   : > { %6066 = vst.msk [vmem:[%s6753_s18 + $0x1f8] sm:$0xff] %vm2964_vm5, %v4565_v44  ;;  %v4806_v54 = vpop.f32.mrf.mxu2  ;;  %v4710_v27 = vadd.f32 %v4709_v42, %v4617_v32  ;;  %v4956_v40 = vpack.c.b16 %v4934_v29, %v4933_v2  ;;  %v8455_v44 = vld [vmem:[#allocation10_spill] sm:$0xff]  ;;  %v2008_v11 = vrot.slane %v2006_v12, 4 }
 0x3a8   : > { %v5023_v21 = vpop.f32.mrf.mxu3 }
 0x3a9   : > { %v5103_v4 = vadd.f32 %v5023_v21, %v4881_v16  ;;  %v4882_v3 = vadd.f32 %v4803_v10, %v4710_v27  ;;  %v2003_v10 = vsel %vm7019_vm8, %v2001_v50, %v2002_v48  ;;  %v8458_v48 = vld [vmem:[#allocation5_spill] sm:$0xff] }
 0x3aa   : > { %v4714_v33 = vpop.f32.mrf.mxu1  ;;  %v4936_v13 = vunpack.c.l.b16 %v2003_v10  ;;  %v6354_v10 = vld [vmem:[%s6461_s8 + $0xb0] sm:$0x1] }
 0x3ab   : > { %v5135_v57 = vadd.f32 %v8044_v9, %v5103_v4 }
 0x3ad   : > { %v5167_v35 = vmax.f32 %v5135_v57, 0.0  ;;  %v6352_v57 = vld [vmem:[%s6461_s8 + $0xa4] sm:$0x1] }
 0x3ae   : > { %v4620_v53 = vpop.f32.mrf.mxu0  ;;  %v2009_v27 = vrot.slane %v6352_v57, 5  ;;  %v8460_v57 = vld [vmem:[#allocation15_spill] sm:$0xff] }
 0x3af   : > { %5231 = vrot.lane.b32.xlu2 %v5167_v35, %s6386_s28  ;;  %v4808_v14 = vpop.f32.mrf.mxu2  ;;  %v4713_v51 = vadd.f32 %v4712_v23, %v4620_v53 }
 0x3b0   : > { %v5025_v18 = vpop.f32.mrf.mxu3 }
 0x3b1   : > { %v5104_v63 = vadd.f32 %v5025_v18, %v4882_v3  ;;  %6078 = vmatmul.msk.bf16.gmra.mxu0 %vm2091_vm1, %v8453_v25  ;;  %v4883_v42 = vadd.f32 %v4806_v54, %v4713_v51  ;;  %v8456_v54 = vld [vmem:[#allocation4_spill] sm:$0xff]  ;;  %v2010_v3 = vsel %vm7019_vm8, %v2008_v11, %v2009_v27  ;;  %v8461_v27 = vld [vmem:[#allocation7_spill] sm:$0xff] }
 0x3b2   : > { %v4717_v45 = vpop.f32.mrf.mxu1  ;;  %v4938_v25 = vunpack.c.l.b16 %v2010_v3  ;;  %v5621_v11 = vld [vmem:[%s6461_s8 + $0xb4] sm:$0xe]  ;;  %v6356_v3 = vld [vmem:[%s6461_s8 + $0xbc] sm:$0x1] }
 0x3b3   : > { %v5136_v39 = vadd.f32 %v8044_v9, %v5104_v63 }
 0x3b4   : > { %6112 = vmatmul.msk.bf16.gmra.mxu2 %vm2091_vm1, %v7841_v41  ;;  %6095 = vmatmul.msk.bf16.gmra.mxu1 %vm2091_vm1, %v8454_v5  ;;  %v2000_v41 = vsel %vm7019_vm8, %v5634_v24, %v1999_v6  ;;  %v8457_v5 = vld [vmem:[#allocation11_spill] sm:$0xff] }
 0x3b5   : > { %6128 = vmatmul.msk.bf16.gmra.mxu3 %vm2091_vm1, %v4956_v40  ;;  %v5168_v62 = vmax.f32 %v5136_v39, 0.0  ;;  %v4935_v30 = vunpack.c.l.b16 %v2000_v41 }
 0x3b6   : > { %v4622_v28 = vpop.f32.mrf.mxu0 }
 0x3b7   : > { %5233 = vrot.lane.b32.xlu0 %v5168_v62, %s6386_s28  ;;  %v4811_v58 = vpop.f32.mrf.mxu2  ;;  %v4715_v59 = vadd.f32 %v4714_v33, %v4622_v28  ;;  %v4957_v16 = vpack.c.b16 %v4936_v13, %v4935_v30  ;;  %v6353_v28 = vld [vmem:[%s6461_s8 + $0xac] sm:$0xf] }
 0x3b8   : > { %v5028_v1 = vpop.f32.mrf.mxu3  ;;  %v2013_v24 = vrot.slane %v6353_v28, 5 }
 0x3b9   : > { %v5105_v47 = vadd.f32 %v5028_v1, %v4883_v42  ;;  %v4884_v26 = vadd.f32 %v4808_v14, %v4715_v59 }
 0x3ba   : > { %v4719_v34 = vpop.f32.mrf.mxu1  ;;  %v2015_v41 = vrot.slane %v2013_v24, 4 }
 0x3bb   : > { %v5137_v52 = vadd.f32 %v8044_v9, %v5105_v47 }
 0x3bd   : > { %v5169_v7 = vmax.f32 %v5137_v52, 0.0  ;;  %v2016_v52 = vrot.slane %v6354_v10, 5  ;;  %v5622_v10 = vld [vmem:[%s6461_s8 + $0xc0] sm:$0xe] }
 0x3be   : > { %v4625_v23 = vpop.f32.mrf.mxu0 }
 0x3bf   : > { %5235 = vrot.lane.b32.xlu1 %v5169_v7, %s6386_s28  ;;  %v4813_v56 = vpop.f32.mrf.mxu2  ;;  %v4718_v46 = vadd.f32 %v4717_v45, %v4625_v23  ;;  %v2017_v23 = vsel %vm7019_vm8, %v2015_v41, %v2016_v52 }
 0x3c0   : > { %v5030_v0 = vpop.f32.mrf.mxu3 }
 0x3c1   : > { %v5106_v49 = vadd.f32 %v5030_v0, %v4884_v26  ;;  %6079 = vmatmul.msk.bf16.gmra.mxu0 %vm2091_vm1, %v8455_v44  ;;  %v4885_v4 = vadd.f32 %v4811_v58, %v4718_v46  ;;  %v4940_v46 = vunpack.c.l.b16 %v2017_v23 }
 0x3c2   : > { %v4722_v32 = vpop.f32.mrf.mxu1 }
 0x3c3   : > { %v5138_v17 = vadd.f32 %v8044_v9, %v5106_v49 }
 0x3c4   : > { %6113 = vmatmul.msk.bf16.gmra.mxu2 %vm2091_vm1, %v7868_v36  ;;  %6096 = vmatmul.msk.bf16.gmra.mxu1 %vm2091_vm1, %v8456_v54  ;;  %v2007_v36 = vsel %vm7019_vm8, %v5635_v15, %v2006_v12 }
 0x3c5   : > { %6129 = vmatmul.msk.bf16.gmra.mxu3 %vm2091_vm1, %v4957_v16  ;;  %v5170_v21 = vmax.f32 %v5138_v17, 0.0  ;;  %v4937_v51 = vunpack.c.l.b16 %v2007_v36 }
 0x3c6   : > { %v4627_v33 = vpop.f32.mrf.mxu0 }
 0x3c7   : > { %5237 = vrot.lane.b32.xlu2 %v5170_v21, %s6386_s28  ;;  %v4816_v35 = vpop.f32.mrf.mxu2  ;;  %v4720_v18 = vadd.f32 %v4719_v34, %v4627_v33  ;;  %v4958_v62 = vpack.c.b16 %v4938_v25, %v4937_v51  ;;  %v5636_v34 = vrot.slane %v5620_v60, 9 }
 0x3c8   : > { %v5033_v2 = vpop.f32.mrf.mxu3 }
 0x3c9   : > { %v5107_v29 = vadd.f32 %v5033_v2, %v4885_v4  ;;  %v4886_v45 = vadd.f32 %v4813_v56, %v4720_v18  ;;  %v6355_v4 = vld [vmem:[%s6461_s8 + $0xb8] sm:$0xf] }
 0x3ca   : > { %v4724_v53 = vpop.f32.mrf.mxu1  ;;  %v2020_v33 = vrot.slane %v6355_v4, 5 }
 0x3cb   : > { %v5139_v14 = vadd.f32 %v8044_v9, %v5107_v29 }
 0x3cc   : > { %v2022_v36 = vrot.slane %v2020_v33, 4 }
 0x3cd   : > { %v5171_v63 = vmax.f32 %v5139_v14, 0.0  ;;  %v2023_v14 = vrot.slane %v6356_v3, 5 }
 0x3ce   : > { %v4630_v40 = vpop.f32.mrf.mxu0 }
 0x3cf   : > { %5239 = vrot.lane.b32.xlu0 %v5171_v63, %s6386_s28  ;;  %v4818_v20 = vpop.f32.mrf.mxu2  ;;  %v4723_v61 = vadd.f32 %v4722_v32, %v4630_v40 }
 0x3d0   : > { %v5035_v6 = vpop.f32.mrf.mxu3 }
 0x3d1   : > { %v5108_v39 = vadd.f32 %v5035_v6, %v4886_v45  ;;  %6080 = vmatmul.msk.bf16.gmra.mxu0 %vm2091_vm1, %v8457_v5  ;;  %v4887_v1 = vadd.f32 %v4816_v35, %v4723_v61  ;;  %v2024_v45 = vsel %vm7019_vm8, %v2022_v36, %v2023_v14 }
 0x3d2   : > { %v4727_v42 = vpop.f32.mrf.mxu1  ;;  %v4942_v5 = vunpack.c.l.b16 %v2024_v45 }
 0x3d3   : > { %v5140_v50 = vadd.f32 %v8044_v9, %v5108_v39 }
 0x3d4   : > { %6114 = vmatmul.msk.bf16.gmra.mxu2 %vm2091_vm1, %v7895_v19  ;;  %6097 = vmatmul.msk.bf16.gmra.mxu1 %vm2091_vm1, %v8458_v48  ;;  %v2014_v19 = vsel %vm7019_vm8, %v5636_v34, %v2013_v24  ;;  %v8462_v48 = vld [vmem:[#allocation6_spill] sm:$0xff] }
 0x3d5   : > { %6130 = vmatmul.msk.bf16.gmra.mxu3 %vm2091_vm1, %v4958_v62  ;;  %v5172_v58 = vmax.f32 %v5140_v50, 0.0  ;;  %v4939_v49 = vunpack.c.l.b16 %v2014_v19  ;;  %v6358_v19 = vld [vmem:[%s6461_s8 + $0xc8] sm:$0x1] }
 0x3d6   : > { %v4632_v47 = vpop.f32.mrf.mxu0  ;;  %v2030_v23 = vrot.slane %v6358_v19, 5 }
 0x3d7   : > { %5241 = vrot.lane.b32.xlu1 %v5172_v58, %s6386_s28  ;;  %v4821_v59 = vpop.f32.mrf.mxu2  ;;  %v4725_v56 = vadd.f32 %v4724_v53, %v4632_v47  ;;  %v4959_v54 = vpack.c.b16 %v4940_v46, %v4939_v49  ;;  %v5637_v53 = vrot.slane %v5621_v11, 9  ;;  %v6357_v47 = vld [vmem:[%s6461_s8 + $0xc4] sm:$0xf] }
 0x3d8   : > { %v5038_v7 = vpop.f32.mrf.mxu3  ;;  %v2027_v34 = vrot.slane %v6357_v47, 5 }
 0x3d9   : > { %v5109_v30 = vadd.f32 %v5038_v7, %v4887_v1  ;;  %v4888_v16 = vadd.f32 %v4818_v20, %v4725_v56  ;;  %v2021_v40 = vsel %vm7019_vm8, %v5637_v53, %v2020_v33  ;;  %v8463_v33 = vld [vmem:[#allocation13_spill] sm:$0xff] }
 0x3da   : > { %v4729_v13 = vpop.f32.mrf.mxu1  ;;  %v4941_v61 = vunpack.c.l.b16 %v2021_v40 }
 0x3db   : > { %v5141_v26 = vadd.f32 %v8044_v9, %v5109_v30  ;;  %v5638_v30 = vrot.slane %v5622_v10, 9 }
 0x3dc   : > { %v4960_v58 = vpack.c.b16 %v4942_v5, %v4941_v61 }
 0x3dd   : > { %v5173_v0 = vmax.f32 %v5141_v26, 0.0 }
 0x3de   : > { %v4635_v44 = vpop.f32.mrf.mxu0 }
 0x3df   : > { %5243 = vrot.lane.b32.xlu2 %v5173_v0, %s6386_s28  ;;  %v4823_v32 = vpop.f32.mrf.mxu2  ;;  %v4728_v17 = vadd.f32 %v4727_v42, %v4635_v44 }
 0x3e0   : > { %v5040_v37 = vpop.f32.mrf.mxu3 }
 0x3e1   : > { %v5110_v12 = vadd.f32 %v5040_v37, %v4888_v16  ;;  %6081 = vmatmul.msk.bf16.gmra.mxu0 %vm2091_vm1, %v8459_v22  ;;  %v4889_v2 = vadd.f32 %v4821_v59, %v4728_v17 }
 0x3e2   : > { %v4732_v21 = vpop.f32.mrf.mxu1 }
 0x3e3   : > { %v5142_v15 = vadd.f32 %v8044_v9, %v5110_v12 }
 0x3e4   : > { %6115 = vmatmul.msk.bf16.gmra.mxu2 %vm2091_vm1, %v8460_v57  ;;  %6098 = vmatmul.msk.bf16.gmra.mxu1 %vm2091_vm1, %v8461_v27  ;;  %v6359_v57 = vld [vmem:[%s6461_s8 + $0xd0] sm:$0xf] }
 0x3e5   : > { %6131 = vmatmul.msk.bf16.gmra.mxu3 %vm2091_vm1, %v4959_v54  ;;  %v5174_v35 = vmax.f32 %v5142_v15, 0.0  ;;  %v2034_v27 = vrot.slane %v6359_v57, 5 }
 0x3e6   : > { %v4637_v29 = vpop.f32.mrf.mxu0 }
 0x3e7   : > { %5245 = vrot.lane.b32.xlu0 %v5174_v35, %s6386_s28  ;;  %v4826_v18 = vpop.f32.mrf.mxu2  ;;  %v4730_v6 = vadd.f32 %v4729_v13, %v4637_v29  ;;  %v2029_v13 = vrot.slane %v2027_v34, 4  ;;  %v2036_v14 = vrot.slane %v2034_v27, 4 }
 0x3e8   : > { %v5043_v63 = vpop.f32.mrf.mxu3 }
 0x3e9   : > { %v5111_v51 = vadd.f32 %v5043_v63, %v4889_v2  ;;  %v4890_v42 = vadd.f32 %v4823_v32, %v4730_v6  ;;  %v5623_v2 = vld [vmem:[%s6461_s8 + $0xcc] sm:$0xe] }
 0x3ea   : > { %v4734_v25 = vpop.f32.mrf.mxu1  ;;  %v5639_v3 = vrot.slane %v5623_v2, 9 }
 0x3eb   : > { %v5143_v20 = vadd.f32 %v8044_v9, %v5111_v51 }
 0x3ed   : > { %v5175_v39 = vmax.f32 %v5143_v20, 0.0 }
 0x3ee   : > { %v4640_v62 = vpop.f32.mrf.mxu0 }
 0x3ef   : > { %5247 = vrot.lane.b32.xlu1 %v5175_v39, %s6386_s28  ;;  %v4828_v28 = vpop.f32.mrf.mxu2  ;;  %v4733_v60 = vadd.f32 %v4732_v21, %v4640_v62 }
 0x3f0   : > { %v5045_v24 = vpop.f32.mrf.mxu3 }
 0x3f1   : > { %v5112_v50 = vadd.f32 %v5045_v24, %v4890_v42  ;;  %6082 = vmatmul.msk.bf16.gmra.mxu0 %vm2091_vm1, %v8462_v48  ;;  %v4891_v59 = vadd.f32 %v4826_v18, %v4733_v60  ;;  %v6360_v18 = vld [vmem:[%s6461_s8 + $0xd4] sm:$0x1] }
 0x3f2   : > { %v4737_v1 = vpop.f32.mrf.mxu1  ;;  %v2037_v63 = vrot.slane %v6360_v18, 5 }
 0x3f3   : > { %v5144_v41 = vadd.f32 %v8044_v9, %v5112_v50 }
 0x3f4   : > { %6116 = vmatmul.msk.bf16.gmra.mxu2 %vm2091_vm1, %v7952_v31  ;;  %6099 = vmatmul.msk.bf16.gmra.mxu1 %vm2091_vm1, %v7017_v55  ;;  %v2028_v31 = vsel %vm7019_vm8, %v5638_v30, %v2027_v34  ;;  %v2031_v55 = vsel %vm7019_vm8, %v2029_v13, %v2030_v23  ;;  %v2038_v20 = vsel %vm7019_vm8, %v2036_v14, %v2037_v63 }
 0x3f5   : > { %v5176_v52 = vmax.f32 %v5144_v41, 0.0  ;;  %6132 = vmatmul.msk.bf16.gmra.mxu3 %vm2091_vm1, %v4960_v58  ;;  %v4943_v32 = vunpack.c.l.b16 %v2028_v31  ;;  %v4944_v37 = vunpack.c.l.b16 %v2031_v55  ;;  %v4946_v62 = vunpack.c.l.b16 %v2038_v20  ;;  %v8464_v58 = vld [vmem:[#allocation14_spill] sm:$0xff] }
 0x3f6   : > { %v4642_v7 = vpop.f32.mrf.mxu0 }
 0x3f7   : > { %5249 = vrot.lane.b32.xlu2 %v5176_v52, %s6386_s28  ;;  %v4831_v26 = vpop.f32.mrf.mxu2  ;;  %v4735_v44 = vadd.f32 %v4734_v25, %v4642_v7  ;;  %v4961_v15 = vpack.c.b16 %v4944_v37, %v4943_v32 }
 0x3f8   : > { %v5048_v56 = vpop.f32.mrf.mxu3 }
 0x3f9   : > { %v5113_v0 = vadd.f32 %v5048_v56, %v4891_v59  ;;  %v4892_v17 = vadd.f32 %v4828_v28, %v4735_v44 }
 0x3fa   : > { %v4739_v49 = vpop.f32.mrf.mxu1 }
 0x3fb   : > { %v5145_v46 = vadd.f32 %v8044_v9, %v5113_v0 }
 0x3fd   : > { %v5177_v16 = vmax.f32 %v5145_v46, 0.0 }
 0x3fe   : > { %v4645_v12 = vpop.f32.mrf.mxu0 }
 0x3ff   : > { %5251 = vrot.lane.b32.xlu0 %v5177_v16, %s6386_s28  ;;  %v4833_v22 = vpop.f32.mrf.mxu2  ;;  %v4738_v4 = vadd.f32 %v4737_v1, %v4645_v12 }
 0x400   : > { %v5050_v54 = vpop.f32.mrf.mxu3 }
 0x401   : > { %v5114_v21 = vadd.f32 %v5050_v54, %v4892_v17  ;;  %6083 = vmatmul.msk.bf16.gmra.mxu0 %vm2091_vm1, %v8463_v33  ;;  %v4893_v53 = vadd.f32 %v4831_v26, %v4738_v4 }
 0x402   : > { %v4742_v11 = vpop.f32.mrf.mxu1 }
 0x403   : > { %v5146_v35 = vadd.f32 %v8044_v9, %v5114_v21 }
 0x404   : > { %6117 = vmatmul.msk.bf16.gmra.mxu2 %vm2091_vm1, %v7973_v38  ;;  %6100 = vmatmul.msk.bf16.gmra.mxu1 %vm2091_vm1, %v7079_v8  ;;  %v2035_v8 = vsel %vm7019_vm8, %v5639_v3, %v2034_v27 }
 0x405   : > { %v5178_v29 = vmax.f32 %v5146_v35, 0.0  ;;  %6133 = vmatmul.msk.bf16.gmra.mxu3 %vm2091_vm1, %v4961_v15  ;;  %v4945_v5 = vunpack.c.l.b16 %v2035_v8 }
 0x406   : > { %v4647_v36 = vpop.f32.mrf.mxu0 }
 0x407   : > { %5253 = vrot.lane.b32.xlu1 %v5178_v29, %s6386_s28  ;;  %v4836_v51 = vpop.f32.mrf.mxu2  ;;  %v4740_v39 = vadd.f32 %v4739_v49, %v4647_v36  ;;  %v4962_v1 = vpack.c.b16 %v4946_v62, %v4945_v5 }
 0x408   : > { %v5053_v25 = vpop.f32.mrf.mxu3 }
 0x409   : > { %v5115_v40 = vadd.f32 %v5053_v25, %v4893_v53  ;;  %v5232_v45 = vpop.permute.xlu2 %5231  ;;  %v4894_v28 = vadd.f32 %v4833_v22, %v4740_v39 }
 0x40a   : > { %6135 = vst.msk [vmem:[%s6753_s18 + $0x10] sm:$0xff] %vm3821_vm9, %v5232_v45  ;;  %v4744_v38 = vpop.f32.mrf.mxu1 }
 0x40b   : > { %v5147_v6 = vadd.f32 %v8044_v9, %v5115_v40 }
 0x40d   : > { %v5179_v61 = vmax.f32 %v5147_v6, 0.0 }
 0x40e   : > { %v4650_v42 = vpop.f32.mrf.mxu0 }
 0x40f   : > { %5255 = vrot.lane.b32.xlu2 %v5179_v61, %s6386_s28  ;;  %v4838_v24 = vpop.f32.mrf.mxu2  ;;  %v4743_v48 = vadd.f32 %v4742_v11, %v4650_v42 }
 0x410   : > { %v5055_v50 = vpop.f32.mrf.mxu3 }
 0x411   : > { %v5116_v60 = vadd.f32 %v5055_v50, %v4894_v28  ;;  %6084 = vmatmul.msk.bf16.gmra.mxu0 %vm2091_vm1, %v8464_v58  ;;  %v4895_v41 = vadd.f32 %v4836_v51, %v4743_v48  ;;  %v8320_v48 = vld [vmem:[%s8411_s2] ss:$0 sm:$0xff] }
 0x412   : > { %v4747_v43 = vpop.f32.mrf.mxu1 }
 0x413   : > { %v5148_v47 = vadd.f32 %v8044_v9, %v5116_v60 }
 0x415   : > { %v5180_v34 = vmax.f32 %v5148_v47, 0.0  ;;  %6134 = vmatmul.msk.bf16.gmra.mxu3 %vm2091_vm1, %v4962_v1 }
 0x416   : > { %v4652_v10 = vpop.f32.mrf.mxu0 }
 0x417   : > { %5257 = vrot.lane.b32.xlu0 %v5180_v34, %s6386_s28  ;;  %v4841_v52 = vpop.f32.mrf.mxu2  ;;  %v4745_v19 = vadd.f32 %v4744_v38, %v4652_v10 }
 0x418   : > { %v5058_v59 = vpop.f32.mrf.mxu3 }
 0x419   : > { %v5117_v7 = vadd.f32 %v5058_v59, %v4895_v41  ;;  %v4896_v56 = vadd.f32 %v4838_v24, %v4745_v19 }
 0x41a   : > { %v4749_v30 = vpop.f32.mrf.mxu1 }
 0x41b   : > { %v5149_v13 = vadd.f32 %v8044_v9, %v5117_v7 }
 0x41d   : > { %v5181_v23 = vmax.f32 %v5149_v13, 0.0 }
 0x41e   : > { %v4655_v26 = vpop.f32.mrf.mxu0 }
 0x41f   : > { %5259 = vrot.lane.b32.xlu1 %v5181_v23, %s6386_s28  ;;  %v4843_v0 = vpop.f32.mrf.mxu2  ;;  %v4748_v46 = vadd.f32 %v4747_v43, %v4655_v26 }
 0x420   : > { %v5060_v49 = vpop.f32.mrf.mxu3 }
 0x421   : > { %v5118_v31 = vadd.f32 %v5060_v49, %v4896_v56  ;;  %v5238_v55 = vpop.permute.xlu2 %5237  ;;  %v4897_v37 = vadd.f32 %v4841_v52, %v4748_v46 }
 0x422   : > { %6138 = vst.msk [vmem:[%s6753_s18 + $0x38] sm:$0xff] %vm3821_vm9, %v5238_v55  ;;  %v4752_v44 = vpop.f32.mrf.mxu1 }
 0x423   : > { %v5150_v16 = vadd.f32 %v8044_v9, %v5118_v31 }
 0x425   : > { %v5182_v32 = vmax.f32 %v5150_v16, 0.0 }
 0x426   : > { %v4657_v12 = vpop.f32.mrf.mxu0 }
 0x427   : > { %5261 = vrot.lane.b32.xlu2 %v5182_v32, %s6386_s28  ;;  %v4846_v17 = vpop.f32.mrf.mxu2  ;;  %v4750_v15 = vadd.f32 %v4749_v30, %v4657_v12 }
 0x428   : > { %v5063_v22 = vpop.f32.mrf.mxu3 }
 0x429   : > { %v5119_v54 = vadd.f32 %v5063_v22, %v4897_v37  ;;  %v5234_v21 = vpop.permute.xlu0 %5233  ;;  %v4898_v27 = vadd.f32 %v4843_v0, %v4750_v15 }
 0x42a   : > { %6136 = vst.msk [vmem:[%s6753_s18 + $0x18] sm:$0xff] %vm3821_vm9, %v5234_v21  ;;  %v4754_v4 = vpop.f32.mrf.mxu1 }
 0x42b   : > { %v5151_v33 = vadd.f32 %v8044_v9, %v5119_v54 }
 0x42d   : > { %v5183_v11 = vmax.f32 %v5151_v33, 0.0 }
 0x42e   : > { %v4660_v57 = vpop.f32.mrf.mxu0 }
 0x42f   : > { %5263 = vrot.lane.b32.xlu0 %v5183_v11, %s6386_s28  ;;  %v4848_v35 = vpop.f32.mrf.mxu2  ;;  %v4753_v36 = vadd.f32 %v4752_v44, %v4660_v57 }
 0x430   : > { %v5065_v2 = vpop.f32.mrf.mxu3 }
 0x431   : > { %v5120_v29 = vadd.f32 %v5065_v2, %v4898_v27  ;;  %v5236_v53 = vpop.permute.xlu1 %5235  ;;  %v4899_v63 = vadd.f32 %v4846_v17, %v4753_v36 }
 0x432   : > { %6137 = vst.msk [vmem:[%s6753_s18 + $0x30] sm:$0xff] %vm3821_vm9, %v5236_v53  ;;  %v4757_v3 = vpop.f32.mrf.mxu1 }
 0x433   : > { %v5152_v14 = vadd.f32 %v8044_v9, %v5120_v29 }
 0x435   : > { %v5184_v18 = vmax.f32 %v5152_v14, 0.0 }
 0x436   : > { %v4662_v51 = vpop.f32.mrf.mxu0 }
 0x437   : > { %5265 = vrot.lane.b32.xlu1 %v5184_v18, %s6386_s28  ;;  %v4851_v25 = vpop.f32.mrf.mxu2  ;;  %v4755_v6 = vadd.f32 %v4754_v4, %v4662_v51 }
 0x438   : > { %v5068_v40 = vpop.f32.mrf.mxu3 }
 0x439   : > { %v5121_v45 = vadd.f32 %v5068_v40, %v4899_v63  ;;  %v5244_v38 = vpop.permute.xlu2 %5243  ;;  %v4900_v5 = vadd.f32 %v4848_v35, %v4755_v6 }
 0x43a   : > { %6141 = vst.msk [vmem:[%s6753_s18 + $0x70] sm:$0xff] %vm3821_vm9, %v5244_v38  ;;  %v4759_v8 = vpop.f32.mrf.mxu1 }
 0x43b   : > { %v5153_v20 = vadd.f32 %v8044_v9, %v5121_v45 }
 0x43d   : > { %v5185_v39 = vmax.f32 %v5153_v20, 0.0 }
 0x43e   : > { %v4665_v61 = vpop.f32.mrf.mxu0 }
 0x43f   : > { %5267 = vrot.lane.b32.xlu2 %v5185_v39, %s6386_s28  ;;  %v4853_v62 = vpop.f32.mrf.mxu2  ;;  %v4758_v50 = vadd.f32 %v4757_v3, %v4665_v61 }
 0x440   : > { %v5070_v42 = vpop.f32.mrf.mxu3 }
 0x441   : > { %v5122_v28 = vadd.f32 %v5070_v42, %v4900_v5  ;;  %v5240_v24 = vpop.permute.xlu0 %5239  ;;  %v4901_v1 = vadd.f32 %v4851_v25, %v4758_v50 }
 0x442   : > { %6139 = vst.msk [vmem:[%s6753_s18 + $0x50] sm:$0xff] %vm3821_vm9, %v5240_v24  ;;  %v4762_v60 = vpop.f32.mrf.mxu1 }
 0x443   : > { %v5154_v9 = vadd.f32 %v8320_v48, %v5122_v28 }
 0x445   : > { %v5186_v58 = vmax.f32 %v5154_v9, 0.0 }
 0x446   : > { %v4667_v43 = vpop.f32.mrf.mxu0 }
 0x447   : > { %5269 = vrot.lane.b32.xlu0 %v5186_v58, %s6386_s28  ;;  %v4856_v47 = vpop.f32.mrf.mxu2  ;;  %v4760_v7 = vadd.f32 %v4759_v8, %v4667_v43 }
 0x448   : > { %v5073_v34 = vpop.f32.mrf.mxu3 }
 0x449   : > { %v5123_v41 = vadd.f32 %v5073_v34, %v4901_v1  ;;  %v5242_v10 = vpop.permute.xlu1 %5241  ;;  %v4902_v19 = vadd.f32 %v4853_v62, %v4760_v7 }
 0x44a   : > { %6140 = vst.msk [vmem:[%s6753_s18 + $0x58] sm:$0xff] %vm3821_vm9, %v5242_v10  ;;  %v4764_v52 = vpop.f32.mrf.mxu1 }
 0x44b   : > { %v5155_v59 = vadd.f32 %v8320_v48, %v5123_v41 }
 0x44d   : > { %v5187_v30 = vmax.f32 %v5155_v59, 0.0 }
 0x44e   : > { %v4670_v13 = vpop.f32.mrf.mxu0 }
 0x44f   : > { %5271 = vrot.lane.b32.xlu1 %v5187_v30, %s6386_s28  ;;  %v4858_v23 = vpop.f32.mrf.mxu2  ;;  %v4763_v49 = vadd.f32 %v4762_v60, %v4670_v13 }
 0x450   : > { %v5075_v26 = vpop.f32.mrf.mxu3 }
 0x451   : > { %v5124_v56 = vadd.f32 %v5075_v26, %v4902_v19  ;;  %v5250_v0 = vpop.permute.xlu2 %5249  ;;  %v4903_v44 = vadd.f32 %v4856_v47, %v4763_v49 }
 0x452   : > { %6144 = vst.msk [vmem:[%s6753_s18 + $0x98] sm:$0xff] %vm3821_vm9, %v5250_v0  ;;  %v4767_v55 = vpop.f32.mrf.mxu1 }
 0x453   : > { %v5156_v31 = vadd.f32 %v8320_v48, %v5124_v56 }
 0x455   : > { %v5188_v46 = vmax.f32 %v5156_v31, 0.0 }
 0x456   : > { %v4672_v16 = vpop.f32.mrf.mxu0 }
 0x457   : > { %5273 = vrot.lane.b32.xlu2 %v5188_v46, %s6386_s28  ;;  %v4861_v37 = vpop.f32.mrf.mxu2  ;;  %v4765_v54 = vadd.f32 %v4764_v52, %v4672_v16 }
 0x458   : > { %v5078_v32 = vpop.f32.mrf.mxu3 }
 0x459   : > { %v5125_v12 = vadd.f32 %v5078_v32, %v4903_v44  ;;  %v5246_v17 = vpop.permute.xlu0 %5245  ;;  %v4904_v15 = vadd.f32 %v4858_v23, %v4765_v54 }
 0x45a   : > { %6142 = vst.msk [vmem:[%s6753_s18 + $0x78] sm:$0xff] %vm3821_vm9, %v5246_v17  ;;  %v4769_v33 = vpop.f32.mrf.mxu1 }
 0x45b   : > { %v5157_v22 = vadd.f32 %v8320_v48, %v5125_v12 }
 0x45d   : > { %v5189_v21 = vmax.f32 %v5157_v22, 0.0 }
 0x45e   : > { %v4675_v4 = vpop.f32.mrf.mxu0 }
 0x45f   : > { %5275 = vrot.lane.b32.xlu0 %v5189_v21, %s6386_s28  ;;  %v4768_v35 = vadd.f32 %v4767_v55, %v4675_v4  ;;  %v4863_v2 = vpop.f32.mrf.mxu2 }
 0x460   : > { %v5080_v11 = vpop.f32.mrf.mxu3 }
 0x461   : > { %v5126_v57 = vadd.f32 %v5080_v11, %v4904_v15  ;;  %v5248_v27 = vpop.permute.xlu1 %5247  ;;  %v4905_v36 = vadd.f32 %v4861_v37, %v4768_v35 }
 0x462   : > { %6143 = vst.msk [vmem:[%s6753_s18 + $0x90] sm:$0xff] %vm3821_vm9, %v5248_v27  ;;  %v4772_v18 = vpop.f32.mrf.mxu1 }
 0x463   : > { %v5158_v29 = vadd.f32 %v8320_v48, %v5126_v57 }
 0x465   : > { %v5190_v53 = vmax.f32 %v5158_v29, 0.0 }
 0x466   : > { %v4677_v3 = vpop.f32.mrf.mxu0 }
 0x467   : > { %5277 = vrot.lane.b32.xlu1 %v5190_v53, %s6386_s28  ;;  %v4770_v40 = vadd.f32 %v4769_v33, %v4677_v3  ;;  %v4866_v45 = vpop.f32.mrf.mxu2 }
 0x468   : > { %v5083_v14 = vpop.f32.mrf.mxu3 }
 0x469   : > { %v5127_v63 = vadd.f32 %v5083_v14, %v4905_v36  ;;  %v5256_v51 = vpop.permute.xlu2 %5255  ;;  %v4906_v20 = vadd.f32 %v4863_v2, %v4770_v40 }
 0x46a   : > { %6147 = vst.msk [vmem:[%s6753_s18 + $0xd0] sm:$0xff] %vm3821_vm9, %v5256_v51  ;;  %v4774_v62 = vpop.f32.mrf.mxu1 }
 0x46b   : > { %v5159_v25 = vadd.f32 %v8320_v48, %v5127_v63 }
 0x46d   : > { %v5191_v38 = vmax.f32 %v5159_v25, 0.0 }
 0x46e   : > { %v4680_v8 = vpop.f32.mrf.mxu0 }
 0x46f   : > { %5279 = vrot.lane.b32.xlu2 %v5191_v38, %s6386_s28  ;;  %v4773_v5 = vadd.f32 %v4772_v18, %v4680_v8  ;;  %v4868_v50 = vpop.f32.mrf.mxu2 }
 0x470   : > { %v5085_v6 = vpop.f32.mrf.mxu3 }
 0x471   : > { %v5128_v39 = vadd.f32 %v5085_v6, %v4906_v20  ;;  %v5252_v61 = vpop.permute.xlu0 %5251  ;;  %v4907_v24 = vadd.f32 %v4866_v45, %v4773_v5 }
 0x472   : > { %6145 = vst.msk [vmem:[%s6753_s18 + $0xb0] sm:$0xff] %vm3821_vm9, %v5252_v61  ;;  %v4777_v34 = vpop.f32.mrf.mxu1 }
 0x473   : > { %v5160_v42 = vadd.f32 %v8320_v48, %v5128_v39 }
 0x475   : > { %v5192_v28 = vmax.f32 %v5160_v42, 0.0 }
 0x476   : > { %v4682_v60 = vpop.f32.mrf.mxu0 }
 0x477   : > { %5281 = vrot.lane.b32.xlu0 %v5192_v28, %s6386_s28  ;;  %v4775_v47 = vadd.f32 %v4774_v62, %v4682_v60  ;;  %v4871_v59 = vpop.f32.mrf.mxu2 }
 0x478   : > { %v5088_v9 = vpop.f32.mrf.mxu3 }
 0x479   : > { %v5129_v58 = vadd.f32 %v5088_v9, %v4907_v24  ;;  %v5254_v1 = vpop.permute.xlu1 %5253  ;;  %v4908_v52 = vadd.f32 %v4868_v50, %v4775_v47 }
 0x47a   : > { %6146 = vst.msk [vmem:[%s6753_s18 + $0xb8] sm:$0xff] %vm3821_vm9, %v5254_v1  ;;  %v4779_v0 = vpop.f32.mrf.mxu1 }
 0x47b   : > { %v5161_v43 = vadd.f32 %v8320_v48, %v5129_v58 }
 0x47d   : > { %v5193_v41 = vmax.f32 %v5161_v43, 0.0 }
 0x47e   : > { %v4685_v10 = vpop.f32.mrf.mxu0 }
 0x47f   : > { %5283 = vrot.lane.b32.xlu1 %v5193_v41, %s6386_s28  ;;  %v4778_v19 = vadd.f32 %v4777_v34, %v4685_v10  ;;  %v4873_v44 = vpop.f32.mrf.mxu2 }
 0x480   : > { %v5090_v7 = vpop.f32.mrf.mxu3 }
 0x481   : > { %v5130_v30 = vadd.f32 %v5090_v7, %v4908_v52  ;;  %v5262_v13 = vpop.permute.xlu2 %5261  ;;  %v4909_v56 = vadd.f32 %v4871_v59, %v4778_v19 }
 0x482   : > { %6150 = vst.msk [vmem:[%s6753_s18 + $0xf8] sm:$0xff] %vm3821_vm9, %v5262_v13  ;;  %v4782_v22 = vpop.f32.mrf.mxu1 }
 0x483   : > { %v5162_v23 = vadd.f32 %v8320_v48, %v5130_v30 }
 0x485   : > { %v5194_v26 = vmax.f32 %v5162_v23, 0.0 }
 0x486   : > { %v4687_v49 = vpop.f32.mrf.mxu0 }
 0x487   : > { %5285 = vrot.lane.b32.xlu2 %v5194_v26, %s6386_s28  ;;  %v4780_v32 = vadd.f32 %v4779_v0, %v4687_v49  ;;  %v4876_v11 = vpop.f32.mrf.mxu2 }
 0x488   : > { %v5093_v31 = vpop.f32.mrf.mxu3 }
 0x489   : > { %v5131_v55 = vadd.f32 %v5093_v31, %v4909_v56  ;;  %v5258_v46 = vpop.permute.xlu0 %5257  ;;  %v4910_v17 = vadd.f32 %v4873_v44, %v4780_v32 }
 0x48a   : > { %6148 = vst.msk [vmem:[%s6753_s18 + $0xd8] sm:$0xff] %vm3821_vm9, %v5258_v46  ;;  %v4784_v36 = vpop.f32.mrf.mxu1 }
 0x48b   : > { %v5163_v16 = vadd.f32 %v8320_v48, %v5131_v55 }
 0x48d   : > { %v5195_v37 = vmax.f32 %v5163_v16, 0.0 }
 0x48e   : > { %v4690_v12 = vpop.f32.mrf.mxu0 }
 0x48f   : > { %5287 = vrot.lane.b32.xlu0 %v5195_v37, %s6386_s28  ;;  %v4783_v33 = vadd.f32 %v4782_v22, %v4690_v12  ;;  %v4878_v63 = vpop.f32.mrf.mxu2 }
 0x490   : > { %v5095_v54 = vpop.f32.mrf.mxu3 }
 0x491   : > { %v5132_v21 = vadd.f32 %v5095_v54, %v4910_v17  ;;  %v5260_v4 = vpop.permute.xlu1 %5259  ;;  %v4911_v27 = vadd.f32 %v4876_v11, %v4783_v33 }
 0x492   : > { %6149 = vst.msk [vmem:[%s6753_s18 + $0xf0] sm:$0xff] %vm3821_vm9, %v5260_v4 }
 0x493   : > { %v5164_v15 = vadd.f32 %v8320_v48, %v5132_v21 }
 0x495   : > { %v5196_v57 = vmax.f32 %v5164_v15, 0.0 }
 0x496   : > { %v4692_v2 = vpop.f32.mrf.mxu0 }
 0x497   : > { %5289 = vrot.lane.b32.xlu1 %v5196_v57, %s6386_s28  ;;  %v4785_v14 = vadd.f32 %v4784_v36, %v4692_v2 }
 0x498   : > { %v5098_v35 = vpop.f32.mrf.mxu3 }
 0x499   : > { %v5133_v29 = vadd.f32 %v5098_v35, %v4911_v27  ;;  %v5268_v53 = vpop.permute.xlu2 %5267  ;;  %v4912_v51 = vadd.f32 %v4878_v63, %v4785_v14 }
 0x49a   : > { %6153 = vst.msk [vmem:[%s6753_s18 + $0x130] sm:$0xff] %vm3821_vm9, %v5268_v53 }
 0x49b   : > { %v5165_v3 = vadd.f32 %v8320_v48, %v5133_v29 }
 0x49d   : > { %v5197_v18 = vmax.f32 %v5165_v3, 0.0 }
 0x49f   : > { %5291 = vrot.lane.b32.xlu2 %v5197_v18, %s6386_s28 }
 0x4a0   : > { %v5100_v25 = vpop.f32.mrf.mxu3 }
 0x4a1   : > { %v5134_v40 = vadd.f32 %v5100_v25, %v4912_v51  ;;  %v5264_v45 = vpop.permute.xlu0 %5263 }
 0x4a2   : > { %6151 = vst.msk [vmem:[%s6753_s18 + $0x110] sm:$0xff] %vm3821_vm9, %v5264_v45 }
 0x4a3   : > { %v5166_v38 = vadd.f32 %v8320_v48, %v5134_v40 }
 0x4a5   : > { %v5198_v8 = vmax.f32 %v5166_v38, 0.0 }
 0x4a7   : > { %5293 = vrot.lane.b32.xlu0 %v5198_v8, %s6386_s28 }
 0x4a9   : > { %v5266_v20 = vpop.permute.xlu1 %5265 }
 0x4aa   : > { %6152 = vst.msk [vmem:[%s6753_s18 + $0x118] sm:$0xff] %vm3821_vm9, %v5266_v20 }
 0x4b1   : > { %v5274_v6 = vpop.permute.xlu2 %5273 }
 0x4b2   : > { %6156 = vst.msk [vmem:[%s6753_s18 + $0x158] sm:$0xff] %vm3821_vm9, %v5274_v6 }
 0x4b9   : > { %v5270_v39 = vpop.permute.xlu0 %5269 }
 0x4ba   : > { %6154 = vst.msk [vmem:[%s6753_s18 + $0x138] sm:$0xff] %vm3821_vm9, %v5270_v39 }
 0x4c1   : > { %v5272_v61 = vpop.permute.xlu1 %5271 }
 0x4c2   : > { %6155 = vst.msk [vmem:[%s6753_s18 + $0x150] sm:$0xff] %vm3821_vm9, %v5272_v61 }
 0x4c9   : > { %v5280_v48 = vpop.permute.xlu2 %5279 }
 0x4ca   : > { %6159 = vst.msk [vmem:[%s6753_s18 + $0x190] sm:$0xff] %vm3821_vm9, %v5280_v48 }
 0x4d1   : > { %v5276_v5 = vpop.permute.xlu0 %5275 }
 0x4d2   : > { %6157 = vst.msk [vmem:[%s6753_s18 + $0x170] sm:$0xff] %vm3821_vm9, %v5276_v5 }
 0x4d9   : > { %v5278_v62 = vpop.permute.xlu1 %5277 }
 0x4da   : > { %6158 = vst.msk [vmem:[%s6753_s18 + $0x178] sm:$0xff] %vm3821_vm9, %v5278_v62 }
 0x4e1   : > { %v5286_v42 = vpop.permute.xlu2 %5285 }
 0x4e2   : > { %6162 = vst.msk [vmem:[%s6753_s18 + $0x1b8] sm:$0xff] %vm3821_vm9, %v5286_v42 }
 0x4e9   : > { %v5282_v28 = vpop.permute.xlu0 %5281 }
 0x4ea   : > { %6160 = vst.msk [vmem:[%s6753_s18 + $0x198] sm:$0xff] %vm3821_vm9, %v5282_v28 }
 0x4f1   : > { %v5284_v24 = vpop.permute.xlu1 %5283 }
 0x4f2   : > { %6161 = vst.msk [vmem:[%s6753_s18 + $0x1b0] sm:$0xff] %vm3821_vm9, %v5284_v24 }
 0x4f9   : > { %v5292_v50 = vpop.permute.xlu2 %5291 }
 0x4fa   : > { %6165 = vst.msk [vmem:[%s6753_s18 + $0x1f0] sm:$0xff] %vm3821_vm9, %v5292_v50 }
 0x501   : > { %v5288_v60 = vpop.permute.xlu0 %5287 }
 0x502   : > { %6163 = vst.msk [vmem:[%s6753_s18 + $0x1d0] sm:$0xff] %vm3821_vm9, %v5288_v60 }
 0x509   : > { %v5290_v9 = vpop.permute.xlu1 %5289 }
 0x50a   : > { %6164 = vst.msk [vmem:[%s6753_s18 + $0x1d8] sm:$0xff] %vm3821_vm9, %v5290_v9 }
 0x519   : > { %v5294_v58 = vpop.permute.xlu0 %5293 }
 0x51a   : > { %6166 = vst.msk [vmem:[%s6753_s18 + $0x1f8] sm:$0xff] %vm3821_vm9, %v5294_v58 }
 0x51b PF: > { %s13_s14 = sadd.s32 1, %s6384_s14   ;;  %s8465_s12 = smov %s6380_s13 }
 0x51c   : > { %p10_p5 = scmp.ge.s32.totalorder %s13_s14, 4   ;;  %s8466_s13 = smov %s8468_s15 }
 0x51e   :  { %12 = sbr.rel (!%p10_p5) target bundleno = 2 (0x2), region = 81 }

</bundles_post_ra>
